<compile_context>
chip_gen: v7x
topology: tpu7x:2x2x1
jax: 0.10.0
libtpu: 0.0.40
codegen_flags: <defaults>
</compile_context>

<pallas_src>
import numpy as np
import jax
import jax.numpy as jnp
from jax.experimental import pallas as pl
from jax.experimental.pallas import tpu as pltpu


def _round_up(x, m):
    return ((x + m - 1) // m) * m


def _pick_block_steps(max_len, requested):
    ts = max(1, min(requested, max_len))
    while max_len % ts:
        ts -= 1
    return ts


def make_gru_decoder_kernel(n_layers, h_pad, v_pad, b_pad, ts):
    """Builds the per-grid-step kernel (grid = (max_len // ts,))."""

    def kernel(emb_ref, wg_ref, bg_ref, wout_ref, bout_ref, h0_ref,
               logits_ref, hT_ref, lhs_scr):
        # emb_ref   : [Vp, Hp]        bf16 embedding table (zero padded)
        # wg_ref    : [L, 2Hp, 4Hp]   bf16 fused gate weights (lane slots r|z|i_n|h_n)
        # bg_ref    : [L, 1, 4Hp]     f32 fused gate biases   (r/z pre-summed)
        # wout_ref  : [Hp, Vp]        bf16 output projection
        # bout_ref  : [1, Vp]         f32 output bias (pad lanes = -1e30)
        # h0_ref    : [L, Bp, Hp]     f32 encoder context (initial hidden)
        # logits_ref: [TS, Bp, Vp]    f32 this block's logits
        # hT_ref    : [L, Bp, Hp]     f32 resident hidden-state carry / final output
        # lhs_scr   : [Bp, 2Hp]       bf16 persistent MXU LHS ([input | h_prev])
        t = pl.program_id(0)

        @pl.when(t == 0)
        def _init():
            hT_ref[...] = h0_ref[...]
            # first decoder input: embedding of SOS token (id 0)
            lhs_scr[:, :h_pad] = jnp.broadcast_to(emb_ref[0:1, :],
                                                  (b_pad, h_pad))

        # hoisted loop-invariant iota (broadcast_in_dim is not CSE'd)
        col = jax.lax.broadcasted_iota(jnp.int32, (b_pad, v_pad), 1)

        def step(s, carry):
            h_top = None
            for l in range(n_layers):                    # static unroll (L small)
                h_prev = hT_ref[l]                       # [Bp, Hp] f32
                lhs_scr[:, h_pad:] = h_prev.astype(jnp.bfloat16)
                # single fused MXU push per (step, layer)
                g = jnp.dot(lhs_scr[...], wg_ref[l],
                            preferred_element_type=jnp.float32) + bg_ref[l]
                r = jax.nn.sigmoid(g[:, 0 * h_pad:1 * h_pad])       # i_r+h_r (+b)
                z = jax.nn.sigmoid(g[:, 1 * h_pad:2 * h_pad])       # i_z+h_z (+b)
                n = jnp.tanh(g[:, 2 * h_pad:3 * h_pad]              # i_n + r*h_n
                             + r * g[:, 3 * h_pad:4 * h_pad])
                h_new = (1.0 - z) * n + z * h_prev                  # f32 gate math
                hT_ref[l] = h_new
                if l + 1 < n_layers:
                    lhs_scr[:, :h_pad] = h_new.astype(jnp.bfloat16)
                h_top = h_new

            logits = jnp.dot(h_top.astype(jnp.bfloat16), wout_ref[...],
                             preferred_element_type=jnp.float32) + bout_ref[...]
            logits_ref[s] = logits                       # lane-dense [Bp, Vp] store

            # greedy decoding: next input = Emb[argmax(logits)] (first-max index).
            mx = jnp.max(logits, axis=-1, keepdims=True)
            idx = jnp.min(jnp.where(logits >= mx, col, v_pad),
                          axis=-1, keepdims=True)        # [Bp, 1]
            onehot = (col == idx).astype(jnp.bfloat16)   # [Bp, Vp]
            x = jnp.dot(onehot, emb_ref[...],
                        preferred_element_type=jnp.float32)  # exact bf16 row
            lhs_scr[:, :h_pad] = x.astype(jnp.bfloat16)
            return carry

        jax.lax.fori_loop(0, ts, step, 0, unroll=True)

    return kernel


def _prepare_params(emb, wih, whh, bih, bhh, wout, bout, h_pad, v_pad):
    """Host-side packing: fuse / lane-pad weights, pre-sum r/z biases, bf16 cast."""
    V, H = emb.shape
    L = wih.shape[0]

    emb_p = jnp.zeros((v_pad, h_pad), jnp.float32)
    emb_p = emb_p.at[:V, :H].set(emb).astype(jnp.bfloat16)

    wih_t = jnp.transpose(wih, (0, 2, 1))   # [L, H, 3H]  (in, out), gate order r,z,n
    whh_t = jnp.transpose(whh, (0, 2, 1))   # [L, H, 3H]

    wg = jnp.zeros((L, 2 * h_pad, 4 * h_pad), jnp.float32)
    # rows 0:H  <- input path
    wg = wg.at[:, :H, 0 * h_pad:0 * h_pad + H].set(wih_t[:, :, 0:H])          # r
    wg = wg.at[:, :H, 1 * h_pad:1 * h_pad + H].set(wih_t[:, :, H:2 * H])      # z
    wg = wg.at[:, :H, 2 * h_pad:2 * h_pad + H].set(wih_t[:, :, 2 * H:3 * H])  # i_n
    # rows Hp:Hp+H <- hidden path
    wg = wg.at[:, h_pad:h_pad + H, 0 * h_pad:0 * h_pad + H].set(whh_t[:, :, 0:H])
    wg = wg.at[:, h_pad:h_pad + H, 1 * h_pad:1 * h_pad + H].set(whh_t[:, :, H:2 * H])
    wg = wg.at[:, h_pad:h_pad + H, 3 * h_pad:3 * h_pad + H].set(whh_t[:, :, 2 * H:3 * H])
    wg = wg.astype(jnp.bfloat16)

    bg = jnp.zeros((L, 1, 4 * h_pad), jnp.float32)
    bg = bg.at[:, 0, 0 * h_pad:0 * h_pad + H].set(bih[:, 0:H] + bhh[:, 0:H])          # r
    bg = bg.at[:, 0, 1 * h_pad:1 * h_pad + H].set(bih[:, H:2 * H] + bhh[:, H:2 * H])  # z
    bg = bg.at[:, 0, 2 * h_pad:2 * h_pad + H].set(bih[:, 2 * H:3 * H])                # i_n
    bg = bg.at[:, 0, 3 * h_pad:3 * h_pad + H].set(bhh[:, 2 * H:3 * H])                # h_n

    wout_p = jnp.zeros((h_pad, v_pad), jnp.float32)
    wout_p = wout_p.at[:H, :V].set(wout.T).astype(jnp.bfloat16)

    bout_p = jnp.full((1, v_pad), -1e30, jnp.float32)       # pad lanes lose argmax
    bout_p = bout_p.at[0, :V].set(bout)

    return emb_p, wg, bg, wout_p, bout_p


def decoder_forward(context, emb, wih, whh, bih, bhh, wout, bout, *,
                    max_len, block_steps=4):
    L, B, H = context.shape
    V = emb.shape[0]
    h_pad = _round_up(H, 128)
    v_pad = _round_up(V, 128)
    b_pad = _round_up(B, 8)                                # full f32 sublane tile
    ts = _pick_block_steps(max_len, block_steps)           # decode steps / grid step

    emb_p, wg, bg, wout_p, bout_p = _prepare_params(
        emb, wih, whh, bih, bhh, wout, bout, h_pad, v_pad)
    h0_p = jnp.zeros((L, b_pad, h_pad), jnp.float32).at[:, :B, :H].set(context)

    kernel = make_gru_decoder_kernel(L, h_pad, v_pad, b_pad, ts)
    const3 = lambda t: (0, 0, 0)
    const2 = lambda t: (0, 0)

    logits_p, hT_p = pl.pallas_call(
        kernel,
        out_shape=(jax.ShapeDtypeStruct((max_len, b_pad, v_pad), jnp.float32),
                   jax.ShapeDtypeStruct((L, b_pad, h_pad), jnp.float32)),
        grid=(max_len // ts,),
        in_specs=[
            pl.BlockSpec((v_pad, h_pad), const2),               # emb   (resident)
            pl.BlockSpec((L, 2 * h_pad, 4 * h_pad), const3),    # fused gate W
            pl.BlockSpec((L, 1, 4 * h_pad), const3),            # fused gate b
            pl.BlockSpec((h_pad, v_pad), const2),               # wout
            pl.BlockSpec((1, v_pad), const2),                   # bout
            pl.BlockSpec((L, b_pad, h_pad), const3),            # h0
        ],
        out_specs=(
            pl.BlockSpec((ts, b_pad, v_pad), lambda t: (t, 0, 0)),  # TS-step logits
            pl.BlockSpec((L, b_pad, h_pad), const3),                # hidden carry / hT
        ),
        scratch_shapes=[pltpu.VMEM((b_pad, 2 * h_pad), jnp.bfloat16)],  # fused MXU LHS
        input_output_aliases={5: 1},     # reuse the h0 HBM buffer for hT output
        compiler_params=pltpu.CompilerParams(
            dimension_semantics=("arbitrary",),
            vmem_limit_bytes=32 * 1024 * 1024),
    )(emb_p, wg, bg, wout_p, bout_p, h0_p)

    return logits_p[:, :B, :V], hT_p[:, :B, :H]


def decoder_reference(context, emb, wih, whh, bih, bhh, wout, bout, max_len):
    """Pure-JAX reference (mirrors the kernel's bf16 MXU-ingest numerics)."""
    L, B, H = context.shape
    bf, f32 = jnp.bfloat16, jnp.float32
    wih_t = jnp.transpose(wih, (0, 2, 1)).astype(bf)
    whh_t = jnp.transpose(whh, (0, 2, 1)).astype(bf)
    wout_t = wout.T.astype(bf)
    hs = [context[l] for l in range(L)]
    x = jnp.broadcast_to(emb[0:1, :], (B, H))
    logits_all = []
    for _ in range(max_len):
        inp = x
        for l in range(L):
            h_prev = hs[l]
            gi = jnp.dot(inp.astype(bf), wih_t[l], preferred_element_type=f32) + bih[l]
            gh = jnp.dot(h_prev.astype(bf), whh_t[l], preferred_element_type=f32) + bhh[l]
            i_r, i_z, i_n = gi[:, :H], gi[:, H:2 * H], gi[:, 2 * H:]
            h_r, h_z, h_n = gh[:, :H], gh[:, H:2 * H], gh[:, 2 * H:]
            r = jax.nn.sigmoid(i_r + h_r)
            z = jax.nn.sigmoid(i_z + h_z)
            n = jnp.tanh(i_n + r * h_n)
            h_new = (1.0 - z) * n + z * h_prev
            hs[l] = h_new
            inp = h_new
        logits = jnp.dot(inp.astype(bf), wout_t, preferred_element_type=f32) + bout
        logits_all.append(logits)
        x = emb[jnp.argmax(logits, axis=-1)]
    return jnp.stack(logits_all, axis=0), jnp.stack(hs, axis=0)


if __name__ == "__main__":
    # small, module-consistent shapes
    B, H, V, L, T = 2, 32, 50, 2, 8   # batch, hidden, target vocab, n_layers, max_target_length

    key = jax.random.PRNGKey(0)
    ks = jax.random.split(key, 8)
    scale = 1.0 / np.sqrt(H)

    emb = jax.random.normal(ks[0], (V, H), jnp.float32)
    wih = jax.random.uniform(ks[1], (L, 3 * H, H), jnp.float32, -scale, scale)
    whh = jax.random.uniform(ks[2], (L, 3 * H, H), jnp.float32, -scale, scale)
    bih = jax.random.uniform(ks[3], (L, 3 * H), jnp.float32, -scale, scale)
    bhh = jax.random.uniform(ks[4], (L, 3 * H), jnp.float32, -scale, scale)
    wout = jax.random.uniform(ks[5], (V, H), jnp.float32, -scale, scale)
    bout = jax.random.uniform(ks[6], (V,), jnp.float32, -scale, scale)
    context = jax.random.normal(ks[7], (L, B, H), jnp.float32)

    logits, h_final = decoder_forward(
        context, emb, wih, whh, bih, bhh, wout, bout, max_len=T, block_steps=4)
    jax.block_until_ready((logits, h_final))

    logits_ref, h_ref = decoder_reference(
        context, emb, wih, whh, bih, bhh, wout, bout, T)

    assert logits.shape == (T, B, V) and h_final.shape == (L, B, H)
    assert np.allclose(np.asarray(logits), np.asarray(logits_ref),
                       rtol=1e-2, atol=1e-2)
    assert np.allclose(np.asarray(h_final), np.asarray(h_ref),
                       rtol=1e-2, atol=1e-2)

    print("KERNEL_OK")
</pallas_src>

<mosaic_0001>
module attributes {stable_mosaic.version = 11 : i64} {
  func.func @kernel(%arg0: i32, %arg1: memref<128x128xbf16, #tpu.memory_space<vmem>>, %arg2: memref<2x256x512xbf16, #tpu.memory_space<vmem>>, %arg3: memref<2x1x512xf32, #tpu.memory_space<vmem>>, %arg4: memref<128x128xbf16, #tpu.memory_space<vmem>>, %arg5: memref<1x128xf32, #tpu.memory_space<vmem>>, %arg6: memref<2x8x128xf32, #tpu.memory_space<vmem>>, %arg7: memref<4x8x128xf32, #tpu.memory_space<vmem>>, %arg8: memref<2x8x128xf32, #tpu.memory_space<vmem>>, %arg9: memref<8x256xbf16, #tpu.memory_space<vmem>>) attributes {dimension_semantics = [#tpu.dimension_semantics<arbitrary>], iteration_bounds = array<i64: 2>, scalar_prefetch = 0 : i64, scratch_operands = 1 : i64, tpu.core_type = #tpu.core_type<tc>, window_params = [{pipeline_mode = #tpu.pipeline_mode<synchronous>, transform_indices = @transform_0, window_bounds = array<i64: 128, 128>}, {pipeline_mode = #tpu.pipeline_mode<synchronous>, transform_indices = @transform_1, window_bounds = array<i64: 2, 256, 512>}, {pipeline_mode = #tpu.pipeline_mode<synchronous>, transform_indices = @transform_2, window_bounds = array<i64: 2, 1, 512>}, {pipeline_mode = #tpu.pipeline_mode<synchronous>, transform_indices = @transform_3, window_bounds = array<i64: 128, 128>}, {pipeline_mode = #tpu.pipeline_mode<synchronous>, transform_indices = @transform_4, window_bounds = array<i64: 1, 128>}, {pipeline_mode = #tpu.pipeline_mode<synchronous>, transform_indices = @transform_5, window_bounds = array<i64: 2, 8, 128>}, {transform_indices = @transform_6, window_bounds = array<i64: 4, 8, 128>}, {pipeline_mode = #tpu.pipeline_mode<synchronous>, transform_indices = @transform_7, window_bounds = array<i64: 2, 8, 128>}]} {
    %c0_i32 = arith.constant 0 : i32
    %0 = arith.cmpi eq, %arg0, %c0_i32 : i32
    %1 = arith.extui %0 : i1 to i32
    %c0_i32_0 = arith.constant 0 : i32
    %2 = arith.cmpi ne, %1, %c0_i32_0 : i32
    scf.if %2 {
      %c0_225 = arith.constant 0 : index
      %c0_226 = arith.constant 0 : index
      %c0_227 = arith.constant 0 : index
      %416 = vector.load %arg6[%c0_225, %c0_226, %c0_227] : memref<2x8x128xf32, #tpu.memory_space<vmem>>, vector<2x8x128xf32>
      %c0_228 = arith.constant 0 : index
      %c0_229 = arith.constant 0 : index
      %c0_230 = arith.constant 0 : index
      %417 = vector.load %arg8[%c0_228, %c0_229, %c0_230] : memref<2x8x128xf32, #tpu.memory_space<vmem>>, vector<2x8x128xf32>
      tpu.vector_store %arg8[%c0_228, %c0_229, %c0_230], %416 {strides = array<i32>} : memref<2x8x128xf32, #tpu.memory_space<vmem>>, vector<2x8x128xf32>,
      %c0_231 = arith.constant 0 : index
      %c0_232 = arith.constant 0 : index
      %418 = vector.load %arg1[%c0_231, %c0_232] : memref<128x128xbf16, #tpu.memory_space<vmem>>, vector<1x128xbf16>
      %419 = vector.shape_cast %418 : vector<1x128xbf16> to vector<1x128xbf16>
      %420 = vector.broadcast %419 : vector<1x128xbf16> to vector<8x128xbf16>
      %c0_233 = arith.constant 0 : index
      %c0_234 = arith.constant 0 : index
      %421 = vector.load %arg9[%c0_233, %c0_234] : memref<8x256xbf16, #tpu.memory_space<vmem>>, vector<8x128xbf16>
      tpu.vector_store %arg9[%c0_233, %c0_234], %420 {strides = array<i32>} : memref<8x256xbf16, #tpu.memory_space<vmem>>, vector<8x128xbf16>,
    } else {
    }
    %3 = tpu.iota {dimensions = array<i32: 1>} : vector<8x128xi32>
    %c0_i32_1 = arith.constant 0 : i32
    %c0 = arith.constant 0 : index
    %c0_2 = arith.constant 0 : index
    %c0_3 = arith.constant 0 : index
    %4 = vector.load %arg8[%c0, %c0_2, %c0_3] : memref<2x8x128xf32, #tpu.memory_space<vmem>>, vector<1x8x128xf32>
    %5 = vector.shape_cast %4 : vector<1x8x128xf32> to vector<8x128xf32>
    %6 = arith.truncf %5 : vector<8x128xf32> to vector<8x128xbf16>
    %c0_4 = arith.constant 0 : index
    %c128 = arith.constant 128 : index
    %7 = vector.load %arg9[%c0_4, %c128] : memref<8x256xbf16, #tpu.memory_space<vmem>>, vector<8x128xbf16>
    tpu.vector_store %arg9[%c0_4, %c128], %6 {strides = array<i32>} : memref<8x256xbf16, #tpu.memory_space<vmem>>, vector<8x128xbf16>,
    %c0_5 = arith.constant 0 : index
    %c0_6 = arith.constant 0 : index
    %8 = vector.load %arg9[%c0_5, %c0_6] : memref<8x256xbf16, #tpu.memory_space<vmem>>, vector<8x256xbf16>
    %c0_7 = arith.constant 0 : index
    %c0_8 = arith.constant 0 : index
    %c0_9 = arith.constant 0 : index
    %9 = vector.load %arg2[%c0_7, %c0_8, %c0_9] : memref<2x256x512xbf16, #tpu.memory_space<vmem>>, vector<1x256x512xbf16>
    %10 = vector.shape_cast %9 : vector<1x256x512xbf16> to vector<256x512xbf16>
    %cst = arith.constant dense<0.000000e+00> : vector<8x512xf32>
    %11 = tpu.matmul %8, %10, %cst {dimension_numbers = #tpu.dot_dimension_numbers<[1], [0], [0], [1], [0, 0, 1, 1], [], []>} : vector<8x256xbf16>, vector<256x512xbf16>, vector<8x512xf32> -> vector<8x512xf32>
    %c0_10 = arith.constant 0 : index
    %c0_11 = arith.constant 0 : index
    %c0_12 = arith.constant 0 : index
    %12 = vector.load %arg3[%c0_10, %c0_11, %c0_12] : memref<2x1x512xf32, #tpu.memory_space<vmem>>, vector<1x1x512xf32>
    %13 = vector.shape_cast %12 : vector<1x1x512xf32> to vector<1x512xf32>
    %14 = vector.broadcast %13 : vector<1x512xf32> to vector<8x512xf32>
    %15 = arith.addf %11, %14 : vector<8x512xf32>
    %16 = vector.extract_strided_slice %15 {offsets = [0, 0], sizes = [8, 128], strides = [1, 1]} : vector<8x512xf32> to vector<8x128xf32>
    %17 = arith.negf %16 : vector<8x128xf32>
    %18 = math.exp %17 : vector<8x128xf32>
    %cst_13 = arith.constant 1.000000e+00 : f32
    %19 = vector.broadcast %cst_13 : f32 to vector<8x128xf32>
    %20 = arith.addf %19, %18 : vector<8x128xf32>
    %21 = arith.divf %19, %20 : vector<8x128xf32>
    %22 = vector.extract_strided_slice %15 {offsets = [0, 128], sizes = [8, 128], strides = [1, 1]} : vector<8x512xf32> to vector<8x128xf32>
    %23 = arith.negf %22 : vector<8x128xf32>
    %24 = math.exp %23 : vector<8x128xf32>
    %cst_14 = arith.constant 1.000000e+00 : f32
    %25 = vector.broadcast %cst_14 : f32 to vector<8x128xf32>
    %26 = arith.addf %25, %24 : vector<8x128xf32>
    %27 = arith.divf %25, %26 : vector<8x128xf32>
    %28 = vector.extract_strided_slice %15 {offsets = [0, 256], sizes = [8, 128], strides = [1, 1]} : vector<8x512xf32> to vector<8x128xf32>
    %29 = vector.extract_strided_slice %15 {offsets = [0, 384], sizes = [8, 128], strides = [1, 1]} : vector<8x512xf32> to vector<8x128xf32>
    %30 = arith.mulf %21, %29 : vector<8x128xf32>
    %31 = arith.addf %28, %30 : vector<8x128xf32>
    %32 = math.tanh %31 : vector<8x128xf32>
    %cst_15 = arith.constant 1.000000e+00 : f32
    %33 = vector.broadcast %cst_15 : f32 to vector<8x128xf32>
    %34 = arith.subf %33, %27 : vector<8x128xf32>
    %35 = arith.mulf %34, %32 : vector<8x128xf32>
    %36 = arith.mulf %27, %5 : vector<8x128xf32>
    %37 = arith.addf %35, %36 : vector<8x128xf32>
    %c0_16 = arith.constant 0 : index
    %c0_17 = arith.constant 0 : index
    %c0_18 = arith.constant 0 : index
    %38 = vector.load %arg8[%c0_16, %c0_17, %c0_18] : memref<2x8x128xf32, #tpu.memory_space<vmem>>, vector<1x8x128xf32>
    %39 = vector.shape_cast %38 : vector<1x8x128xf32> to vector<8x128xf32>
    %40 = vector.shape_cast %37 : vector<8x128xf32> to vector<1x8x128xf32>
    tpu.vector_store %arg8[%c0_16, %c0_17, %c0_18], %40 {strides = array<i32>} : memref<2x8x128xf32, #tpu.memory_space<vmem>>, vector<1x8x128xf32>,
    %41 = arith.truncf %37 : vector<8x128xf32> to vector<8x128xbf16>
    %c0_19 = arith.constant 0 : index
    %c0_20 = arith.constant 0 : index
    %42 = vector.load %arg9[%c0_19, %c0_20] : memref<8x256xbf16, #tpu.memory_space<vmem>>, vector<8x128xbf16>
    tpu.vector_store %arg9[%c0_19, %c0_20], %41 {strides = array<i32>} : memref<8x256xbf16, #tpu.memory_space<vmem>>, vector<8x128xbf16>,
    %c1 = arith.constant 1 : index
    %c0_21 = arith.constant 0 : index
    %c0_22 = arith.constant 0 : index
    %43 = vector.load %arg8[%c1, %c0_21, %c0_22] : memref<2x8x128xf32, #tpu.memory_space<vmem>>, vector<1x8x128xf32>
    %44 = vector.shape_cast %43 : vector<1x8x128xf32> to vector<8x128xf32>
    %45 = arith.truncf %44 : vector<8x128xf32> to vector<8x128xbf16>
    %c0_23 = arith.constant 0 : index
    %c128_24 = arith.constant 128 : index
    %46 = vector.load %arg9[%c0_23, %c128_24] : memref<8x256xbf16, #tpu.memory_space<vmem>>, vector<8x128xbf16>
    tpu.vector_store %arg9[%c0_23, %c128_24], %45 {strides = array<i32>} : memref<8x256xbf16, #tpu.memory_space<vmem>>, vector<8x128xbf16>,
    %c0_25 = arith.constant 0 : index
    %c0_26 = arith.constant 0 : index
    %47 = vector.load %arg9[%c0_25, %c0_26] : memref<8x256xbf16, #tpu.memory_space<vmem>>, vector<8x256xbf16>
    %c1_27 = arith.constant 1 : index
    %c0_28 = arith.constant 0 : index
    %c0_29 = arith.constant 0 : index
    %48 = vector.load %arg2[%c1_27, %c0_28, %c0_29] : memref<2x256x512xbf16, #tpu.memory_space<vmem>>, vector<1x256x512xbf16>
    %49 = vector.shape_cast %48 : vector<1x256x512xbf16> to vector<256x512xbf16>
    %cst_30 = arith.constant dense<0.000000e+00> : vector<8x512xf32>
    %50 = tpu.matmul %47, %49, %cst_30 {dimension_numbers = #tpu.dot_dimension_numbers<[1], [0], [0], [1], [0, 0, 1, 1], [], []>} : vector<8x256xbf16>, vector<256x512xbf16>, vector<8x512xf32> -> vector<8x512xf32>
    %c1_31 = arith.constant 1 : index
    %c0_32 = arith.constant 0 : index
    %c0_33 = arith.constant 0 : index
    %51 = vector.load %arg3[%c1_31, %c0_32, %c0_33] : memref<2x1x512xf32, #tpu.memory_space<vmem>>, vector<1x1x512xf32>
    %52 = vector.shape_cast %51 : vector<1x1x512xf32> to vector<1x512xf32>
    %53 = vector.broadcast %52 : vector<1x512xf32> to vector<8x512xf32>
    %54 = arith.addf %50, %53 : vector<8x512xf32>
    %55 = vector.extract_strided_slice %54 {offsets = [0, 0], sizes = [8, 128], strides = [1, 1]} : vector<8x512xf32> to vector<8x128xf32>
    %56 = arith.negf %55 : vector<8x128xf32>
    %57 = math.exp %56 : vector<8x128xf32>
    %cst_34 = arith.constant 1.000000e+00 : f32
    %58 = vector.broadcast %cst_34 : f32 to vector<8x128xf32>
    %59 = arith.addf %58, %57 : vector<8x128xf32>
    %60 = arith.divf %58, %59 : vector<8x128xf32>
    %61 = vector.extract_strided_slice %54 {offsets = [0, 128], sizes = [8, 128], strides = [1, 1]} : vector<8x512xf32> to vector<8x128xf32>
    %62 = arith.negf %61 : vector<8x128xf32>
    %63 = math.exp %62 : vector<8x128xf32>
    %cst_35 = arith.constant 1.000000e+00 : f32
    %64 = vector.broadcast %cst_35 : f32 to vector<8x128xf32>
    %65 = arith.addf %64, %63 : vector<8x128xf32>
    %66 = arith.divf %64, %65 : vector<8x128xf32>
    %67 = vector.extract_strided_slice %54 {offsets = [0, 256], sizes = [8, 128], strides = [1, 1]} : vector<8x512xf32> to vector<8x128xf32>
    %68 = vector.extract_strided_slice %54 {offsets = [0, 384], sizes = [8, 128], strides = [1, 1]} : vector<8x512xf32> to vector<8x128xf32>
    %69 = arith.mulf %60, %68 : vector<8x128xf32>
    %70 = arith.addf %67, %69 : vector<8x128xf32>
    %71 = math.tanh %70 : vector<8x128xf32>
    %cst_36 = arith.constant 1.000000e+00 : f32
    %72 = vector.broadcast %cst_36 : f32 to vector<8x128xf32>
    %73 = arith.subf %72, %66 : vector<8x128xf32>
    %74 = arith.mulf %73, %71 : vector<8x128xf32>
    %75 = arith.mulf %66, %44 : vector<8x128xf32>
    %76 = arith.addf %74, %75 : vector<8x128xf32>
    %c1_37 = arith.constant 1 : index
    %c0_38 = arith.constant 0 : index
    %c0_39 = arith.constant 0 : index
    %77 = vector.load %arg8[%c1_37, %c0_38, %c0_39] : memref<2x8x128xf32, #tpu.memory_space<vmem>>, vector<1x8x128xf32>
    %78 = vector.shape_cast %77 : vector<1x8x128xf32> to vector<8x128xf32>
    %79 = vector.shape_cast %76 : vector<8x128xf32> to vector<1x8x128xf32>
    tpu.vector_store %arg8[%c1_37, %c0_38, %c0_39], %79 {strides = array<i32>} : memref<2x8x128xf32, #tpu.memory_space<vmem>>, vector<1x8x128xf32>,
    %80 = arith.truncf %76 : vector<8x128xf32> to vector<8x128xbf16>
    %c0_40 = arith.constant 0 : index
    %c0_41 = arith.constant 0 : index
    %81 = vector.load %arg4[%c0_40, %c0_41] : memref<128x128xbf16, #tpu.memory_space<vmem>>, vector<128x128xbf16>
    %cst_42 = arith.constant dense<0.000000e+00> : vector<8x128xf32>
    %82 = tpu.matmul %80, %81, %cst_42 {dimension_numbers = #tpu.dot_dimension_numbers<[1], [0], [0], [1], [0, 0, 1, 1], [], []>} : vector<8x128xbf16>, vector<128x128xbf16>, vector<8x128xf32> -> vector<8x128xf32>
    %c0_43 = arith.constant 0 : index
    %c0_44 = arith.constant 0 : index
    %83 = vector.load %arg5[%c0_43, %c0_44] : memref<1x128xf32, #tpu.memory_space<vmem>>, vector<1x128xf32>
    %84 = vector.broadcast %83 : vector<1x128xf32> to vector<8x128xf32>
    %85 = arith.addf %82, %84 : vector<8x128xf32>
    %86 = arith.index_cast %c0_i32_1 : i32 to index
    %c0_45 = arith.constant 0 : index
    %c0_46 = arith.constant 0 : index
    %87 = vector.load %arg7[%86, %c0_45, %c0_46] : memref<4x8x128xf32, #tpu.memory_space<vmem>>, vector<1x8x128xf32>
    %88 = vector.shape_cast %87 : vector<1x8x128xf32> to vector<8x128xf32>
    %89 = vector.shape_cast %85 : vector<8x128xf32> to vector<1x8x128xf32>
    tpu.vector_store %arg7[%86, %c0_45, %c0_46], %89 {strides = array<i32>} : memref<4x8x128xf32, #tpu.memory_space<vmem>>, vector<1x8x128xf32>,
    %cst_47 = arith.constant dense<0xFF800000> : vector<8xf32>
    %90 = vector.multi_reduction <maximumf>, %85, %cst_47 [1] : vector<8x128xf32> to vector<8xf32>
    %91 = vector.shape_cast %90 : vector<8xf32> to vector<8x1xf32>
    %92 = vector.broadcast %91 : vector<8x1xf32> to vector<8x128xf32>
    %93 = arith.cmpf oge, %85, %92 : vector<8x128xf32>
    %c128_i32 = arith.constant 128 : i32
    %94 = vector.broadcast %c128_i32 : i32 to vector<8x128xi32>
    %95 = arith.select %93, %3, %94 : vector<8x128xi1>, vector<8x128xi32>
    %cst_48 = arith.constant dense<2147483647> : vector<8xi32>
    %96 = vector.multi_reduction <minsi>, %95, %cst_48 [1] : vector<8x128xi32> to vector<8xi32>
    %97 = vector.shape_cast %96 : vector<8xi32> to vector<8x1xi32>
    %98 = vector.broadcast %97 : vector<8x1xi32> to vector<8x128xi32>
    %99 = arith.cmpi eq, %3, %98 : vector<8x128xi32>
    %100 = arith.extui %99 : vector<8x128xi1> to vector<8x128xi32>
    %101 = arith.sitofp %100 : vector<8x128xi32> to vector<8x128xf32>
    %102 = arith.truncf %101 : vector<8x128xf32> to vector<8x128xbf16>
    %c0_49 = arith.constant 0 : index
    %c0_50 = arith.constant 0 : index
    %103 = vector.load %arg1[%c0_49, %c0_50] : memref<128x128xbf16, #tpu.memory_space<vmem>>, vector<128x128xbf16>
    %cst_51 = arith.constant dense<0.000000e+00> : vector<8x128xf32>
    %104 = tpu.matmul %102, %103, %cst_51 {dimension_numbers = #tpu.dot_dimension_numbers<[1], [0], [0], [1], [0, 0, 1, 1], [], []>} : vector<8x128xbf16>, vector<128x128xbf16>, vector<8x128xf32> -> vector<8x128xf32>
    %105 = arith.truncf %104 : vector<8x128xf32> to vector<8x128xbf16>
    %c0_52 = arith.constant 0 : index
    %c0_53 = arith.constant 0 : index
    %106 = vector.load %arg9[%c0_52, %c0_53] : memref<8x256xbf16, #tpu.memory_space<vmem>>, vector<8x128xbf16>
    tpu.vector_store %arg9[%c0_52, %c0_53], %105 {strides = array<i32>} : memref<8x256xbf16, #tpu.memory_space<vmem>>, vector<8x128xbf16>,
    %c1_i32 = arith.constant 1 : i32
    %c0_54 = arith.constant 0 : index
    %c0_55 = arith.constant 0 : index
    %c0_56 = arith.constant 0 : index
    %107 = vector.load %arg8[%c0_54, %c0_55, %c0_56] : memref<2x8x128xf32, #tpu.memory_space<vmem>>, vector<1x8x128xf32>
    %108 = vector.shape_cast %107 : vector<1x8x128xf32> to vector<8x128xf32>
    %109 = arith.truncf %108 : vector<8x128xf32> to vector<8x128xbf16>
    %c0_57 = arith.constant 0 : index
    %c128_58 = arith.constant 128 : index
    %110 = vector.load %arg9[%c0_57, %c128_58] : memref<8x256xbf16, #tpu.memory_space<vmem>>, vector<8x128xbf16>
    tpu.vector_store %arg9[%c0_57, %c128_58], %109 {strides = array<i32>} : memref<8x256xbf16, #tpu.memory_space<vmem>>, vector<8x128xbf16>,
    %c0_59 = arith.constant 0 : index
    %c0_60 = arith.constant 0 : index
    %111 = vector.load %arg9[%c0_59, %c0_60] : memref<8x256xbf16, #tpu.memory_space<vmem>>, vector<8x256xbf16>
    %c0_61 = arith.constant 0 : index
    %c0_62 = arith.constant 0 : index
    %c0_63 = arith.constant 0 : index
    %112 = vector.load %arg2[%c0_61, %c0_62, %c0_63] : memref<2x256x512xbf16, #tpu.memory_space<vmem>>, vector<1x256x512xbf16>
    %113 = vector.shape_cast %112 : vector<1x256x512xbf16> to vector<256x512xbf16>
    %cst_64 = arith.constant dense<0.000000e+00> : vector<8x512xf32>
    %114 = tpu.matmul %111, %113, %cst_64 {dimension_numbers = #tpu.dot_dimension_numbers<[1], [0], [0], [1], [0, 0, 1, 1], [], []>} : vector<8x256xbf16>, vector<256x512xbf16>, vector<8x512xf32> -> vector<8x512xf32>
    %c0_65 = arith.constant 0 : index
    %c0_66 = arith.constant 0 : index
    %c0_67 = arith.constant 0 : index
    %115 = vector.load %arg3[%c0_65, %c0_66, %c0_67] : memref<2x1x512xf32, #tpu.memory_space<vmem>>, vector<1x1x512xf32>
    %116 = vector.shape_cast %115 : vector<1x1x512xf32> to vector<1x512xf32>
    %117 = vector.broadcast %116 : vector<1x512xf32> to vector<8x512xf32>
    %118 = arith.addf %114, %117 : vector<8x512xf32>
    %119 = vector.extract_strided_slice %118 {offsets = [0, 0], sizes = [8, 128], strides = [1, 1]} : vector<8x512xf32> to vector<8x128xf32>
    %120 = arith.negf %119 : vector<8x128xf32>
    %121 = math.exp %120 : vector<8x128xf32>
    %cst_68 = arith.constant 1.000000e+00 : f32
    %122 = vector.broadcast %cst_68 : f32 to vector<8x128xf32>
    %123 = arith.addf %122, %121 : vector<8x128xf32>
    %124 = arith.divf %122, %123 : vector<8x128xf32>
    %125 = vector.extract_strided_slice %118 {offsets = [0, 128], sizes = [8, 128], strides = [1, 1]} : vector<8x512xf32> to vector<8x128xf32>
    %126 = arith.negf %125 : vector<8x128xf32>
    %127 = math.exp %126 : vector<8x128xf32>
    %cst_69 = arith.constant 1.000000e+00 : f32
    %128 = vector.broadcast %cst_69 : f32 to vector<8x128xf32>
    %129 = arith.addf %128, %127 : vector<8x128xf32>
    %130 = arith.divf %128, %129 : vector<8x128xf32>
    %131 = vector.extract_strided_slice %118 {offsets = [0, 256], sizes = [8, 128], strides = [1, 1]} : vector<8x512xf32> to vector<8x128xf32>
    %132 = vector.extract_strided_slice %118 {offsets = [0, 384], sizes = [8, 128], strides = [1, 1]} : vector<8x512xf32> to vector<8x128xf32>
    %133 = arith.mulf %124, %132 : vector<8x128xf32>
    %134 = arith.addf %131, %133 : vector<8x128xf32>
    %135 = math.tanh %134 : vector<8x128xf32>
    %cst_70 = arith.constant 1.000000e+00 : f32
    %136 = vector.broadcast %cst_70 : f32 to vector<8x128xf32>
    %137 = arith.subf %136, %130 : vector<8x128xf32>
    %138 = arith.mulf %137, %135 : vector<8x128xf32>
    %139 = arith.mulf %130, %108 : vector<8x128xf32>
    %140 = arith.addf %138, %139 : vector<8x128xf32>
    %c0_71 = arith.constant 0 : index
    %c0_72 = arith.constant 0 : index
    %c0_73 = arith.constant 0 : index
    %141 = vector.load %arg8[%c0_71, %c0_72, %c0_73] : memref<2x8x128xf32, #tpu.memory_space<vmem>>, vector<1x8x128xf32>
    %142 = vector.shape_cast %141 : vector<1x8x128xf32> to vector<8x128xf32>
    %143 = vector.shape_cast %140 : vector<8x128xf32> to vector<1x8x128xf32>
    tpu.vector_store %arg8[%c0_71, %c0_72, %c0_73], %143 {strides = array<i32>} : memref<2x8x128xf32, #tpu.memory_space<vmem>>, vector<1x8x128xf32>,
    %144 = arith.truncf %140 : vector<8x128xf32> to vector<8x128xbf16>
    %c0_74 = arith.constant 0 : index
    %c0_75 = arith.constant 0 : index
    %145 = vector.load %arg9[%c0_74, %c0_75] : memref<8x256xbf16, #tpu.memory_space<vmem>>, vector<8x128xbf16>
    tpu.vector_store %arg9[%c0_74, %c0_75], %144 {strides = array<i32>} : memref<8x256xbf16, #tpu.memory_space<vmem>>, vector<8x128xbf16>,
    %c1_76 = arith.constant 1 : index
    %c0_77 = arith.constant 0 : index
    %c0_78 = arith.constant 0 : index
    %146 = vector.load %arg8[%c1_76, %c0_77, %c0_78] : memref<2x8x128xf32, #tpu.memory_space<vmem>>, vector<1x8x128xf32>
    %147 = vector.shape_cast %146 : vector<1x8x128xf32> to vector<8x128xf32>
    %148 = arith.truncf %147 : vector<8x128xf32> to vector<8x128xbf16>
    %c0_79 = arith.constant 0 : index
    %c128_80 = arith.constant 128 : index
    %149 = vector.load %arg9[%c0_79, %c128_80] : memref<8x256xbf16, #tpu.memory_space<vmem>>, vector<8x128xbf16>
    tpu.vector_store %arg9[%c0_79, %c128_80], %148 {strides = array<i32>} : memref<8x256xbf16, #tpu.memory_space<vmem>>, vector<8x128xbf16>,
    %c0_81 = arith.constant 0 : index
    %c0_82 = arith.constant 0 : index
    %150 = vector.load %arg9[%c0_81, %c0_82] : memref<8x256xbf16, #tpu.memory_space<vmem>>, vector<8x256xbf16>
    %c1_83 = arith.constant 1 : index
    %c0_84 = arith.constant 0 : index
    %c0_85 = arith.constant 0 : index
    %151 = vector.load %arg2[%c1_83, %c0_84, %c0_85] : memref<2x256x512xbf16, #tpu.memory_space<vmem>>, vector<1x256x512xbf16>
    %152 = vector.shape_cast %151 : vector<1x256x512xbf16> to vector<256x512xbf16>
    %cst_86 = arith.constant dense<0.000000e+00> : vector<8x512xf32>
    %153 = tpu.matmul %150, %152, %cst_86 {dimension_numbers = #tpu.dot_dimension_numbers<[1], [0], [0], [1], [0, 0, 1, 1], [], []>} : vector<8x256xbf16>, vector<256x512xbf16>, vector<8x512xf32> -> vector<8x512xf32>
    %c1_87 = arith.constant 1 : index
    %c0_88 = arith.constant 0 : index
    %c0_89 = arith.constant 0 : index
    %154 = vector.load %arg3[%c1_87, %c0_88, %c0_89] : memref<2x1x512xf32, #tpu.memory_space<vmem>>, vector<1x1x512xf32>
    %155 = vector.shape_cast %154 : vector<1x1x512xf32> to vector<1x512xf32>
    %156 = vector.broadcast %155 : vector<1x512xf32> to vector<8x512xf32>
    %157 = arith.addf %153, %156 : vector<8x512xf32>
    %158 = vector.extract_strided_slice %157 {offsets = [0, 0], sizes = [8, 128], strides = [1, 1]} : vector<8x512xf32> to vector<8x128xf32>
    %159 = arith.negf %158 : vector<8x128xf32>
    %160 = math.exp %159 : vector<8x128xf32>
    %cst_90 = arith.constant 1.000000e+00 : f32
    %161 = vector.broadcast %cst_90 : f32 to vector<8x128xf32>
    %162 = arith.addf %161, %160 : vector<8x128xf32>
    %163 = arith.divf %161, %162 : vector<8x128xf32>
    %164 = vector.extract_strided_slice %157 {offsets = [0, 128], sizes = [8, 128], strides = [1, 1]} : vector<8x512xf32> to vector<8x128xf32>
    %165 = arith.negf %164 : vector<8x128xf32>
    %166 = math.exp %165 : vector<8x128xf32>
    %cst_91 = arith.constant 1.000000e+00 : f32
    %167 = vector.broadcast %cst_91 : f32 to vector<8x128xf32>
    %168 = arith.addf %167, %166 : vector<8x128xf32>
    %169 = arith.divf %167, %168 : vector<8x128xf32>
    %170 = vector.extract_strided_slice %157 {offsets = [0, 256], sizes = [8, 128], strides = [1, 1]} : vector<8x512xf32> to vector<8x128xf32>
    %171 = vector.extract_strided_slice %157 {offsets = [0, 384], sizes = [8, 128], strides = [1, 1]} : vector<8x512xf32> to vector<8x128xf32>
    %172 = arith.mulf %163, %171 : vector<8x128xf32>
    %173 = arith.addf %170, %172 : vector<8x128xf32>
    %174 = math.tanh %173 : vector<8x128xf32>
    %cst_92 = arith.constant 1.000000e+00 : f32
    %175 = vector.broadcast %cst_92 : f32 to vector<8x128xf32>
    %176 = arith.subf %175, %169 : vector<8x128xf32>
    %177 = arith.mulf %176, %174 : vector<8x128xf32>
    %178 = arith.mulf %169, %147 : vector<8x128xf32>
    %179 = arith.addf %177, %178 : vector<8x128xf32>
    %c1_93 = arith.constant 1 : index
    %c0_94 = arith.constant 0 : index
    %c0_95 = arith.constant 0 : index
    %180 = vector.load %arg8[%c1_93, %c0_94, %c0_95] : memref<2x8x128xf32, #tpu.memory_space<vmem>>, vector<1x8x128xf32>
    %181 = vector.shape_cast %180 : vector<1x8x128xf32> to vector<8x128xf32>
    %182 = vector.shape_cast %179 : vector<8x128xf32> to vector<1x8x128xf32>
    tpu.vector_store %arg8[%c1_93, %c0_94, %c0_95], %182 {strides = array<i32>} : memref<2x8x128xf32, #tpu.memory_space<vmem>>, vector<1x8x128xf32>,
    %183 = arith.truncf %179 : vector<8x128xf32> to vector<8x128xbf16>
    %c0_96 = arith.constant 0 : index
    %c0_97 = arith.constant 0 : index
    %184 = vector.load %arg4[%c0_96, %c0_97] : memref<128x128xbf16, #tpu.memory_space<vmem>>, vector<128x128xbf16>
    %cst_98 = arith.constant dense<0.000000e+00> : vector<8x128xf32>
    %185 = tpu.matmul %183, %184, %cst_98 {dimension_numbers = #tpu.dot_dimension_numbers<[1], [0], [0], [1], [0, 0, 1, 1], [], []>} : vector<8x128xbf16>, vector<128x128xbf16>, vector<8x128xf32> -> vector<8x128xf32>
    %c0_99 = arith.constant 0 : index
    %c0_100 = arith.constant 0 : index
    %186 = vector.load %arg5[%c0_99, %c0_100] : memref<1x128xf32, #tpu.memory_space<vmem>>, vector<1x128xf32>
    %187 = vector.broadcast %186 : vector<1x128xf32> to vector<8x128xf32>
    %188 = arith.addf %185, %187 : vector<8x128xf32>
    %189 = arith.index_cast %c1_i32 : i32 to index
    %c0_101 = arith.constant 0 : index
    %c0_102 = arith.constant 0 : index
    %190 = vector.load %arg7[%189, %c0_101, %c0_102] : memref<4x8x128xf32, #tpu.memory_space<vmem>>, vector<1x8x128xf32>
    %191 = vector.shape_cast %190 : vector<1x8x128xf32> to vector<8x128xf32>
    %192 = vector.shape_cast %188 : vector<8x128xf32> to vector<1x8x128xf32>
    tpu.vector_store %arg7[%189, %c0_101, %c0_102], %192 {strides = array<i32>} : memref<4x8x128xf32, #tpu.memory_space<vmem>>, vector<1x8x128xf32>,
    %cst_103 = arith.constant dense<0xFF800000> : vector<8xf32>
    %193 = vector.multi_reduction <maximumf>, %188, %cst_103 [1] : vector<8x128xf32> to vector<8xf32>
    %194 = vector.shape_cast %193 : vector<8xf32> to vector<8x1xf32>
    %195 = vector.broadcast %194 : vector<8x1xf32> to vector<8x128xf32>
    %196 = arith.cmpf oge, %188, %195 : vector<8x128xf32>
    %c128_i32_104 = arith.constant 128 : i32
    %197 = vector.broadcast %c128_i32_104 : i32 to vector<8x128xi32>
    %198 = arith.select %196, %3, %197 : vector<8x128xi1>, vector<8x128xi32>
    %cst_105 = arith.constant dense<2147483647> : vector<8xi32>
    %199 = vector.multi_reduction <minsi>, %198, %cst_105 [1] : vector<8x128xi32> to vector<8xi32>
    %200 = vector.shape_cast %199 : vector<8xi32> to vector<8x1xi32>
    %201 = vector.broadcast %200 : vector<8x1xi32> to vector<8x128xi32>
    %202 = arith.cmpi eq, %3, %201 : vector<8x128xi32>
    %203 = arith.extui %202 : vector<8x128xi1> to vector<8x128xi32>
    %204 = arith.sitofp %203 : vector<8x128xi32> to vector<8x128xf32>
    %205 = arith.truncf %204 : vector<8x128xf32> to vector<8x128xbf16>
    %c0_106 = arith.constant 0 : index
    %c0_107 = arith.constant 0 : index
    %206 = vector.load %arg1[%c0_106, %c0_107] : memref<128x128xbf16, #tpu.memory_space<vmem>>, vector<128x128xbf16>
    %cst_108 = arith.constant dense<0.000000e+00> : vector<8x128xf32>
    %207 = tpu.matmul %205, %206, %cst_108 {dimension_numbers = #tpu.dot_dimension_numbers<[1], [0], [0], [1], [0, 0, 1, 1], [], []>} : vector<8x128xbf16>, vector<128x128xbf16>, vector<8x128xf32> -> vector<8x128xf32>
    %208 = arith.truncf %207 : vector<8x128xf32> to vector<8x128xbf16>
    %c0_109 = arith.constant 0 : index
    %c0_110 = arith.constant 0 : index
    %209 = vector.load %arg9[%c0_109, %c0_110] : memref<8x256xbf16, #tpu.memory_space<vmem>>, vector<8x128xbf16>
    tpu.vector_store %arg9[%c0_109, %c0_110], %208 {strides = array<i32>} : memref<8x256xbf16, #tpu.memory_space<vmem>>, vector<8x128xbf16>,
    %c2_i32 = arith.constant 2 : i32
    %c0_111 = arith.constant 0 : index
    %c0_112 = arith.constant 0 : index
    %c0_113 = arith.constant 0 : index
    %210 = vector.load %arg8[%c0_111, %c0_112, %c0_113] : memref<2x8x128xf32, #tpu.memory_space<vmem>>, vector<1x8x128xf32>
    %211 = vector.shape_cast %210 : vector<1x8x128xf32> to vector<8x128xf32>
    %212 = arith.truncf %211 : vector<8x128xf32> to vector<8x128xbf16>
    %c0_114 = arith.constant 0 : index
    %c128_115 = arith.constant 128 : index
    %213 = vector.load %arg9[%c0_114, %c128_115] : memref<8x256xbf16, #tpu.memory_space<vmem>>, vector<8x128xbf16>
    tpu.vector_store %arg9[%c0_114, %c128_115], %212 {strides = array<i32>} : memref<8x256xbf16, #tpu.memory_space<vmem>>, vector<8x128xbf16>,
    %c0_116 = arith.constant 0 : index
    %c0_117 = arith.constant 0 : index
    %214 = vector.load %arg9[%c0_116, %c0_117] : memref<8x256xbf16, #tpu.memory_space<vmem>>, vector<8x256xbf16>
    %c0_118 = arith.constant 0 : index
    %c0_119 = arith.constant 0 : index
    %c0_120 = arith.constant 0 : index
    %215 = vector.load %arg2[%c0_118, %c0_119, %c0_120] : memref<2x256x512xbf16, #tpu.memory_space<vmem>>, vector<1x256x512xbf16>
    %216 = vector.shape_cast %215 : vector<1x256x512xbf16> to vector<256x512xbf16>
    %cst_121 = arith.constant dense<0.000000e+00> : vector<8x512xf32>
    %217 = tpu.matmul %214, %216, %cst_121 {dimension_numbers = #tpu.dot_dimension_numbers<[1], [0], [0], [1], [0, 0, 1, 1], [], []>} : vector<8x256xbf16>, vector<256x512xbf16>, vector<8x512xf32> -> vector<8x512xf32>
    %c0_122 = arith.constant 0 : index
    %c0_123 = arith.constant 0 : index
    %c0_124 = arith.constant 0 : index
    %218 = vector.load %arg3[%c0_122, %c0_123, %c0_124] : memref<2x1x512xf32, #tpu.memory_space<vmem>>, vector<1x1x512xf32>
    %219 = vector.shape_cast %218 : vector<1x1x512xf32> to vector<1x512xf32>
    %220 = vector.broadcast %219 : vector<1x512xf32> to vector<8x512xf32>
    %221 = arith.addf %217, %220 : vector<8x512xf32>
    %222 = vector.extract_strided_slice %221 {offsets = [0, 0], sizes = [8, 128], strides = [1, 1]} : vector<8x512xf32> to vector<8x128xf32>
    %223 = arith.negf %222 : vector<8x128xf32>
    %224 = math.exp %223 : vector<8x128xf32>
    %cst_125 = arith.constant 1.000000e+00 : f32
    %225 = vector.broadcast %cst_125 : f32 to vector<8x128xf32>
    %226 = arith.addf %225, %224 : vector<8x128xf32>
    %227 = arith.divf %225, %226 : vector<8x128xf32>
    %228 = vector.extract_strided_slice %221 {offsets = [0, 128], sizes = [8, 128], strides = [1, 1]} : vector<8x512xf32> to vector<8x128xf32>
    %229 = arith.negf %228 : vector<8x128xf32>
    %230 = math.exp %229 : vector<8x128xf32>
    %cst_126 = arith.constant 1.000000e+00 : f32
    %231 = vector.broadcast %cst_126 : f32 to vector<8x128xf32>
    %232 = arith.addf %231, %230 : vector<8x128xf32>
    %233 = arith.divf %231, %232 : vector<8x128xf32>
    %234 = vector.extract_strided_slice %221 {offsets = [0, 256], sizes = [8, 128], strides = [1, 1]} : vector<8x512xf32> to vector<8x128xf32>
    %235 = vector.extract_strided_slice %221 {offsets = [0, 384], sizes = [8, 128], strides = [1, 1]} : vector<8x512xf32> to vector<8x128xf32>
    %236 = arith.mulf %227, %235 : vector<8x128xf32>
    %237 = arith.addf %234, %236 : vector<8x128xf32>
    %238 = math.tanh %237 : vector<8x128xf32>
    %cst_127 = arith.constant 1.000000e+00 : f32
    %239 = vector.broadcast %cst_127 : f32 to vector<8x128xf32>
    %240 = arith.subf %239, %233 : vector<8x128xf32>
    %241 = arith.mulf %240, %238 : vector<8x128xf32>
    %242 = arith.mulf %233, %211 : vector<8x128xf32>
    %243 = arith.addf %241, %242 : vector<8x128xf32>
    %c0_128 = arith.constant 0 : index
    %c0_129 = arith.constant 0 : index
    %c0_130 = arith.constant 0 : index
    %244 = vector.load %arg8[%c0_128, %c0_129, %c0_130] : memref<2x8x128xf32, #tpu.memory_space<vmem>>, vector<1x8x128xf32>
    %245 = vector.shape_cast %244 : vector<1x8x128xf32> to vector<8x128xf32>
    %246 = vector.shape_cast %243 : vector<8x128xf32> to vector<1x8x128xf32>
    tpu.vector_store %arg8[%c0_128, %c0_129, %c0_130], %246 {strides = array<i32>} : memref<2x8x128xf32, #tpu.memory_space<vmem>>, vector<1x8x128xf32>,
    %247 = arith.truncf %243 : vector<8x128xf32> to vector<8x128xbf16>
    %c0_131 = arith.constant 0 : index
    %c0_132 = arith.constant 0 : index
    %248 = vector.load %arg9[%c0_131, %c0_132] : memref<8x256xbf16, #tpu.memory_space<vmem>>, vector<8x128xbf16>
    tpu.vector_store %arg9[%c0_131, %c0_132], %247 {strides = array<i32>} : memref<8x256xbf16, #tpu.memory_space<vmem>>, vector<8x128xbf16>,
    %c1_133 = arith.constant 1 : index
    %c0_134 = arith.constant 0 : index
    %c0_135 = arith.constant 0 : index
    %249 = vector.load %arg8[%c1_133, %c0_134, %c0_135] : memref<2x8x128xf32, #tpu.memory_space<vmem>>, vector<1x8x128xf32>
    %250 = vector.shape_cast %249 : vector<1x8x128xf32> to vector<8x128xf32>
    %251 = arith.truncf %250 : vector<8x128xf32> to vector<8x128xbf16>
    %c0_136 = arith.constant 0 : index
    %c128_137 = arith.constant 128 : index
    %252 = vector.load %arg9[%c0_136, %c128_137] : memref<8x256xbf16, #tpu.memory_space<vmem>>, vector<8x128xbf16>
    tpu.vector_store %arg9[%c0_136, %c128_137], %251 {strides = array<i32>} : memref<8x256xbf16, #tpu.memory_space<vmem>>, vector<8x128xbf16>,
    %c0_138 = arith.constant 0 : index
    %c0_139 = arith.constant 0 : index
    %253 = vector.load %arg9[%c0_138, %c0_139] : memref<8x256xbf16, #tpu.memory_space<vmem>>, vector<8x256xbf16>
    %c1_140 = arith.constant 1 : index
    %c0_141 = arith.constant 0 : index
    %c0_142 = arith.constant 0 : index
    %254 = vector.load %arg2[%c1_140, %c0_141, %c0_142] : memref<2x256x512xbf16, #tpu.memory_space<vmem>>, vector<1x256x512xbf16>
    %255 = vector.shape_cast %254 : vector<1x256x512xbf16> to vector<256x512xbf16>
    %cst_143 = arith.constant dense<0.000000e+00> : vector<8x512xf32>
    %256 = tpu.matmul %253, %255, %cst_143 {dimension_numbers = #tpu.dot_dimension_numbers<[1], [0], [0], [1], [0, 0, 1, 1], [], []>} : vector<8x256xbf16>, vector<256x512xbf16>, vector<8x512xf32> -> vector<8x512xf32>
    %c1_144 = arith.constant 1 : index
    %c0_145 = arith.constant 0 : index
    %c0_146 = arith.constant 0 : index
    %257 = vector.load %arg3[%c1_144, %c0_145, %c0_146] : memref<2x1x512xf32, #tpu.memory_space<vmem>>, vector<1x1x512xf32>
    %258 = vector.shape_cast %257 : vector<1x1x512xf32> to vector<1x512xf32>
    %259 = vector.broadcast %258 : vector<1x512xf32> to vector<8x512xf32>
    %260 = arith.addf %256, %259 : vector<8x512xf32>
    %261 = vector.extract_strided_slice %260 {offsets = [0, 0], sizes = [8, 128], strides = [1, 1]} : vector<8x512xf32> to vector<8x128xf32>
    %262 = arith.negf %261 : vector<8x128xf32>
    %263 = math.exp %262 : vector<8x128xf32>
    %cst_147 = arith.constant 1.000000e+00 : f32
    %264 = vector.broadcast %cst_147 : f32 to vector<8x128xf32>
    %265 = arith.addf %264, %263 : vector<8x128xf32>
    %266 = arith.divf %264, %265 : vector<8x128xf32>
    %267 = vector.extract_strided_slice %260 {offsets = [0, 128], sizes = [8, 128], strides = [1, 1]} : vector<8x512xf32> to vector<8x128xf32>
    %268 = arith.negf %267 : vector<8x128xf32>
    %269 = math.exp %268 : vector<8x128xf32>
    %cst_148 = arith.constant 1.000000e+00 : f32
    %270 = vector.broadcast %cst_148 : f32 to vector<8x128xf32>
    %271 = arith.addf %270, %269 : vector<8x128xf32>
    %272 = arith.divf %270, %271 : vector<8x128xf32>
    %273 = vector.extract_strided_slice %260 {offsets = [0, 256], sizes = [8, 128], strides = [1, 1]} : vector<8x512xf32> to vector<8x128xf32>
    %274 = vector.extract_strided_slice %260 {offsets = [0, 384], sizes = [8, 128], strides = [1, 1]} : vector<8x512xf32> to vector<8x128xf32>
    %275 = arith.mulf %266, %274 : vector<8x128xf32>
    %276 = arith.addf %273, %275 : vector<8x128xf32>
    %277 = math.tanh %276 : vector<8x128xf32>
    %cst_149 = arith.constant 1.000000e+00 : f32
    %278 = vector.broadcast %cst_149 : f32 to vector<8x128xf32>
    %279 = arith.subf %278, %272 : vector<8x128xf32>
    %280 = arith.mulf %279, %277 : vector<8x128xf32>
    %281 = arith.mulf %272, %250 : vector<8x128xf32>
    %282 = arith.addf %280, %281 : vector<8x128xf32>
    %c1_150 = arith.constant 1 : index
    %c0_151 = arith.constant 0 : index
    %c0_152 = arith.constant 0 : index
    %283 = vector.load %arg8[%c1_150, %c0_151, %c0_152] : memref<2x8x128xf32, #tpu.memory_space<vmem>>, vector<1x8x128xf32>
    %284 = vector.shape_cast %283 : vector<1x8x128xf32> to vector<8x128xf32>
    %285 = vector.shape_cast %282 : vector<8x128xf32> to vector<1x8x128xf32>
    tpu.vector_store %arg8[%c1_150, %c0_151, %c0_152], %285 {strides = array<i32>} : memref<2x8x128xf32, #tpu.memory_space<vmem>>, vector<1x8x128xf32>,
    %286 = arith.truncf %282 : vector<8x128xf32> to vector<8x128xbf16>
    %c0_153 = arith.constant 0 : index
    %c0_154 = arith.constant 0 : index
    %287 = vector.load %arg4[%c0_153, %c0_154] : memref<128x128xbf16, #tpu.memory_space<vmem>>, vector<128x128xbf16>
    %cst_155 = arith.constant dense<0.000000e+00> : vector<8x128xf32>
    %288 = tpu.matmul %286, %287, %cst_155 {dimension_numbers = #tpu.dot_dimension_numbers<[1], [0], [0], [1], [0, 0, 1, 1], [], []>} : vector<8x128xbf16>, vector<128x128xbf16>, vector<8x128xf32> -> vector<8x128xf32>
    %c0_156 = arith.constant 0 : index
    %c0_157 = arith.constant 0 : index
    %289 = vector.load %arg5[%c0_156, %c0_157] : memref<1x128xf32, #tpu.memory_space<vmem>>, vector<1x128xf32>
    %290 = vector.broadcast %289 : vector<1x128xf32> to vector<8x128xf32>
    %291 = arith.addf %288, %290 : vector<8x128xf32>
    %292 = arith.index_cast %c2_i32 : i32 to index
    %c0_158 = arith.constant 0 : index
    %c0_159 = arith.constant 0 : index
    %293 = vector.load %arg7[%292, %c0_158, %c0_159] : memref<4x8x128xf32, #tpu.memory_space<vmem>>, vector<1x8x128xf32>
    %294 = vector.shape_cast %293 : vector<1x8x128xf32> to vector<8x128xf32>
    %295 = vector.shape_cast %291 : vector<8x128xf32> to vector<1x8x128xf32>
    tpu.vector_store %arg7[%292, %c0_158, %c0_159], %295 {strides = array<i32>} : memref<4x8x128xf32, #tpu.memory_space<vmem>>, vector<1x8x128xf32>,
    %cst_160 = arith.constant dense<0xFF800000> : vector<8xf32>
    %296 = vector.multi_reduction <maximumf>, %291, %cst_160 [1] : vector<8x128xf32> to vector<8xf32>
    %297 = vector.shape_cast %296 : vector<8xf32> to vector<8x1xf32>
    %298 = vector.broadcast %297 : vector<8x1xf32> to vector<8x128xf32>
    %299 = arith.cmpf oge, %291, %298 : vector<8x128xf32>
    %c128_i32_161 = arith.constant 128 : i32
    %300 = vector.broadcast %c128_i32_161 : i32 to vector<8x128xi32>
    %301 = arith.select %299, %3, %300 : vector<8x128xi1>, vector<8x128xi32>
    %cst_162 = arith.constant dense<2147483647> : vector<8xi32>
    %302 = vector.multi_reduction <minsi>, %301, %cst_162 [1] : vector<8x128xi32> to vector<8xi32>
    %303 = vector.shape_cast %302 : vector<8xi32> to vector<8x1xi32>
    %304 = vector.broadcast %303 : vector<8x1xi32> to vector<8x128xi32>
    %305 = arith.cmpi eq, %3, %304 : vector<8x128xi32>
    %306 = arith.extui %305 : vector<8x128xi1> to vector<8x128xi32>
    %307 = arith.sitofp %306 : vector<8x128xi32> to vector<8x128xf32>
    %308 = arith.truncf %307 : vector<8x128xf32> to vector<8x128xbf16>
    %c0_163 = arith.constant 0 : index
    %c0_164 = arith.constant 0 : index
    %309 = vector.load %arg1[%c0_163, %c0_164] : memref<128x128xbf16, #tpu.memory_space<vmem>>, vector<128x128xbf16>
    %cst_165 = arith.constant dense<0.000000e+00> : vector<8x128xf32>
    %310 = tpu.matmul %308, %309, %cst_165 {dimension_numbers = #tpu.dot_dimension_numbers<[1], [0], [0], [1], [0, 0, 1, 1], [], []>} : vector<8x128xbf16>, vector<128x128xbf16>, vector<8x128xf32> -> vector<8x128xf32>
    %311 = arith.truncf %310 : vector<8x128xf32> to vector<8x128xbf16>
    %c0_166 = arith.constant 0 : index
    %c0_167 = arith.constant 0 : index
    %312 = vector.load %arg9[%c0_166, %c0_167] : memref<8x256xbf16, #tpu.memory_space<vmem>>, vector<8x128xbf16>
    tpu.vector_store %arg9[%c0_166, %c0_167], %311 {strides = array<i32>} : memref<8x256xbf16, #tpu.memory_space<vmem>>, vector<8x128xbf16>,
    %c3_i32 = arith.constant 3 : i32
    %c0_168 = arith.constant 0 : index
    %c0_169 = arith.constant 0 : index
    %c0_170 = arith.constant 0 : index
    %313 = vector.load %arg8[%c0_168, %c0_169, %c0_170] : memref<2x8x128xf32, #tpu.memory_space<vmem>>, vector<1x8x128xf32>
    %314 = vector.shape_cast %313 : vector<1x8x128xf32> to vector<8x128xf32>
    %315 = arith.truncf %314 : vector<8x128xf32> to vector<8x128xbf16>
    %c0_171 = arith.constant 0 : index
    %c128_172 = arith.constant 128 : index
    %316 = vector.load %arg9[%c0_171, %c128_172] : memref<8x256xbf16, #tpu.memory_space<vmem>>, vector<8x128xbf16>
    tpu.vector_store %arg9[%c0_171, %c128_172], %315 {strides = array<i32>} : memref<8x256xbf16, #tpu.memory_space<vmem>>, vector<8x128xbf16>,
    %c0_173 = arith.constant 0 : index
    %c0_174 = arith.constant 0 : index
    %317 = vector.load %arg9[%c0_173, %c0_174] : memref<8x256xbf16, #tpu.memory_space<vmem>>, vector<8x256xbf16>
    %c0_175 = arith.constant 0 : index
    %c0_176 = arith.constant 0 : index
    %c0_177 = arith.constant 0 : index
    %318 = vector.load %arg2[%c0_175, %c0_176, %c0_177] : memref<2x256x512xbf16, #tpu.memory_space<vmem>>, vector<1x256x512xbf16>
    %319 = vector.shape_cast %318 : vector<1x256x512xbf16> to vector<256x512xbf16>
    %cst_178 = arith.constant dense<0.000000e+00> : vector<8x512xf32>
    %320 = tpu.matmul %317, %319, %cst_178 {dimension_numbers = #tpu.dot_dimension_numbers<[1], [0], [0], [1], [0, 0, 1, 1], [], []>} : vector<8x256xbf16>, vector<256x512xbf16>, vector<8x512xf32> -> vector<8x512xf32>
    %c0_179 = arith.constant 0 : index
    %c0_180 = arith.constant 0 : index
    %c0_181 = arith.constant 0 : index
    %321 = vector.load %arg3[%c0_179, %c0_180, %c0_181] : memref<2x1x512xf32, #tpu.memory_space<vmem>>, vector<1x1x512xf32>
    %322 = vector.shape_cast %321 : vector<1x1x512xf32> to vector<1x512xf32>
    %323 = vector.broadcast %322 : vector<1x512xf32> to vector<8x512xf32>
    %324 = arith.addf %320, %323 : vector<8x512xf32>
    %325 = vector.extract_strided_slice %324 {offsets = [0, 0], sizes = [8, 128], strides = [1, 1]} : vector<8x512xf32> to vector<8x128xf32>
    %326 = arith.negf %325 : vector<8x128xf32>
    %327 = math.exp %326 : vector<8x128xf32>
    %cst_182 = arith.constant 1.000000e+00 : f32
    %328 = vector.broadcast %cst_182 : f32 to vector<8x128xf32>
    %329 = arith.addf %328, %327 : vector<8x128xf32>
    %330 = arith.divf %328, %329 : vector<8x128xf32>
    %331 = vector.extract_strided_slice %324 {offsets = [0, 128], sizes = [8, 128], strides = [1, 1]} : vector<8x512xf32> to vector<8x128xf32>
    %332 = arith.negf %331 : vector<8x128xf32>
    %333 = math.exp %332 : vector<8x128xf32>
    %cst_183 = arith.constant 1.000000e+00 : f32
    %334 = vector.broadcast %cst_183 : f32 to vector<8x128xf32>
    %335 = arith.addf %334, %333 : vector<8x128xf32>
    %336 = arith.divf %334, %335 : vector<8x128xf32>
    %337 = vector.extract_strided_slice %324 {offsets = [0, 256], sizes = [8, 128], strides = [1, 1]} : vector<8x512xf32> to vector<8x128xf32>
    %338 = vector.extract_strided_slice %324 {offsets = [0, 384], sizes = [8, 128], strides = [1, 1]} : vector<8x512xf32> to vector<8x128xf32>
    %339 = arith.mulf %330, %338 : vector<8x128xf32>
    %340 = arith.addf %337, %339 : vector<8x128xf32>
    %341 = math.tanh %340 : vector<8x128xf32>
    %cst_184 = arith.constant 1.000000e+00 : f32
    %342 = vector.broadcast %cst_184 : f32 to vector<8x128xf32>
    %343 = arith.subf %342, %336 : vector<8x128xf32>
    %344 = arith.mulf %343, %341 : vector<8x128xf32>
    %345 = arith.mulf %336, %314 : vector<8x128xf32>
    %346 = arith.addf %344, %345 : vector<8x128xf32>
    %c0_185 = arith.constant 0 : index
    %c0_186 = arith.constant 0 : index
    %c0_187 = arith.constant 0 : index
    %347 = vector.load %arg8[%c0_185, %c0_186, %c0_187] : memref<2x8x128xf32, #tpu.memory_space<vmem>>, vector<1x8x128xf32>
    %348 = vector.shape_cast %347 : vector<1x8x128xf32> to vector<8x128xf32>
    %349 = vector.shape_cast %346 : vector<8x128xf32> to vector<1x8x128xf32>
    tpu.vector_store %arg8[%c0_185, %c0_186, %c0_187], %349 {strides = array<i32>} : memref<2x8x128xf32, #tpu.memory_space<vmem>>, vector<1x8x128xf32>,
    %350 = arith.truncf %346 : vector<8x128xf32> to vector<8x128xbf16>
    %c0_188 = arith.constant 0 : index
    %c0_189 = arith.constant 0 : index
    %351 = vector.load %arg9[%c0_188, %c0_189] : memref<8x256xbf16, #tpu.memory_space<vmem>>, vector<8x128xbf16>
    tpu.vector_store %arg9[%c0_188, %c0_189], %350 {strides = array<i32>} : memref<8x256xbf16, #tpu.memory_space<vmem>>, vector<8x128xbf16>,
    %c1_190 = arith.constant 1 : index
    %c0_191 = arith.constant 0 : index
    %c0_192 = arith.constant 0 : index
    %352 = vector.load %arg8[%c1_190, %c0_191, %c0_192] : memref<2x8x128xf32, #tpu.memory_space<vmem>>, vector<1x8x128xf32>
    %353 = vector.shape_cast %352 : vector<1x8x128xf32> to vector<8x128xf32>
    %354 = arith.truncf %353 : vector<8x128xf32> to vector<8x128xbf16>
    %c0_193 = arith.constant 0 : index
    %c128_194 = arith.constant 128 : index
    %355 = vector.load %arg9[%c0_193, %c128_194] : memref<8x256xbf16, #tpu.memory_space<vmem>>, vector<8x128xbf16>
    tpu.vector_store %arg9[%c0_193, %c128_194], %354 {strides = array<i32>} : memref<8x256xbf16, #tpu.memory_space<vmem>>, vector<8x128xbf16>,
    %c0_195 = arith.constant 0 : index
    %c0_196 = arith.constant 0 : index
    %356 = vector.load %arg9[%c0_195, %c0_196] : memref<8x256xbf16, #tpu.memory_space<vmem>>, vector<8x256xbf16>
    %c1_197 = arith.constant 1 : index
    %c0_198 = arith.constant 0 : index
    %c0_199 = arith.constant 0 : index
    %357 = vector.load %arg2[%c1_197, %c0_198, %c0_199] : memref<2x256x512xbf16, #tpu.memory_space<vmem>>, vector<1x256x512xbf16>
    %358 = vector.shape_cast %357 : vector<1x256x512xbf16> to vector<256x512xbf16>
    %cst_200 = arith.constant dense<0.000000e+00> : vector<8x512xf32>
    %359 = tpu.matmul %356, %358, %cst_200 {dimension_numbers = #tpu.dot_dimension_numbers<[1], [0], [0], [1], [0, 0, 1, 1], [], []>} : vector<8x256xbf16>, vector<256x512xbf16>, vector<8x512xf32> -> vector<8x512xf32>
    %c1_201 = arith.constant 1 : index
    %c0_202 = arith.constant 0 : index
    %c0_203 = arith.constant 0 : index
    %360 = vector.load %arg3[%c1_201, %c0_202, %c0_203] : memref<2x1x512xf32, #tpu.memory_space<vmem>>, vector<1x1x512xf32>
    %361 = vector.shape_cast %360 : vector<1x1x512xf32> to vector<1x512xf32>
    %362 = vector.broadcast %361 : vector<1x512xf32> to vector<8x512xf32>
    %363 = arith.addf %359, %362 : vector<8x512xf32>
    %364 = vector.extract_strided_slice %363 {offsets = [0, 0], sizes = [8, 128], strides = [1, 1]} : vector<8x512xf32> to vector<8x128xf32>
    %365 = arith.negf %364 : vector<8x128xf32>
    %366 = math.exp %365 : vector<8x128xf32>
    %cst_204 = arith.constant 1.000000e+00 : f32
    %367 = vector.broadcast %cst_204 : f32 to vector<8x128xf32>
    %368 = arith.addf %367, %366 : vector<8x128xf32>
    %369 = arith.divf %367, %368 : vector<8x128xf32>
    %370 = vector.extract_strided_slice %363 {offsets = [0, 128], sizes = [8, 128], strides = [1, 1]} : vector<8x512xf32> to vector<8x128xf32>
    %371 = arith.negf %370 : vector<8x128xf32>
    %372 = math.exp %371 : vector<8x128xf32>
    %cst_205 = arith.constant 1.000000e+00 : f32
    %373 = vector.broadcast %cst_205 : f32 to vector<8x128xf32>
    %374 = arith.addf %373, %372 : vector<8x128xf32>
    %375 = arith.divf %373, %374 : vector<8x128xf32>
    %376 = vector.extract_strided_slice %363 {offsets = [0, 256], sizes = [8, 128], strides = [1, 1]} : vector<8x512xf32> to vector<8x128xf32>
    %377 = vector.extract_strided_slice %363 {offsets = [0, 384], sizes = [8, 128], strides = [1, 1]} : vector<8x512xf32> to vector<8x128xf32>
    %378 = arith.mulf %369, %377 : vector<8x128xf32>
    %379 = arith.addf %376, %378 : vector<8x128xf32>
    %380 = math.tanh %379 : vector<8x128xf32>
    %cst_206 = arith.constant 1.000000e+00 : f32
    %381 = vector.broadcast %cst_206 : f32 to vector<8x128xf32>
    %382 = arith.subf %381, %375 : vector<8x128xf32>
    %383 = arith.mulf %382, %380 : vector<8x128xf32>
    %384 = arith.mulf %375, %353 : vector<8x128xf32>
    %385 = arith.addf %383, %384 : vector<8x128xf32>
    %c1_207 = arith.constant 1 : index
    %c0_208 = arith.constant 0 : index
    %c0_209 = arith.constant 0 : index
    %386 = vector.load %arg8[%c1_207, %c0_208, %c0_209] : memref<2x8x128xf32, #tpu.memory_space<vmem>>, vector<1x8x128xf32>
    %387 = vector.shape_cast %386 : vector<1x8x128xf32> to vector<8x128xf32>
    %388 = vector.shape_cast %385 : vector<8x128xf32> to vector<1x8x128xf32>
    tpu.vector_store %arg8[%c1_207, %c0_208, %c0_209], %388 {strides = array<i32>} : memref<2x8x128xf32, #tpu.memory_space<vmem>>, vector<1x8x128xf32>,
    %389 = arith.truncf %385 : vector<8x128xf32> to vector<8x128xbf16>
    %c0_210 = arith.constant 0 : index
    %c0_211 = arith.constant 0 : index
    %390 = vector.load %arg4[%c0_210, %c0_211] : memref<128x128xbf16, #tpu.memory_space<vmem>>, vector<128x128xbf16>
    %cst_212 = arith.constant dense<0.000000e+00> : vector<8x128xf32>
    %391 = tpu.matmul %389, %390, %cst_212 {dimension_numbers = #tpu.dot_dimension_numbers<[1], [0], [0], [1], [0, 0, 1, 1], [], []>} : vector<8x128xbf16>, vector<128x128xbf16>, vector<8x128xf32> -> vector<8x128xf32>
    %c0_213 = arith.constant 0 : index
    %c0_214 = arith.constant 0 : index
    %392 = vector.load %arg5[%c0_213, %c0_214] : memref<1x128xf32, #tpu.memory_space<vmem>>, vector<1x128xf32>
    %393 = vector.broadcast %392 : vector<1x128xf32> to vector<8x128xf32>
    %394 = arith.addf %391, %393 : vector<8x128xf32>
    %395 = arith.index_cast %c3_i32 : i32 to index
    %c0_215 = arith.constant 0 : index
    %c0_216 = arith.constant 0 : index
    %396 = vector.load %arg7[%395, %c0_215, %c0_216] : memref<4x8x128xf32, #tpu.memory_space<vmem>>, vector<1x8x128xf32>
    %397 = vector.shape_cast %396 : vector<1x8x128xf32> to vector<8x128xf32>
    %398 = vector.shape_cast %394 : vector<8x128xf32> to vector<1x8x128xf32>
    tpu.vector_store %arg7[%395, %c0_215, %c0_216], %398 {strides = array<i32>} : memref<4x8x128xf32, #tpu.memory_space<vmem>>, vector<1x8x128xf32>,
    %cst_217 = arith.constant dense<0xFF800000> : vector<8xf32>
    %399 = vector.multi_reduction <maximumf>, %394, %cst_217 [1] : vector<8x128xf32> to vector<8xf32>
    %400 = vector.shape_cast %399 : vector<8xf32> to vector<8x1xf32>
    %401 = vector.broadcast %400 : vector<8x1xf32> to vector<8x128xf32>
    %402 = arith.cmpf oge, %394, %401 : vector<8x128xf32>
    %c128_i32_218 = arith.constant 128 : i32
    %403 = vector.broadcast %c128_i32_218 : i32 to vector<8x128xi32>
    %404 = arith.select %402, %3, %403 : vector<8x128xi1>, vector<8x128xi32>
    %cst_219 = arith.constant dense<2147483647> : vector<8xi32>
    %405 = vector.multi_reduction <minsi>, %404, %cst_219 [1] : vector<8x128xi32> to vector<8xi32>
    %406 = vector.shape_cast %405 : vector<8xi32> to vector<8x1xi32>
    %407 = vector.broadcast %406 : vector<8x1xi32> to vector<8x128xi32>
    %408 = arith.cmpi eq, %3, %407 : vector<8x128xi32>
    %409 = arith.extui %408 : vector<8x128xi1> to vector<8x128xi32>
    %410 = arith.sitofp %409 : vector<8x128xi32> to vector<8x128xf32>
    %411 = arith.truncf %410 : vector<8x128xf32> to vector<8x128xbf16>
    %c0_220 = arith.constant 0 : index
    %c0_221 = arith.constant 0 : index
    %412 = vector.load %arg1[%c0_220, %c0_221] : memref<128x128xbf16, #tpu.memory_space<vmem>>, vector<128x128xbf16>
    %cst_222 = arith.constant dense<0.000000e+00> : vector<8x128xf32>
    %413 = tpu.matmul %411, %412, %cst_222 {dimension_numbers = #tpu.dot_dimension_numbers<[1], [0], [0], [1], [0, 0, 1, 1], [], []>} : vector<8x128xbf16>, vector<128x128xbf16>, vector<8x128xf32> -> vector<8x128xf32>
    %414 = arith.truncf %413 : vector<8x128xf32> to vector<8x128xbf16>
    %c0_223 = arith.constant 0 : index
    %c0_224 = arith.constant 0 : index
    %415 = vector.load %arg9[%c0_223, %c0_224] : memref<8x256xbf16, #tpu.memory_space<vmem>>, vector<8x128xbf16>
    tpu.vector_store %arg9[%c0_223, %c0_224], %414 {strides = array<i32>} : memref<8x256xbf16, #tpu.memory_space<vmem>>, vector<8x128xbf16>,
    %c4_i32 = arith.constant 4 : i32
    return
  }
  func.func @transform_0(%arg0: i32) -> (i32, i32) {
    %c0_i32 = arith.constant 0 : i32
    %c0_i32_0 = arith.constant 0 : i32
    %c0_i32_1 = arith.constant 0 : i32
    return %c0_i32, %c0_i32_0 : i32, i32
  }
  func.func @transform_1(%arg0: i32) -> (i32, i32, i32) {
    %c0_i32 = arith.constant 0 : i32
    %c0_i32_0 = arith.constant 0 : i32
    %c0_i32_1 = arith.constant 0 : i32
    %c0_i32_2 = arith.constant 0 : i32
    return %c0_i32, %c0_i32_0, %c0_i32_1 : i32, i32, i32
  }
  func.func @transform_2(%arg0: i32) -> (i32, i32, i32) {
    %c0_i32 = arith.constant 0 : i32
    %c0_i32_0 = arith.constant 0 : i32
    %c0_i32_1 = arith.constant 0 : i32
    %c0_i32_2 = arith.constant 0 : i32
    return %c0_i32, %c0_i32_0, %c0_i32_1 : i32, i32, i32
  }
  func.func @transform_3(%arg0: i32) -> (i32, i32) {
    %c0_i32 = arith.constant 0 : i32
    %c0_i32_0 = arith.constant 0 : i32
    %c0_i32_1 = arith.constant 0 : i32
    return %c0_i32, %c0_i32_0 : i32, i32
  }
  func.func @transform_4(%arg0: i32) -> (i32, i32) {
    %c0_i32 = arith.constant 0 : i32
    %c0_i32_0 = arith.constant 0 : i32
    %c0_i32_1 = arith.constant 0 : i32
    return %c0_i32, %c0_i32_0 : i32, i32
  }
  func.func @transform_5(%arg0: i32) -> (i32, i32, i32) {
    %c0_i32 = arith.constant 0 : i32
    %c0_i32_0 = arith.constant 0 : i32
    %c0_i32_1 = arith.constant 0 : i32
    %c0_i32_2 = arith.constant 0 : i32
    return %c0_i32, %c0_i32_0, %c0_i32_1 : i32, i32, i32
  }
  func.func @transform_6(%arg0: i32) -> (i32, i32, i32) {
    %c0_i32 = arith.constant 0 : i32
    %c0_i32_0 = arith.constant 0 : i32
    %c0_i32_1 = arith.constant 0 : i32
    return %arg0, %c0_i32, %c0_i32_0 : i32, i32, i32
  }
  func.func @transform_7(%arg0: i32) -> (i32, i32, i32) {
    %c0_i32 = arith.constant 0 : i32
    %c0_i32_0 = arith.constant 0 : i32
    %c0_i32_1 = arith.constant 0 : i32
    %c0_i32_2 = arith.constant 0 : i32
    return %c0_i32, %c0_i32_0, %c0_i32_1 : i32, i32, i32
  }
}

</mosaic_0001>

<bundles_post_ra>
// kernel: tpu_custom_call.1
= control target key start
LH: loop header
LB: loop body
LE: loop exit
PB: predicated region body
PF: predicated region fallthrough
CT: control target
= control target key end

     0   :  { %s8327_s0 = inlined_call_operand.hbm [shape: bf16[128,128], index: 0, kind: input, shape index: {}]   ;;  %s8328_s1 = inlined_call_operand.hbm [shape: bf16[2,256,512], index: 1, kind: input, shape index: {}]   ;;  %s8329_s2 = inlined_call_operand.vmem [shape: f32[2,1,512], index: 2, kind: input, shape index: {}]   ;;  %s8330_s3 = inlined_call_operand.hbm [shape: bf16[128,128], index: 3, kind: input, shape index: {}]   ;;  %s8331_s4 = inlined_call_operand.vmem [shape: f32[1,128], index: 4, kind: input, shape index: {}]   ;;  %s8332_s5 = inlined_call_operand.hbm [shape: f32[2,8,128], index: 5, kind: input, shape index: {}, may-alias: {5,7}]   ;;  %s8333_s6 = inlined_call_operand.hbm [shape: f32[8,8,128], index: 6, kind: output, shape index: {0}]   ;;  %s8334_s7 = inlined_call_operand.hbm [shape: f32[2,8,128], index: 7, kind: output, shape index: {1}, may-alias: {5,7}]  }
   0x1   :  { %8340 = sst [smem:[#allocation21_spill]] %s8328_s1 }
   0x2   :  { %13 = vsyncpa [#allocation4], 0 }
   0x3   :  { %14 = vsyncpa [#allocation7], 0 }
   0x4   :  { %15 = vsyncpa [#allocation10], 0 }
   0x5   :  { %16 = vsyncpa [#allocation5], 0 }
   0x6   :  { %18 = vsyncpa [#allocation5 + $0x1], 0 }
   0x7   :  { %19 = vsyncpa [#allocation13], 0  ;;  %s7816_s24 = smov 0   ;;  %s7818_s25 = smov 0  }
   0x8   :  { %s7820_s26 = smov 0   ;;  %s7822_s27 = smov 0  }
   0x9 LB: > { %8341 = sst [smem:[#allocation19_spill]] %s7753_s26  ;;  %s7837_s28 = sadd.s32 4294967295, %s7757_s27   ;;  %s7757_s27 = sphi %s7822_s27, %s8368_s27   ;;  %s7753_s26 = sphi %s7820_s26, %s8365_s26   ;;  %s7749_s25 = sphi %s7818_s25, %s8367_s25   ;;  %s7745_s24 = sphi %s7816_s24, %s8366_s24  }
   0xa   : > { %s5595_s29 = sadd.s32 4294967294, %s7757_s27   ;;  %s7841_s30 = sadd.s32 1, %s7757_s27  }
   0xb   : > { %s158_s8 = sadd.s32 1, %s7753_s26  ;;  %s155_s9 = ssub.s32 %s7757_s27, %s7841_s30 }
   0xc   : > { %p168_p0 = scmp.ne.s32.totalorder %s7753_s26, %s7749_s25  ;;  %p156_p1 = scmp.eq.s32.totalorder %s155_s9, 0 }
   0xd   : > { %p8335_p2 = scmp.eq.s32.totalorder %s7837_s28, 1  ;;  %p174_p3 = scmp.ne.s32.totalorder %s7749_s25, %s7745_s24 }
   0xe   : > { %p175_p4 = scmp.eq.s32.totalorder %s5595_s29, 1  ;;  %p5596_p7 = scmp.ge.s32.totalorder %s7757_s27, 1 }
   0xf   : > { %s7852_s10 = scalar_select %p156_p1, %s7753_s26, %s158_s8  }
  0x10   : > { %p7856_p5 = por %p8335_p2, %p168_p0  ;;  %p7860_p6 = por %p175_p4, %p174_p3 }
  0x11   : > { %8342 = sst [smem:[#allocation20_spill]] %s7852_s10  ;;  %p203_p8 = scmp.lt.s32.totalorder %s7757_s27, 3 }
  0x12   : > { %s8343_s11 = scalar_select %p7856_p5, 1, 0 }
  0x13   : > { %s8344_s12 = scalar_select %p7860_p6, 1, 0 }
  0x14   : > { %p8336_p10 = scmp.eq.s32.totalorder %s7837_s28, 0  ;;  %p7868_p11 = pnand %p5596_p7, %p203_p8 }
  0x15   : > { %s7759_s14 = smov [#allocation6]   ;;  %s7760_s17 = smov [#allocation3]  }
  0x16   : > { %s8345_s13 = scalar_select %p7868_p11, 1, 0 }
  0x17   : > { %s228_s15 = sshll.u32 %s7759_s14, 4  ;;  %p6536_p12 = pneg %p7868_p11  ;;  %s229_s15 = int_to_ptr.vmem [resolvable:$true] %s228_s15 }
  0x18   : > { %s215_s18 = sshll.u32 %s7760_s17, 4  ;;  %s8347_s1 = sld [smem:[#allocation21_spill]]  ;;  %s7880_s18 = int_to_ptr.vmem [resolvable:$true] %s215_s18 }
  0x19   : > { %p7876_p13 = pnand %p8336_p10, %p6536_p12 }
  0x1b   : > { %p7890_p1 = pneg %p7876_p13 }
  0x1e   : > { %s7541_s21 = scalar_lea.hbm %s8347_s1, 16384 }
  0x1f   : > { %p7542_p0 = scmp.ne.s32.totalorder %s8347_s1, %s7541_s21  ;;  %p7548_p7 = scmp.lt.u32.totalorder %s7541_s21, %s8347_s1 }
  0x21   : > { %p7544_p3 = pnand %p7890_p1, %p7542_p0 }
  0x23   : > { %p7545_p4 = pneg %p7544_p3 }
  0x25   : > { %p7550_p8 = pnand %p7548_p7, %p7545_p4 }
  0x27   : > { %7553 = shalt.err (!%p7550_p8)
}
  0x28   : > { %s7554_s14 = scalar_lea.vmem %s229_s15, 16384  ;;  %p7562_p10 = scmp.lt.s32.totalorder %s229_s15, %s229_s15 }
  0x29   : > { %p7555_p12 = scmp.ne.s32.totalorder %s229_s15, %s7554_s14  ;;  %p7563_p6 = scmp.lt.s32.totalorder %s7554_s14, %s7554_s14 }
  0x2b   : > { %p7557_p2 = pnand %p7555_p12, %p7890_p1  ;;  %p7564_p5 = por %p7563_p6, %p7562_p10 }
  0x2d   : > { %p7558_p9 = pneg %p7557_p2 }
  0x2f   : > { %p7565_p11 = pnand %p7564_p5, %p7558_p9 }
  0x31   : > { %7568 = shalt.err (!%p7565_p11)
}
  0x32   : > { %s7761_s17 = smov 256   ;;  %s7762_s19 = smov 16  }
  0x33   : > { %6542 = dma.hbm_to_vmem [thread:$0]  (!%p7876_p13), %s8347_s1, 16384, %s229_s15, [#allocation7], %s7761_s17, %s7761_s17, %s7762_s19  }
  0x34   : > { %s7569_s8 = scalar_lea.hbm %s8327_s0, 1024 }
  0x35   : > { %p7570_p2 = scmp.ne.s32.totalorder %s8327_s0, %s7569_s8  ;;  %p7576_p9 = scmp.lt.u32.totalorder %s7569_s8, %s8327_s0 }
  0x37   : > { %p7572_p5 = pnand %p7570_p2, %p7890_p1 }
  0x39   : > { %p7573_p6 = pneg %p7572_p5 }
  0x3b   : > { %p7578_p10 = pnand %p7576_p9, %p7573_p6 }
  0x3d   : > { %7581 = shalt.err (!%p7578_p10)
}
  0x3e   : > { %s7582_s15 = scalar_lea.vmem %s7880_s18, 1024  ;;  %p7590_p4 = scmp.lt.s32.totalorder %s7880_s18, %s7880_s18 }
  0x3f   : > { %p7583_p11 = scmp.ne.s32.totalorder %s7880_s18, %s7582_s15  ;;  %p7591_p7 = scmp.lt.s32.totalorder %s7582_s15, %s7582_s15 }
  0x41   : > { %p7585_p0 = pnand %p7583_p11, %p7890_p1  ;;  %p7592_p8 = por %p7591_p7, %p7590_p4 }
  0x43   : > { %p7586_p3 = pneg %p7585_p0 }
  0x45   : > { %p7593_p12 = pnand %p7592_p8, %p7586_p3 }
  0x47   : > { %7596 = shalt.err (!%p7593_p12)
}
  0x48   : > { %s7763_s10 = smov 64   ;;  %s7764_s26 = smov 4  }
  0x49   : > { %6539 = dma.hbm_to_vmem [thread:$0]  (!%p7876_p13), %s8327_s0, 1024, %s7880_s18, [#allocation4], %s7763_s10, %s7763_s10, %s7764_s26  }
  0x4a   : > { %s7765_s20 = smov [#allocation8]   ;;  %s7766_s22 = smov [#allocation9]  }
  0x4b   : > { %s244_s21 = sshll.u32 %s7765_s20, 4  ;;  %s260_s23 = sshll.u32 %s7766_s22, 4  ;;  %s245_s21 = int_to_ptr.vmem [resolvable:$true] %s244_s21  ;;  %s7929_s23 = int_to_ptr.vmem [resolvable:$true] %s260_s23 }
  0x4c   : > { %s7597_s14 = scalar_lea.hbm %s8330_s3, 1024 }
  0x4d   : > { %p7598_p2 = scmp.ne.s32.totalorder %s8330_s3, %s7597_s14  ;;  %p7604_p9 = scmp.lt.u32.totalorder %s7597_s14, %s8330_s3 }
  0x4f   : > { %p7600_p5 = pnand %p7598_p2, %p7890_p1 }
  0x51   : > { %p7601_p6 = pneg %p7600_p5 }
  0x53   : > { %p7606_p10 = pnand %p7604_p9, %p7601_p6 }
  0x55   : > { %7609 = shalt.err (!%p7606_p10)
}
  0x56   : > { %s7610_s19 = scalar_lea.vmem %s245_s21, 1024  ;;  %p7618_p4 = scmp.lt.s32.totalorder %s245_s21, %s245_s21 }
  0x57   : > { %p7611_p11 = scmp.ne.s32.totalorder %s245_s21, %s7610_s19  ;;  %p7619_p7 = scmp.lt.s32.totalorder %s7610_s19, %s7610_s19 }
  0x59   : > { %p7613_p0 = pnand %p7611_p11, %p7890_p1  ;;  %p7620_p8 = por %p7619_p7, %p7618_p4 }
  0x5b   : > { %p7614_p3 = pneg %p7613_p0 }
  0x5d   : > { %p7621_p12 = pnand %p7620_p8, %p7614_p3 }
  0x5f   : > { %7624 = shalt.err (!%p7621_p12)
}
  0x60   : > { %6545 = dma.hbm_to_vmem [thread:$0]  (!%p7876_p13), %s8330_s3, 1024, %s245_s21, [#allocation7], %s7763_s10, %s7763_s10, %s7764_s26  }
  0x61   : > { %s7625_s9 = scalar_lea.hbm %s8332_s5, 256 }
  0x62   : > { %p7626_p2 = scmp.ne.s32.totalorder %s8332_s5, %s7625_s9  ;;  %p7632_p9 = scmp.lt.u32.totalorder %s7625_s9, %s8332_s5 }
  0x64   : > { %p7628_p5 = pnand %p7626_p2, %p7890_p1 }
  0x66   : > { %p7629_p6 = pneg %p7628_p5 }
  0x68   : > { %p7634_p10 = pnand %p7632_p9, %p7629_p6 }
  0x6a   : > { %7637 = shalt.err (!%p7634_p10)
}
  0x6b   : > { %s7638_s10 = scalar_lea.vmem %s7929_s23, 256  ;;  %p7646_p4 = scmp.lt.s32.totalorder %s7929_s23, %s7929_s23 }
  0x6c   : > { %p7639_p11 = scmp.ne.s32.totalorder %s7929_s23, %s7638_s10  ;;  %p7647_p7 = scmp.lt.s32.totalorder %s7638_s10, %s7638_s10 }
  0x6e   : > { %p7641_p0 = pnand %p7639_p11, %p7890_p1  ;;  %p7648_p8 = por %p7647_p7, %p7646_p4 }
  0x70   : > { %p7642_p3 = pneg %p7641_p0 }
  0x72   : > { %p7649_p12 = pnand %p7648_p8, %p7642_p3 }
  0x74   : > { %7652 = shalt.err (!%p7649_p12)
}
  0x75   : > { %s7767_s26 = smov 128   ;;  %s7768_s21 = smov 8  }
  0x76   : > { %6548 = dma.hbm_to_vmem [thread:$0]  (!%p7876_p13), %s8332_s5, 256, %s7929_s23, [#allocation10], %s7767_s26, %s7767_s26, %s7768_s21  }
  0x77   : > { %p8349_p2 = scmp.ne.s32.totalorder %s8345_s13, 0 }
  0x78   : > { %p8350_p1 = scmp.eq.s32.totalorder (!%p8349_p2), %s7837_s28, 0 }
  0x79   : > { %276 = sbr.rel (%p8349_p2) target bundleno = 5774 (0x168e), region = 44 }
  0x80   : > { %7724 = dma.done.wait (%p8350_p1), [#allocation4], 1024   ;;  %p8351_p5 = pmov %p8350_p1 }
  0x81   : > { %p8352_p6 = pmov %p8350_p1 }
  0x82   : > { %7726 = vsyncadd (%p8351_p5), [#allocation4], 4294966272 }
  0x83   : > { %7728 = dma.done.wait (%p8352_p6), [#allocation7], 17408   ;;  %p8353_p9 = pmov %p8350_p1 }
  0x84   : > { %p8354_p10 = pmov %p8350_p1 }
  0x85   : > { %7730 = vsyncadd (%p8353_p9), [#allocation7], 4294949888 }
  0x86   : > { %7732 = dma.done.wait (%p8354_p10), [#allocation10], 256   ;;  %p8355_p13 = pmov %p8350_p1 }
  0x87   : > { %s310_s13 = sand.u32 1, %s7749_s25   ;;  %p8356_p11 = scmp.ne.s32.totalorder %s7837_s28, 0 }
  0x88   : > { %7734 = vsyncadd (%p8355_p13), [#allocation10], 4294967040  ;;  %s5606_s16 = sshll.u32 %s310_s13, 5  ;;  %v321_v0 = vld [vmem:[#allocation9] sm:$0xff] (!%p8356_p11)  ;;  %v322_v1 = vld [vmem:[#allocation9 + $0x8] sm:$0xff] (!%p8356_p11)  ;;  %v329_v3 = vlaneseq (!%p8356_p11) }
  0x89   : > { %s7989_s29 = scalar_lea.vmem [#allocation11], %s5606_s16  ;;  %320 = sbr.rel (%p8356_p11) target bundleno = 145 (0x91), region = 64  ;;  %v325_v2 = vld [vmem:[#allocation3] sm:$0x1] (!%p8356_p11)  ;;  %323 = vst [vmem:[#allocation12] sm:$0xff] (!%p8356_p11), %v321_v0  ;;  %324 = vst [vmem:[#allocation12 + $0x8] sm:$0xff] (!%p8356_p11), %v322_v1 }
  0x8a   : > { %v327_v4 = vpack.i.b16 (!%p8356_p11), %v325_v2, %v325_v2  ;;  %v330_v5 = vshrl.u32 (!%p8356_p11), %v329_v3, 7 }
  0x8c   : > { %v331_v6 = vsub.s32 (!%p8356_p11), 0, %v330_v5 }
  0x8e   : > { %v332_v7 = vrot.slane (!%p8356_p11), %v327_v4, %v331_v6 }
  0x90   : > { %333 = vst [vmem:[#allocation2] sm:$0xf] %v332_v7 }
  0x91 PF: > { %v6612_v8 = vld [vmem:[#allocation6 + $0x4] ss:$16 sps:$4 sm:$0xff]   ;;  %v6614_v9 = vld [vmem:[#allocation6] ss:$16 sps:$4 sm:$0xff]   ;;  %v6630_v15 = vld [vmem:[#allocation6 + $0xc] ss:$16 sps:$4 sm:$0xff]  }
  0x92   : > { %753 = vmatprep.subr.bf16.mxu0 %v6612_v8  ;;  %v6615_v10 = vld [vmem:[#allocation6 + $0x24] ss:$16 sps:$4 sm:$0xff]   ;;  %v6617_v11 = vld [vmem:[#allocation6 + $0x20] ss:$16 sps:$4 sm:$0xff]   ;;  %v6632_v16 = vld [vmem:[#allocation6 + $0x8] ss:$16 sps:$4 sm:$0xff]   ;;  %794 = vmatprep.subr.bf16.mxu1 %v6630_v15 }
  0x93   : > { %754 = vmatpush1.bf16.msra.mxu0 %v6614_v9  ;;  %v6618_v12 = vld [vmem:[#allocation6 + $0x44] ss:$16 sps:$4 sm:$0xff]   ;;  %v6620_v13 = vld [vmem:[#allocation6 + $0x40] ss:$16 sps:$4 sm:$0xff]   ;;  %795 = vmatpush1.bf16.msra.mxu1 %v6632_v16  ;;  %v6636_v18 = vld [vmem:[#allocation6 + $0x2c] ss:$16 sps:$4 sm:$0xff]  }
  0x94   : > { %755 = vmatprep.subr.bf16.mxu0 %v6615_v10  ;;  %v6621_v14 = vld [vmem:[#allocation6 + $0x64] ss:$16 sps:$4 sm:$0xff]   ;;  %v6623_v17 = vld [vmem:[#allocation6 + $0x60] ss:$16 sps:$4 sm:$0xff]   ;;  %v6638_v19 = vld [vmem:[#allocation6 + $0x28] ss:$16 sps:$4 sm:$0xff]   ;;  %796 = vmatprep.subr.bf16.mxu1 %v6636_v18 }
  0x95   : > { %v6624_v20 = vld [vmem:[#allocation6 + $0x84] ss:$16 sps:$4 sm:$0xff]   ;;  %v6626_v21 = vld [vmem:[#allocation6 + $0x80] ss:$16 sps:$4 sm:$0xff]   ;;  %v6642_v22 = vld [vmem:[#allocation6 + $0x4c] ss:$16 sps:$4 sm:$0xff]  }
  0x96   : > { %v6627_v23 = vld [vmem:[#allocation6 + $0xa4] ss:$16 sps:$4 sm:$0xff]   ;;  %v6644_v24 = vld [vmem:[#allocation6 + $0x48] ss:$16 sps:$4 sm:$0xff]   ;;  %v6648_v25 = vld [vmem:[#allocation6 + $0x6c] ss:$16 sps:$4 sm:$0xff]  }
  0x97   : > { %756 = vmatpush1.bf16.msra.mxu0 %v6617_v11  ;;  %797 = vmatpush1.bf16.msra.mxu1 %v6638_v19  ;;  %v6629_v26 = vld [vmem:[#allocation6 + $0xa0] ss:$16 sps:$4 sm:$0xff]   ;;  %v6633_v27 = vld [vmem:[#allocation6 + $0xc4] ss:$16 sps:$4 sm:$0xff]   ;;  %v6650_v28 = vld [vmem:[#allocation6 + $0x68] ss:$16 sps:$4 sm:$0xff]  }
  0x98   : > { %757 = vmatprep.subr.bf16.mxu0 %v6618_v12  ;;  %798 = vmatprep.subr.bf16.mxu1 %v6642_v22  ;;  %v6654_v29 = vld [vmem:[#allocation6 + $0x8c] ss:$16 sps:$4 sm:$0xff]   ;;  %v6635_v30 = vld [vmem:[#allocation6 + $0xc0] ss:$16 sps:$4 sm:$0xff]   ;;  %v6639_v31 = vld [vmem:[#allocation6 + $0xe4] ss:$16 sps:$4 sm:$0xff]  }
  0x99   : > { %v6656_v32 = vld [vmem:[#allocation6 + $0x88] ss:$16 sps:$4 sm:$0xff]   ;;  %v6660_v33 = vld [vmem:[#allocation6 + $0xac] ss:$16 sps:$4 sm:$0xff]   ;;  %v6641_v34 = vld [vmem:[#allocation6 + $0xe0] ss:$16 sps:$4 sm:$0xff]  }
  0x9a   : > { %v6645_v35 = vld [vmem:[#allocation6 + $0x104] ss:$16 sps:$4 sm:$0xff]   ;;  %v6662_v36 = vld [vmem:[#allocation6 + $0xa8] ss:$16 sps:$4 sm:$0xff]   ;;  %v6666_v37 = vld [vmem:[#allocation6 + $0xcc] ss:$16 sps:$4 sm:$0xff]  }
  0x9b   : > { %758 = vmatpush1.bf16.msra.mxu0 %v6620_v13  ;;  %799 = vmatpush1.bf16.msra.mxu1 %v6644_v24  ;;  %v6647_v38 = vld [vmem:[#allocation6 + $0x100] ss:$16 sps:$4 sm:$0xff]   ;;  %v6651_v39 = vld [vmem:[#allocation6 + $0x124] ss:$16 sps:$4 sm:$0xff]   ;;  %v6668_v40 = vld [vmem:[#allocation6 + $0xc8] ss:$16 sps:$4 sm:$0xff]  }
  0x9c   : > { %759 = vmatprep.subr.bf16.mxu0 %v6621_v14  ;;  %800 = vmatprep.subr.bf16.mxu1 %v6648_v25  ;;  %v6672_v41 = vld [vmem:[#allocation6 + $0xec] ss:$16 sps:$4 sm:$0xff]   ;;  %v6653_v42 = vld [vmem:[#allocation6 + $0x120] ss:$16 sps:$4 sm:$0xff]   ;;  %v6657_v43 = vld [vmem:[#allocation6 + $0x144] ss:$16 sps:$4 sm:$0xff]  }
  0x9d   : > { %v6674_v44 = vld [vmem:[#allocation6 + $0xe8] ss:$16 sps:$4 sm:$0xff]   ;;  %v336_v45 = vld [vmem:[#allocation12] sm:$0xff]  ;;  %v6678_v46 = vld [vmem:[#allocation6 + $0x10c] ss:$16 sps:$4 sm:$0xff]   ;;  %vm7770_vm0 = vmmov 0  }
  0x9e   : > { %v337_v47 = vpack.c.bf16 %v336_v45, %v336_v45  ;;  %v6659_v48 = vld [vmem:[#allocation6 + $0x140] ss:$16 sps:$4 sm:$0xff]   ;;  %v6663_v49 = vld [vmem:[#allocation6 + $0x164] ss:$16 sps:$4 sm:$0xff]   ;;  %v6680_v50 = vld [vmem:[#allocation6 + $0x108] ss:$16 sps:$4 sm:$0xff]  }
  0x9f   : > { %760 = vmatpush1.bf16.msra.mxu0 %v6623_v17  ;;  %801 = vmatpush1.bf16.msra.mxu1 %v6650_v28  ;;  %v6684_v51 = vld [vmem:[#allocation6 + $0x12c] ss:$16 sps:$4 sm:$0xff]   ;;  %v6665_v52 = vld [vmem:[#allocation6 + $0x160] ss:$16 sps:$4 sm:$0xff]   ;;  %v6669_v53 = vld [vmem:[#allocation6 + $0x184] ss:$16 sps:$4 sm:$0xff]  }
  0xa0   : > { %761 = vmatprep.subr.bf16.mxu0 %v6624_v20  ;;  %802 = vmatprep.subr.bf16.mxu1 %v6654_v29  ;;  %338 = vst [vmem:[#allocation2 + $0x4] sm:$0xf] %v337_v47  ;;  %v6686_v54 = vld [vmem:[#allocation6 + $0x128] ss:$16 sps:$4 sm:$0xff]   ;;  %v6690_v55 = vld [vmem:[#allocation6 + $0x14c] ss:$16 sps:$4 sm:$0xff]  }
  0xa1   : > { %v6671_v56 = vld [vmem:[#allocation6 + $0x180] ss:$16 sps:$4 sm:$0xff]   ;;  %v6693_v58 = vld [vmem:[#allocation6 + $0x148] ss:$16 sps:$4 sm:$0xff]   ;;  %v6675_v59 = vld [vmem:[#allocation6 + $0x1a4] ss:$16 sps:$4 sm:$0xff]  }
  0xa2   : > { %v6695_v61 = vld [vmem:[#allocation6 + $0x16c] ss:$16 sps:$4 sm:$0xff]   ;;  %v6677_v62 = vld [vmem:[#allocation6 + $0x1a0] ss:$16 sps:$4 sm:$0xff]   ;;  %v6697_v63 = vld [vmem:[#allocation6 + $0x168] ss:$16 sps:$4 sm:$0xff]  }
  0xa3   : > { %762 = vmatpush1.bf16.msra.mxu0 %v6626_v21  ;;  %803 = vmatpush1.bf16.msra.mxu1 %v6656_v32  ;;  %v6681_v0 = vld [vmem:[#allocation6 + $0x1c4] ss:$16 sps:$4 sm:$0xff]   ;;  %v6698_v1 = vld [vmem:[#allocation6 + $0x18c] ss:$16 sps:$4 sm:$0xff]   ;;  %v6683_v2 = vld [vmem:[#allocation6 + $0x1c0] ss:$16 sps:$4 sm:$0xff]  }
  0xa4   : > { %763 = vmatprep.subr.bf16.mxu0 %v6627_v23  ;;  %804 = vmatprep.subr.bf16.mxu1 %v6660_v33  ;;  %v6700_v3 = vld [vmem:[#allocation6 + $0x188] ss:$16 sps:$4 sm:$0xff]   ;;  %v6687_v4 = vld [vmem:[#allocation6 + $0x1e4] ss:$16 sps:$4 sm:$0xff]   ;;  %v6701_v5 = vld [vmem:[#allocation6 + $0x1ac] ss:$16 sps:$4 sm:$0xff]  }
  0xa5   : > { %v6689_v6 = vld [vmem:[#allocation6 + $0x1e0] ss:$16 sps:$4 sm:$0xff]   ;;  %v6703_v7 = vld [vmem:[#allocation6 + $0x1a8] ss:$16 sps:$4 sm:$0xff]   ;;  %v6704_v8 = vld [vmem:[#allocation6 + $0x1cc] ss:$16 sps:$4 sm:$0xff]  }
  0xa6   : > { %v6712_v9 = vld [vmem:[#allocation6 + $0x204] ss:$16 sps:$4 sm:$0xff]   ;;  %v6706_v10 = vld [vmem:[#allocation6 + $0x1c8] ss:$16 sps:$4 sm:$0xff]   ;;  %v6710_v11 = vld [vmem:[#allocation6 + $0x200] ss:$16 sps:$4 sm:$0xff]  }
  0xa7   : > { %764 = vmatpush1.bf16.msra.mxu0 %v6629_v26  ;;  %805 = vmatpush1.bf16.msra.mxu1 %v6662_v36  ;;  %v339_v57 = vld [vmem:[#allocation2] sm:$0xff]  ;;  %v6718_v17 = vld [vmem:[#allocation6 + $0x224] ss:$16 sps:$4 sm:$0xff]   ;;  %v6716_v19 = vld [vmem:[#allocation6 + $0x220] ss:$16 sps:$4 sm:$0xff]   ;;  %s6246_s10 = sshll.u32 %s7837_s28, 9 }
  0xa8   : > { %765 = vmatprep.subr.bf16.mxu0 %v6633_v27  ;;  %806 = vmatprep.subr.bf16.mxu1 %v6666_v37  ;;  %v5609_v60 = vcombine.high %v339_v57, %v339_v57  ;;  %v5608_v12 = vcombine.low %v339_v57, %v339_v57  ;;  %v6707_v13 = vld [vmem:[#allocation6 + $0x1ec] ss:$16 sps:$4 sm:$0xff]   ;;  %v6709_v14 = vld [vmem:[#allocation6 + $0x1e8] ss:$16 sps:$4 sm:$0xff]   ;;  %v6724_v21 = vld [vmem:[#allocation6 + $0x244] ss:$16 sps:$4 sm:$0xff]   ;;  %s8255_s1 = scalar_lea.hbm %s8333_s6, %s6246_s10 }
  0xa9   : > { %v6715_v15 = vld [vmem:[#allocation6 + $0x20c] ss:$16 sps:$4 sm:$0xff]   ;;  %v6713_v16 = vld [vmem:[#allocation6 + $0x208] ss:$16 sps:$4 sm:$0xff]   ;;  %v6722_v23 = vld [vmem:[#allocation6 + $0x240] ss:$16 sps:$4 sm:$0xff]  }
  0xaa   : > { %785 = vmatprep.mubr.bf16.mxu0 %v5609_v60  ;;  %826 = vmatprep.mubr.bf16.mxu1 %v5609_v60  ;;  %v6721_v18 = vld [vmem:[#allocation6 + $0x22c] ss:$16 sps:$4 sm:$0xff]   ;;  %v6719_v20 = vld [vmem:[#allocation6 + $0x228] ss:$16 sps:$4 sm:$0xff]   ;;  %v6730_v25 = vld [vmem:[#allocation6 + $0x264] ss:$16 sps:$4 sm:$0xff]  }
  0xab   : > { %766 = vmatpush1.bf16.msra.mxu0 %v6635_v30  ;;  %807 = vmatpush1.bf16.msra.mxu1 %v6668_v40  ;;  %v6727_v22 = vld [vmem:[#allocation6 + $0x24c] ss:$16 sps:$4 sm:$0xff]   ;;  %v6725_v24 = vld [vmem:[#allocation6 + $0x248] ss:$16 sps:$4 sm:$0xff]   ;;  %v6728_v27 = vld [vmem:[#allocation6 + $0x260] ss:$16 sps:$4 sm:$0xff]  }
  0xac   : > { %767 = vmatprep.subr.bf16.mxu0 %v6639_v31  ;;  %808 = vmatprep.subr.bf16.mxu1 %v6672_v41  ;;  %v6733_v26 = vld [vmem:[#allocation6 + $0x26c] ss:$16 sps:$4 sm:$0xff]   ;;  %v6731_v28 = vld [vmem:[#allocation6 + $0x268] ss:$16 sps:$4 sm:$0xff]   ;;  %v6736_v29 = vld [vmem:[#allocation6 + $0x284] ss:$16 sps:$4 sm:$0xff]  }
  0xad   : > { %v6739_v30 = vld [vmem:[#allocation6 + $0x28c] ss:$16 sps:$4 sm:$0xff]   ;;  %v6734_v31 = vld [vmem:[#allocation6 + $0x280] ss:$16 sps:$4 sm:$0xff]   ;;  %v6737_v32 = vld [vmem:[#allocation6 + $0x288] ss:$16 sps:$4 sm:$0xff]  }
  0xae   : > { %v6742_v33 = vld [vmem:[#allocation6 + $0x2a4] ss:$16 sps:$4 sm:$0xff]   ;;  %v6743_v36 = vld [vmem:[#allocation6 + $0x2a8] ss:$16 sps:$4 sm:$0xff]   ;;  %v6758_v47 = vld [vmem:[#allocation6 + $0x300] ss:$16 sps:$4 sm:$0xff]  }
  0xaf   : > { %768 = vmatpush1.bf16.msra.mxu0 %v6641_v34  ;;  %809 = vmatpush1.bf16.msra.mxu1 %v6674_v44  ;;  %v6745_v34 = vld [vmem:[#allocation6 + $0x2ac] ss:$16 sps:$4 sm:$0xff]   ;;  %v6748_v37 = vld [vmem:[#allocation6 + $0x2c4] ss:$16 sps:$4 sm:$0xff]   ;;  %v6749_v40 = vld [vmem:[#allocation6 + $0x2c8] ss:$16 sps:$4 sm:$0xff]  }
  0xb0   : > { %769 = vmatprep.subr.bf16.mxu0 %v6645_v35  ;;  %810 = vmatprep.subr.bf16.mxu1 %v6678_v46  ;;  %v6740_v35 = vld [vmem:[#allocation6 + $0x2a0] ss:$16 sps:$4 sm:$0xff]   ;;  %v6754_v41 = vld [vmem:[#allocation6 + $0x2e4] ss:$16 sps:$4 sm:$0xff]   ;;  %v6755_v44 = vld [vmem:[#allocation6 + $0x2e8] ss:$16 sps:$4 sm:$0xff]  }
  0xb1   : > { %v6760_v45 = vld [vmem:[#allocation6 + $0x304] ss:$16 sps:$4 sm:$0xff]   ;;  %v6763_v46 = vld [vmem:[#allocation6 + $0x30c] ss:$16 sps:$4 sm:$0xff]   ;;  %v6779_v60 = vld [vmem:[#allocation6 + $0x368] ss:$16 sps:$4 sm:$0xff]  }
  0xb2   : > { %v6778_v57 = vld [vmem:[#allocation6 + $0x364] ss:$16 sps:$4 sm:$0xff]   ;;  %s5480_s26 = sshll.u32 %s7989_s29, 4  ;;  %s7772_s16 = smov [#allocation12]   ;;  %s8257_s26 = int_to_ptr.vmem [resolvable:$true] %s5480_s26 }
  0xb3   : > { %770 = vmatpush1.bf16.msra.mxu0 %v6647_v38  ;;  %811 = vmatpush1.bf16.msra.mxu1 %v6680_v50  ;;  %v6751_v38 = vld [vmem:[#allocation6 + $0x2cc] ss:$16 sps:$4 sm:$0xff]   ;;  %s8259_s23 = sshll.u32 %s7772_s16, 4  ;;  %s8263_s20 = scalar_lea.sflag [#allocation5], %s310_s13  ;;  %s5494_s23 = int_to_ptr.vmem [resolvable:$true] %s8259_s23 }
  0xb4   : > { %771 = vmatprep.subr.bf16.mxu0 %v6651_v39  ;;  %812 = vmatprep.subr.bf16.mxu1 %v6684_v51  ;;  %v6746_v39 = vld [vmem:[#allocation6 + $0x2c0] ss:$16 sps:$4 sm:$0xff]   ;;  %v6769_v50 = vld [vmem:[#allocation6 + $0x32c] ss:$16 sps:$4 sm:$0xff]   ;;  %s7653_s22 = scalar_lea.vmem %s8257_s26, 512  ;;  %p8357_p3 = scmp.ne.s32.totalorder %s8343_s11, 0 }
  0xb5   : > { %v6764_v51 = vld [vmem:[#allocation6 + $0x320] ss:$16 sps:$4 sm:$0xff]   ;;  %p7654_p0 = scmp.ne.s32.totalorder %s8257_s26, %s7653_s22 }
  0xb7   : > { %772 = vmatpush1.bf16.msra.mxu0 %v6653_v42  ;;  %813 = vmatpush1.bf16.msra.mxu1 %v6686_v54  ;;  %v6757_v42 = vld [vmem:[#allocation6 + $0x2ec] ss:$16 sps:$4 sm:$0xff]   ;;  %p7655_p4 = pnand %p7654_p0, %p8357_p3 }
  0xb8   : > { %773 = vmatprep.subr.bf16.mxu0 %v6657_v43  ;;  %814 = vmatprep.subr.bf16.mxu1 %v6690_v55  ;;  %v6752_v43 = vld [vmem:[#allocation6 + $0x2e0] ss:$16 sps:$4 sm:$0xff]   ;;  %v6775_v54 = vld [vmem:[#allocation6 + $0x34c] ss:$16 sps:$4 sm:$0xff]  }
  0xb9   : > { %v6770_v55 = vld [vmem:[#allocation6 + $0x340] ss:$16 sps:$4 sm:$0xff]   ;;  %p7656_p7 = pneg %p7655_p4 }
  0xbb   : > { %774 = vmatpush1.bf16.msra.mxu0 %v6659_v48  ;;  %815 = vmatpush1.bf16.msra.mxu1 %v6693_v58  ;;  %v6761_v48 = vld [vmem:[#allocation6 + $0x308] ss:$16 sps:$4 sm:$0xff]   ;;  %v6781_v58 = vld [vmem:[#allocation6 + $0x36c] ss:$16 sps:$4 sm:$0xff]  }
  0xbc   : > { %775 = vmatprep.subr.bf16.mxu0 %v6663_v49  ;;  %816 = vmatprep.subr.bf16.mxu1 %v6695_v61  ;;  %v6766_v49 = vld [vmem:[#allocation6 + $0x324] ss:$16 sps:$4 sm:$0xff]  }
  0xbd   : > { %v6784_v61 = vld [vmem:[#allocation6 + $0x384] ss:$16 sps:$4 sm:$0xff]  }
  0xbf   : > { %776 = vmatpush1.bf16.msra.mxu0 %v6665_v52  ;;  %817 = vmatpush1.bf16.msra.mxu1 %v6697_v63  ;;  %v6767_v52 = vld [vmem:[#allocation6 + $0x328] ss:$16 sps:$4 sm:$0xff]   ;;  %v6782_v63 = vld [vmem:[#allocation6 + $0x380] ss:$16 sps:$4 sm:$0xff]  }
  0xc0   : > { %777 = vmatprep.subr.bf16.mxu0 %v6669_v53  ;;  %818 = vmatprep.subr.bf16.mxu1 %v6698_v1  ;;  %v6772_v53 = vld [vmem:[#allocation6 + $0x344] ss:$16 sps:$4 sm:$0xff]  }
  0xc1   : > { %v6790_v1 = vld [vmem:[#allocation6 + $0x3a4] ss:$16 sps:$4 sm:$0xff]  }
  0xc3   : > { %778 = vmatpush1.bf16.msra.mxu0 %v6671_v56  ;;  %819 = vmatpush1.bf16.msra.mxu1 %v6700_v3  ;;  %v6773_v56 = vld [vmem:[#allocation6 + $0x348] ss:$16 sps:$4 sm:$0xff]   ;;  %v6788_v3 = vld [vmem:[#allocation6 + $0x3a0] ss:$16 sps:$4 sm:$0xff]  }
  0xc4   : > { %779 = vmatprep.subr.bf16.mxu0 %v6675_v59  ;;  %820 = vmatprep.subr.bf16.mxu1 %v6701_v5  ;;  %v6776_v59 = vld [vmem:[#allocation6 + $0x360] ss:$16 sps:$4 sm:$0xff]   ;;  %v6796_v5 = vld [vmem:[#allocation6 + $0x3c4] ss:$16 sps:$4 sm:$0xff]  }
  0xc7   : > { %780 = vmatpush1.bf16.msra.mxu0 %v6677_v62  ;;  %821 = vmatpush1.bf16.msra.mxu1 %v6703_v7  ;;  %v6787_v62 = vld [vmem:[#allocation6 + $0x38c] ss:$16 sps:$4 sm:$0xff]   ;;  %v6794_v7 = vld [vmem:[#allocation6 + $0x3c0] ss:$16 sps:$4 sm:$0xff]  }
  0xc8   : > { %781 = vmatprep.subr.bf16.mxu0 %v6681_v0  ;;  %822 = vmatprep.subr.bf16.mxu1 %v6704_v8  ;;  %v6785_v0 = vld [vmem:[#allocation6 + $0x388] ss:$16 sps:$4 sm:$0xff]  }
  0xc9   : > { %v6797_v8 = vld [vmem:[#allocation6 + $0x3c8] ss:$16 sps:$4 sm:$0xff]  }
  0xcb   : > { %782 = vmatpush1.bf16.msra.mxu0 %v6683_v2  ;;  %823 = vmatpush1.bf16.msra.mxu1 %v6706_v10  ;;  %v6793_v2 = vld [vmem:[#allocation6 + $0x3ac] ss:$16 sps:$4 sm:$0xff]  }
  0xcc   : > { %783 = vmatprep.subr.bf16.mxu0 %v6687_v4  ;;  %824 = vmatprep.subr.bf16.mxu1 %v6707_v13  ;;  %v6791_v4 = vld [vmem:[#allocation6 + $0x3a8] ss:$16 sps:$4 sm:$0xff]   ;;  %v6805_v10 = vld [vmem:[#allocation6 + $0x3ec] ss:$16 sps:$4 sm:$0xff]   ;;  %v334_v13 = vlaneseq }
  0xcf   : > { %784 = vmatpush1.bf16.msra.mxu0 %v6689_v6  ;;  %825 = vmatpush1.bf16.msra.mxu1 %v6709_v14  ;;  %v6799_v6 = vld [vmem:[#allocation6 + $0x3cc] ss:$16 sps:$4 sm:$0xff]   ;;  %v407_v14 = vshrl.u32 %v334_v13, 7 }
  0xd0   : > { %1277 = vmatprep.subr.bf16.mxu0 %v6712_v9  ;;  %1318 = vmatprep.subr.bf16.mxu1 %v6715_v15  ;;  %v6802_v9 = vld [vmem:[#allocation6 + $0x3e4] ss:$16 sps:$4 sm:$0xff]  }
  0xd1   : > { %v7994_v15 = vsub.s32 0, %v407_v14 }
  0xd2   : > { %786 = vmatmul.mubr.bf16.vlgmr.msra.gmra.mrb[0].mxu0 %v5608_v12  ;;  %827 = vmatmul.mubr.bf16.vlgmr.msra.gmra.mrb[0].mxu1 %v5608_v12  ;;  %v6803_v12 = vld [vmem:[#allocation6 + $0x3e8] ss:$16 sps:$4 sm:$0xff]  }
  0xd3   : > { %1278 = vmatpush1.bf16.msra.mxu0 %v6710_v11  ;;  %1319 = vmatpush1.bf16.msra.mxu1 %v6713_v16  ;;  %v6800_v11 = vld [vmem:[#allocation6 + $0x3e0] ss:$16 sps:$4 sm:$0xff]   ;;  %v404_v16 = vld [vmem:[%s8329_s2] sm:$0xf] }
  0xd4   : > { %1279 = vmatprep.subr.bf16.mxu0 %v6718_v17  ;;  %1320 = vmatprep.subr.bf16.mxu1 %v6721_v18  ;;  %v7999_v17 = vsub.s32 1, %v407_v14  ;;  %v409_v18 = vrot.slane %v404_v16, %v7994_v15 }
  0xd7   : > { %1280 = vmatpush1.bf16.msra.mxu0 %v6716_v19  ;;  %1321 = vmatpush1.bf16.msra.mxu1 %v6719_v20  ;;  %v413_v20 = vrot.slane %v404_v16, %v7999_v17 }
  0xd8   : > { %1281 = vmatprep.subr.bf16.mxu0 %v6724_v21  ;;  %1322 = vmatprep.subr.bf16.mxu1 %v6727_v22 }
  0xdb   : > { %1282 = vmatpush1.bf16.msra.mxu0 %v6722_v23  ;;  %1323 = vmatpush1.bf16.msra.mxu1 %v6725_v24 }
  0xdc   : > { %1283 = vmatprep.subr.bf16.mxu0 %v6730_v25  ;;  %1324 = vmatprep.subr.bf16.mxu1 %v6733_v26 }
  0xdf   : > { %1284 = vmatpush1.bf16.msra.mxu0 %v6728_v27  ;;  %1325 = vmatpush1.bf16.msra.mxu1 %v6731_v28 }
  0xe0   : > { %1285 = vmatprep.subr.bf16.mxu0 %v6736_v29  ;;  %1326 = vmatprep.subr.bf16.mxu1 %v6739_v30 }
  0xe3   : > { %1286 = vmatpush1.bf16.msra.mxu0 %v6734_v31  ;;  %1327 = vmatpush1.bf16.msra.mxu1 %v6737_v32 }
  0xe4   : > { %1287 = vmatprep.subr.bf16.mxu0 %v6742_v33  ;;  %1328 = vmatprep.subr.bf16.mxu1 %v6745_v34  ;;  %v8003_v34 = vsub.s32 3, %v407_v14 }
  0xe7   : > { %1288 = vmatpush1.bf16.msra.mxu0 %v6740_v35  ;;  %1329 = vmatpush1.bf16.msra.mxu1 %v6743_v36  ;;  %v8005_v35 = vsub.s32 2, %v407_v14  ;;  %v421_v36 = vrot.slane %v404_v16, %v8003_v34 }
  0xe8   : > { %1289 = vmatprep.subr.bf16.mxu0 %v6748_v37  ;;  %1330 = vmatprep.subr.bf16.mxu1 %v6751_v38 }
  0xeb   : > { %1290 = vmatpush1.bf16.msra.mxu0 %v6746_v39  ;;  %1331 = vmatpush1.bf16.msra.mxu1 %v6749_v40  ;;  %v417_v39 = vrot.slane %v404_v16, %v8005_v35 }
  0xec   : > { %1291 = vmatprep.subr.bf16.mxu0 %v6754_v41  ;;  %1332 = vmatprep.subr.bf16.mxu1 %v6757_v42 }
  0xef   : > { %1292 = vmatpush1.bf16.msra.mxu0 %v6752_v43  ;;  %1333 = vmatpush1.bf16.msra.mxu1 %v6755_v44 }
  0xf0   : > { %1293 = vmatprep.subr.bf16.mxu0 %v6760_v45  ;;  %1334 = vmatprep.subr.bf16.mxu1 %v6763_v46 }
  0xf3   : > { %1294 = vmatpush1.bf16.msra.mxu0 %v6758_v47  ;;  %1335 = vmatpush1.bf16.msra.mxu1 %v6761_v48  ;;  %v7526_v48 = vld [vmem:[#allocation12] sm:$0xff] }
  0xf4   : > { %1295 = vmatprep.subr.bf16.mxu0 %v6766_v49  ;;  %1336 = vmatprep.subr.bf16.mxu1 %v6769_v50 }
  0xf7   : > { %1296 = vmatpush1.bf16.msra.mxu0 %v6764_v51  ;;  %1337 = vmatpush1.bf16.msra.mxu1 %v6767_v52  ;;  %v8009_v51 = vld [vmem:[#allocation12 + $0x8] sm:$0xff] }
  0xf8   : > { %1297 = vmatprep.subr.bf16.mxu0 %v6772_v53  ;;  %1338 = vmatprep.subr.bf16.mxu1 %v6775_v54  ;;  %v7527_v53 = vpack.c.bf16 %v8009_v51, %v8009_v51 }
  0xfa   : > { %1309 = vmatprep.mubr.bf16.mxu0 %v7527_v53  ;;  %1350 = vmatprep.mubr.bf16.mxu1 %v7527_v53  ;;  %v6817_v53 = vld [vmem:[#allocation3 + $0x18] sm:$0xff]  }
  0xfb   : > { %1298 = vmatpush1.bf16.msra.mxu0 %v6770_v55  ;;  %1339 = vmatpush1.bf16.msra.mxu1 %v6773_v56  ;;  %v6806_v55 = vld [vmem:[#allocation8] sm:$0xff]   ;;  %v7769_v56 = vmov 0.0  }
  0xfc   : > { %1299 = vmatprep.subr.bf16.mxu0 %v6778_v57  ;;  %1340 = vmatprep.subr.bf16.mxu1 %v6781_v58  ;;  %v6807_v57 = vld [vmem:[#allocation8 + $0x8] sm:$0xff]   ;;  %v6808_v58 = vld [vmem:[#allocation8 + $0x10] sm:$0xff]  }
  0xff   : > { %1300 = vmatpush1.bf16.msra.mxu0 %v6776_v59  ;;  %1341 = vmatpush1.bf16.msra.mxu1 %v6779_v60  ;;  %v6809_v59 = vld [vmem:[#allocation8 + $0x18] sm:$0xff]   ;;  %v6810_v60 = vld [vmem:[#allocation8 + $0x20] sm:$0xff]  }
 0x100   : > { %1301 = vmatprep.subr.bf16.mxu0 %v6784_v61  ;;  %1342 = vmatprep.subr.bf16.mxu1 %v6787_v62  ;;  %v6811_v61 = vld [vmem:[#allocation8 + $0x28] sm:$0xff]   ;;  %v6812_v62 = vld [vmem:[#allocation8 + $0x30] sm:$0xff]  }
 0x103   : > { %1302 = vmatpush1.bf16.msra.mxu0 %v6782_v63  ;;  %1343 = vmatpush1.bf16.msra.mxu1 %v6785_v0  ;;  %v6813_v63 = vld [vmem:[#allocation8 + $0x38] sm:$0xff]  }
 0x104   : > { %1303 = vmatprep.subr.bf16.mxu0 %v6790_v1  ;;  %1344 = vmatprep.subr.bf16.mxu1 %v6793_v2  ;;  %v5676_v0 = vld [vmem:[%s8329_s2 + $0x4] sm:$0xf] }
 0x105   : > { %v933_v1 = vrot.slane %v5676_v0, %v7994_v15 }
 0x107   : > { %1304 = vmatpush1.bf16.msra.mxu0 %v6788_v3  ;;  %1345 = vmatpush1.bf16.msra.mxu1 %v6791_v4  ;;  %v937_v4 = vrot.slane %v5676_v0, %v7999_v17 }
 0x108   : > { %1305 = vmatprep.subr.bf16.mxu0 %v6796_v5  ;;  %1346 = vmatprep.subr.bf16.mxu1 %v6799_v6 }
 0x10b   : > { %1306 = vmatpush1.bf16.msra.mxu0 %v6794_v7  ;;  %1347 = vmatpush1.bf16.msra.mxu1 %v6797_v8 }
 0x10c   : > { %1307 = vmatprep.subr.bf16.mxu0 %v6802_v9  ;;  %1348 = vmatprep.subr.bf16.mxu1 %v6805_v10 }
 0x10f   : > { %1308 = vmatpush1.bf16.msra.mxu0 %v6800_v11  ;;  %1349 = vmatpush1.bf16.msra.mxu1 %v6803_v12 }
 0x110   : > { %6354 = vmatprep.subr.bf16.mxu0 %v7769_v56  ;;  %6374 = vmatprep.subr.bf16.mxu1 %v7769_v56 }
 0x1a5   : > { %v787_v19 = vpop.f32.mrb[0].mxu0  ;;  %v828_v28 = vpop.f32.mrb[0].mxu1 }
 0x1a6   : > { %v788_v21 = vadd.f32 %v787_v19, %v409_v18  ;;  %v789_v22 = vpop.f32.mrb[1].mxu0  ;;  %v830_v29 = vpop.f32.mrb[1].mxu1  ;;  %v829_v42 = vadd.f32 %v828_v28, %v417_v39 }
 0x1a7   : > { %v791_v23 = vpop.f32.mrb[2].mxu0  ;;  %v790_v26 = vadd.f32 %v789_v22, %v413_v20  ;;  %v832_v30 = vpop.f32.mrb[2].mxu1  ;;  %v831_v40 = vadd.f32 %v830_v29, %v421_v36  ;;  %v941_v22 = vrot.slane %v5676_v0, %v8005_v35 }
 0x1a8   : > { %v5674_v24 = vmul.f32 -1.442695, %v788_v21  ;;  %v792_v25 = vpop.f32.mrb[3].mxu0  ;;  %v833_v31 = vpop.f32.mrb[3].mxu1  ;;  %v945_v21 = vrot.slane %v5676_v0, %v8003_v34  ;;  %v6824_v0 = vld [vmem:[#allocation6 + $0x4] ss:$16 sps:$4 sm:$0xff]  }
 0x1a9   : > { %v5675_v27 = vmul.f32 -1.442695, %v790_v26 }
 0x1aa   : > { %7446 = vpow2.f32 %v5674_v24 }
 0x1ab   : > { %7448 = vpow2.f32 %v5675_v27 }
 0x1b4   : > { %v7447_v32 = vpop.eup %7446 }
 0x1b5   : > { %v838_v33 = vadd.f32 1.0, %v7447_v32  ;;  %v7449_v37 = vpop.eup %7448 }
 0x1b6   : > { %v844_v38 = vadd.f32 1.0, %v7449_v37 }
 0x1b7   : > { %7450 = vrcp.f32 %v838_v33 }
 0x1b8   : > { %7452 = vrcp.f32 %v844_v38  ;;  %v5745_v38 = vld [vmem:[%s8331_s4] ss:$0 sm:$0xff] }
 0x1c1   : > { %v7451_v41 = vpop.eup %7450 }
 0x1c2   : > { %v847_v43 = vmul.f32 %v7451_v41, %v831_v40  ;;  %v7453_v45 = vpop.eup %7452 }
 0x1c3   : > { %v850_v46 = vsub.f32 1.0, %v7453_v45  ;;  %v852_v49 = vmul.f32 %v7526_v48, %v7453_v45 }
 0x1c4   : > { %v848_v44 = vadd.f32 %v847_v43, %v829_v42 }
 0x1c6   : > { %7454 = vtanh.f32 %v848_v44  ;;  %v8054_v44 = vand.u32 127, %v334_v13  ;;  %v6818_v13 = vld [vmem:[#allocation3 + $0x20] sm:$0xff]  }
 0x1d0   : > { %v7455_v47 = vpop.eup %7454 }
 0x1d1   : > { %v851_v50 = vmul.f32 %v7455_v47, %v850_v46 }
 0x1d3   : > { %v8011_v52 = vadd.f32 %v852_v49, %v851_v50  ;;  %v6814_v49 = vld [vmem:[#allocation3] sm:$0xff]   ;;  %v6815_v50 = vld [vmem:[#allocation3 + $0x8] sm:$0xff]  }
 0x1d5   : > { %v8017_v54 = vpack.c.bf16 %v8011_v52, %v8011_v52 }
 0x1d7   : > { %1310 = vmatmul.mubr.bf16.vlgmr.msra.gmra.mrb[4].mxu0 %v8017_v54  ;;  %1351 = vmatmul.mubr.bf16.vlgmr.msra.gmra.mrb[4].mxu1 %v8017_v54 }
 0x1d8   : > { %6355 = vmatpush3.bf16.msra.mxu0 %v6806_v55  ;;  %6370 = vmatprep.mubr.msk.bf16.mxu0 %vm7770_vm0, %v7769_v56  ;;  %v6819_v55 = vld [vmem:[#allocation3 + $0x28] sm:$0xff]  }
 0x1d9   : > { %6356 = vmatprep.subr.bf16.mxu0 %v7769_v56  ;;  %6390 = vmatprep.mubr.msk.bf16.mxu1 %vm7770_vm0, %v7769_v56 }
 0x1da   : > { %6375 = vmatpush3.bf16.msra.mxu1 %v6814_v49  ;;  %v6857_v49 = vld [vmem:[#allocation6 + $0xac] ss:$16 sps:$4 sm:$0xff]  }
 0x1db   : > { %6376 = vmatprep.subr.bf16.mxu1 %v7769_v56 }
 0x1dc   : > { %6357 = vmatpush3.bf16.msra.mxu0 %v6807_v57  ;;  %v6820_v57 = vld [vmem:[#allocation3 + $0x30] sm:$0xff]  }
 0x1dd   : > { %6358 = vmatprep.subr.bf16.mxu0 %v7769_v56 }
 0x1de   : > { %6377 = vmatpush3.bf16.msra.mxu1 %v6815_v50  ;;  %v6855_v50 = vld [vmem:[#allocation6 + $0xa8] ss:$16 sps:$4 sm:$0xff]  }
 0x1df   : > { %6378 = vmatprep.subr.bf16.mxu1 %v7769_v56 }
 0x1e0   : > { %6359 = vmatpush3.bf16.msra.mxu0 %v6808_v58 }
 0x1e1   : > { %6360 = vmatprep.subr.bf16.mxu0 %v7769_v56 }
 0x1e4   : > { %6361 = vmatpush3.bf16.msra.mxu0 %v6809_v59 }
 0x1e5   : > { %6362 = vmatprep.subr.bf16.mxu0 %v7769_v56 }
 0x1e8   : > { %6363 = vmatpush3.bf16.msra.mxu0 %v6810_v60 }
 0x1e9   : > { %6364 = vmatprep.subr.bf16.mxu0 %v7769_v56 }
 0x1ec   : > { %6365 = vmatpush3.bf16.msra.mxu0 %v6811_v61 }
 0x1ed   : > { %6366 = vmatprep.subr.bf16.mxu0 %v7769_v56 }
 0x1f0   : > { %6367 = vmatpush3.bf16.msra.mxu0 %v6812_v62  ;;  %v6821_v62 = vld [vmem:[#allocation3 + $0x38] sm:$0xff]  }
 0x1f1   : > { %6368 = vmatprep.subr.bf16.mxu0 %v7769_v56 }
 0x1f4   : > { %6369 = vmatpush3.bf16.msra.mxu0 %v6813_v63  ;;  %v6822_v63 = vld [vmem:[#allocation6] ss:$16 sps:$4 sm:$0xff]  }
 0x1f5   : > { %2037 = vmatprep.subr.bf16.mxu0 %v6824_v0  ;;  %v6891_v0 = vld [vmem:[#allocation6 + $0x168] ss:$16 sps:$4 sm:$0xff]  }
 0x2aa   : > { %v1311_v2 = vpop.f32.mrb[4].mxu0  ;;  %v1352_v3 = vpop.f32.mrb[4].mxu1 }
 0x2ab   : > { %v1312_v5 = vadd.f32 %v1311_v2, %v933_v1  ;;  %v1313_v6 = vpop.f32.mrb[5].mxu0  ;;  %v1354_v7 = vpop.f32.mrb[5].mxu1  ;;  %v1353_v26 = vadd.f32 %v1352_v3, %v941_v22  ;;  %v6827_v1 = vld [vmem:[#allocation6 + $0xc] ss:$16 sps:$4 sm:$0xff]   ;;  %v6830_v2 = vld [vmem:[#allocation6 + $0x24] ss:$16 sps:$4 sm:$0xff]  }
 0x2ac   : > { %v1315_v8 = vpop.f32.mrb[6].mxu0  ;;  %v1356_v9 = vpop.f32.mrb[6].mxu1  ;;  %v1314_v14 = vadd.f32 %v1313_v6, %v937_v4  ;;  %v1355_v24 = vadd.f32 %v1354_v7, %v945_v21  ;;  %v6828_v3 = vld [vmem:[#allocation6 + $0x20] ss:$16 sps:$4 sm:$0xff]   ;;  %v6836_v4 = vld [vmem:[#allocation6 + $0x44] ss:$16 sps:$4 sm:$0xff]  }
 0x2ad   : > { %v5743_v10 = vmul.f32 -1.442695, %v1312_v5  ;;  %v1316_v11 = vpop.f32.mrb[7].mxu0  ;;  %v1357_v12 = vpop.f32.mrb[7].mxu1  ;;  %v6834_v5 = vld [vmem:[#allocation6 + $0x40] ss:$16 sps:$4 sm:$0xff]  }
 0x2ae   : > { %v5744_v16 = vmul.f32 -1.442695, %v1314_v14  ;;  %v6842_v6 = vld [vmem:[#allocation6 + $0x64] ss:$16 sps:$4 sm:$0xff]   ;;  %v6840_v7 = vld [vmem:[#allocation6 + $0x60] ss:$16 sps:$4 sm:$0xff]  }
 0x2af   : > { %7456 = vpow2.f32 %v5743_v10  ;;  %v6848_v8 = vld [vmem:[#allocation6 + $0x84] ss:$16 sps:$4 sm:$0xff]   ;;  %v6846_v9 = vld [vmem:[#allocation6 + $0x80] ss:$16 sps:$4 sm:$0xff]  }
 0x2b0   : > { %7458 = vpow2.f32 %v5744_v16  ;;  %v6854_v10 = vld [vmem:[#allocation6 + $0xa4] ss:$16 sps:$4 sm:$0xff]   ;;  %v6852_v11 = vld [vmem:[#allocation6 + $0xa0] ss:$16 sps:$4 sm:$0xff]  }
 0x2b1   : > { %v6860_v12 = vld [vmem:[#allocation6 + $0xc4] ss:$16 sps:$4 sm:$0xff]   ;;  %v6858_v14 = vld [vmem:[#allocation6 + $0xc0] ss:$16 sps:$4 sm:$0xff]  }
 0x2b2   : > { %v6866_v16 = vld [vmem:[#allocation6 + $0xe4] ss:$16 sps:$4 sm:$0xff]   ;;  %v6876_v22 = vld [vmem:[#allocation6 + $0x120] ss:$16 sps:$4 sm:$0xff]  }
 0x2b3   : > { %v6878_v21 = vld [vmem:[#allocation6 + $0x124] ss:$16 sps:$4 sm:$0xff]  }
 0x2b9   : > { %v7457_v18 = vpop.eup %7456 }
 0x2ba   : > { %v1362_v19 = vadd.f32 1.0, %v7457_v18  ;;  %v7459_v20 = vpop.eup %7458  ;;  %v6864_v18 = vld [vmem:[#allocation6 + $0xe0] ss:$16 sps:$4 sm:$0xff]  }
 0x2bb   : > { %v1368_v23 = vadd.f32 1.0, %v7459_v20  ;;  %v6870_v20 = vld [vmem:[#allocation6 + $0x100] ss:$16 sps:$4 sm:$0xff]  }
 0x2bc   : > { %7460 = vrcp.f32 %v1362_v19  ;;  %v6872_v19 = vld [vmem:[#allocation6 + $0x104] ss:$16 sps:$4 sm:$0xff]  }
 0x2bd   : > { %7462 = vrcp.f32 %v1368_v23  ;;  %v6884_v23 = vld [vmem:[#allocation6 + $0x144] ss:$16 sps:$4 sm:$0xff]  }
 0x2c6   : > { %v7461_v25 = vpop.eup %7460 }
 0x2c7   : > { %v1371_v27 = vmul.f32 %v7461_v25, %v1355_v24  ;;  %v7463_v29 = vpop.eup %7462  ;;  %v6882_v24 = vld [vmem:[#allocation6 + $0x140] ss:$16 sps:$4 sm:$0xff]   ;;  %v6890_v25 = vld [vmem:[#allocation6 + $0x164] ss:$16 sps:$4 sm:$0xff]  }
 0x2c8   : > { %v1374_v30 = vsub.f32 1.0, %v7463_v29  ;;  %v1376_v33 = vmul.f32 %v7463_v29, %v8009_v51  ;;  %v6816_v51 = vld [vmem:[#allocation3 + $0x10] sm:$0xff]  }
 0x2c9   : > { %v1372_v28 = vadd.f32 %v1371_v27, %v1353_v26  ;;  %6379 = vmatpush3.bf16.msra.mxu1 %v6816_v51  ;;  %v6888_v26 = vld [vmem:[#allocation6 + $0x160] ss:$16 sps:$4 sm:$0xff]   ;;  %v6896_v27 = vld [vmem:[#allocation6 + $0x184] ss:$16 sps:$4 sm:$0xff]   ;;  %v6863_v51 = vld [vmem:[#allocation6 + $0xcc] ss:$16 sps:$4 sm:$0xff]  }
 0x2ca   : > { %6380 = vmatprep.subr.bf16.mxu1 %v7769_v56 }
 0x2cb   : > { %7464 = vtanh.f32 %v1372_v28  ;;  %v6894_v28 = vld [vmem:[#allocation6 + $0x180] ss:$16 sps:$4 sm:$0xff]  }
 0x2cd   : > { %6381 = vmatpush3.bf16.msra.mxu1 %v6817_v53  ;;  %v6861_v53 = vld [vmem:[#allocation6 + $0xc8] ss:$16 sps:$4 sm:$0xff]  }
 0x2ce   : > { %6382 = vmatprep.subr.bf16.mxu1 %v7769_v56 }
 0x2d1   : > { %6383 = vmatpush3.bf16.msra.mxu1 %v6818_v13  ;;  %v6869_v13 = vld [vmem:[#allocation6 + $0xec] ss:$16 sps:$4 sm:$0xff]  }
 0x2d2   : > { %6384 = vmatprep.subr.bf16.mxu1 %v7769_v56 }
 0x2d5   : > { %v7465_v31 = vpop.eup %7464  ;;  %6385 = vmatpush3.bf16.msra.mxu1 %v6819_v55  ;;  %v6867_v55 = vld [vmem:[#allocation6 + $0xe8] ss:$16 sps:$4 sm:$0xff]  }
 0x2d6   : > { %v1375_v32 = vmul.f32 %v7465_v31, %v1374_v30  ;;  %6386 = vmatprep.subr.bf16.mxu1 %v7769_v56 }
 0x2d8   : > { %v8042_v36 = vadd.f32 %v1376_v33, %v1375_v32 }
 0x2d9   : > { %6387 = vmatpush3.bf16.msra.mxu1 %v6820_v57  ;;  %v6875_v57 = vld [vmem:[#allocation6 + $0x10c] ss:$16 sps:$4 sm:$0xff]  }
 0x2da   : > { %v8046_v37 = vpack.c.bf16 %v8042_v36, %v8042_v36  ;;  %6388 = vmatprep.subr.bf16.mxu1 %v7769_v56 }
 0x2dc   : > { %6371 = vmatmul.mubr.bf16.vlgmr.msra.gmra.mrb[8].mxu0 %v8046_v37 }
 0x2dd   : > { %6389 = vmatpush3.bf16.msra.mxu1 %v6821_v62  ;;  %2038 = vmatpush1.bf16.msra.mxu0 %v6822_v63  ;;  %v6885_v62 = vld [vmem:[#allocation6 + $0x148] ss:$16 sps:$4 sm:$0xff]   ;;  %v6893_v63 = vld [vmem:[#allocation6 + $0x16c] ss:$16 sps:$4 sm:$0xff]  }
 0x2de   : > { %2078 = vmatprep.subr.bf16.mxu1 %v6827_v1  ;;  %2039 = vmatprep.subr.bf16.mxu0 %v6830_v2  ;;  %v6899_v1 = vld [vmem:[#allocation6 + $0x18c] ss:$16 sps:$4 sm:$0xff]   ;;  %v6897_v2 = vld [vmem:[#allocation6 + $0x188] ss:$16 sps:$4 sm:$0xff]  }
 0x2df   : > { %2069 = vmatprep.mubr.bf16.mxu0 %v8017_v54 }
 0x2e1   : > { %2040 = vmatpush1.bf16.msra.mxu0 %v6828_v3  ;;  %v6902_v3 = vld [vmem:[#allocation6 + $0x1a4] ss:$16 sps:$4 sm:$0xff]  }
 0x2e2   : > { %2041 = vmatprep.subr.bf16.mxu0 %v6836_v4  ;;  %v6905_v4 = vld [vmem:[#allocation6 + $0x1ac] ss:$16 sps:$4 sm:$0xff]  }
 0x2e5   : > { %2042 = vmatpush1.bf16.msra.mxu0 %v6834_v5  ;;  %v6900_v5 = vld [vmem:[#allocation6 + $0x1a0] ss:$16 sps:$4 sm:$0xff]  }
 0x2e6   : > { %2043 = vmatprep.subr.bf16.mxu0 %v6842_v6  ;;  %v6903_v6 = vld [vmem:[#allocation6 + $0x1a8] ss:$16 sps:$4 sm:$0xff]  }
 0x2e9   : > { %2044 = vmatpush1.bf16.msra.mxu0 %v6840_v7  ;;  %v6908_v7 = vld [vmem:[#allocation6 + $0x1c4] ss:$16 sps:$4 sm:$0xff]  }
 0x2ea   : > { %2045 = vmatprep.subr.bf16.mxu0 %v6848_v8  ;;  %v6911_v8 = vld [vmem:[#allocation6 + $0x1cc] ss:$16 sps:$4 sm:$0xff]  }
 0x2ed   : > { %2046 = vmatpush1.bf16.msra.mxu0 %v6846_v9  ;;  %v6906_v9 = vld [vmem:[#allocation6 + $0x1c0] ss:$16 sps:$4 sm:$0xff]  }
 0x2ee   : > { %2047 = vmatprep.subr.bf16.mxu0 %v6854_v10  ;;  %v6909_v10 = vld [vmem:[#allocation6 + $0x1c8] ss:$16 sps:$4 sm:$0xff]  }
 0x2f1   : > { %2048 = vmatpush1.bf16.msra.mxu0 %v6852_v11  ;;  %v6914_v11 = vld [vmem:[#allocation6 + $0x1e4] ss:$16 sps:$4 sm:$0xff]  }
 0x2f2   : > { %2049 = vmatprep.subr.bf16.mxu0 %v6860_v12  ;;  %v6917_v12 = vld [vmem:[#allocation6 + $0x1ec] ss:$16 sps:$4 sm:$0xff]  }
 0x2f5   : > { %2050 = vmatpush1.bf16.msra.mxu0 %v6858_v14  ;;  %v6912_v14 = vld [vmem:[#allocation6 + $0x1e0] ss:$16 sps:$4 sm:$0xff]  }
 0x2f6   : > { %2051 = vmatprep.subr.bf16.mxu0 %v6866_v16  ;;  %v6915_v16 = vld [vmem:[#allocation6 + $0x1e8] ss:$16 sps:$4 sm:$0xff]  }
 0x2f9   : > { %2052 = vmatpush1.bf16.msra.mxu0 %v6864_v18  ;;  %v6920_v18 = vld [vmem:[#allocation6 + $0x204] ss:$16 sps:$4 sm:$0xff]  }
 0x2fa   : > { %2053 = vmatprep.subr.bf16.mxu0 %v6872_v19  ;;  %v6923_v19 = vld [vmem:[#allocation6 + $0x20c] ss:$16 sps:$4 sm:$0xff]  }
 0x2fd   : > { %2054 = vmatpush1.bf16.msra.mxu0 %v6870_v20 }
 0x2fe   : > { %2055 = vmatprep.subr.bf16.mxu0 %v6878_v21 }
 0x301   : > { %2056 = vmatpush1.bf16.msra.mxu0 %v6876_v22 }
 0x302   : > { %2057 = vmatprep.subr.bf16.mxu0 %v6884_v23 }
 0x305   : > { %2058 = vmatpush1.bf16.msra.mxu0 %v6882_v24 }
 0x306   : > { %2059 = vmatprep.subr.bf16.mxu0 %v6890_v25  ;;  %v6918_v25 = vld [vmem:[#allocation6 + $0x200] ss:$16 sps:$4 sm:$0xff]  }
 0x309   : > { %2060 = vmatpush1.bf16.msra.mxu0 %v6888_v26  ;;  %v6921_v26 = vld [vmem:[#allocation6 + $0x208] ss:$16 sps:$4 sm:$0xff]  }
 0x30a   : > { %2061 = vmatprep.subr.bf16.mxu0 %v6896_v27  ;;  %v6926_v27 = vld [vmem:[#allocation6 + $0x224] ss:$16 sps:$4 sm:$0xff]  }
 0x30d   : > { %2062 = vmatpush1.bf16.msra.mxu0 %v6894_v28  ;;  %v6929_v28 = vld [vmem:[#allocation6 + $0x22c] ss:$16 sps:$4 sm:$0xff]  }
 0x30e   : > { %2063 = vmatprep.subr.bf16.mxu0 %v6902_v3  ;;  %v6977_v3 = vld [vmem:[#allocation6 + $0x32c] ss:$16 sps:$4 sm:$0xff]  }
 0x311   : > { %2064 = vmatpush1.bf16.msra.mxu0 %v6900_v5  ;;  %v6975_v5 = vld [vmem:[#allocation6 + $0x328] ss:$16 sps:$4 sm:$0xff]  }
 0x312   : > { %2065 = vmatprep.subr.bf16.mxu0 %v6908_v7  ;;  %v6983_v7 = vld [vmem:[#allocation6 + $0x34c] ss:$16 sps:$4 sm:$0xff]  }
 0x315   : > { %2066 = vmatpush1.bf16.msra.mxu0 %v6906_v9  ;;  %v6981_v9 = vld [vmem:[#allocation6 + $0x348] ss:$16 sps:$4 sm:$0xff]  }
 0x316   : > { %2067 = vmatprep.subr.bf16.mxu0 %v6914_v11  ;;  %v6989_v11 = vld [vmem:[#allocation6 + $0x36c] ss:$16 sps:$4 sm:$0xff]  }
 0x319   : > { %2068 = vmatpush1.bf16.msra.mxu0 %v6912_v14  ;;  %v6987_v14 = vld [vmem:[#allocation6 + $0x368] ss:$16 sps:$4 sm:$0xff]  }
 0x31a   : > { %2558 = vmatprep.subr.bf16.mxu0 %v6920_v18  ;;  %v6995_v18 = vld [vmem:[#allocation6 + $0x38c] ss:$16 sps:$4 sm:$0xff]  }
 0x3af   : > { %v1485_v39 = vpop.f32.mrb[8].mxu0 }
 0x3b0   : > { %v1486_v40 = vadd.f32 %v5745_v38, %v1485_v39  ;;  %v6372_v41 = vpop.f32.mrb[9].mxu0  ;;  %v6825_v38 = vld [vmem:[#allocation6 + $0x8] ss:$16 sps:$4 sm:$0xff]   ;;  %v6833_v39 = vld [vmem:[#allocation6 + $0x2c] ss:$16 sps:$4 sm:$0xff]  }
 0x3b1   : > { %v1488_v42 = vpop.f32.mrb[10].mxu0  ;;  %v6831_v41 = vld [vmem:[#allocation6 + $0x28] ss:$16 sps:$4 sm:$0xff]  }
 0x3b2   : > { %1491 = vst [vmem:[%s7989_s29] sm:$0xff] %v1486_v40  ;;  %1492 = vmax.xlane.f32.xlu0 %v1486_v40  ;;  %v6373_v43 = vpop.f32.mrb[11].mxu0  ;;  %v6839_v42 = vld [vmem:[#allocation6 + $0x4c] ss:$16 sps:$4 sm:$0xff]  }
 0x3b3   : > { %v6837_v43 = vld [vmem:[#allocation6 + $0x48] ss:$16 sps:$4 sm:$0xff]  }
 0x43f   : > { %v1493_v45 = vpop.xlane.xlu0 %1492 }
 0x440   : > { %vm1494_vm1 = vcmp.ge.f32.partialorder %v1486_v40, %v1493_v45  ;;  %v7771_v40 = vmov 1.0|1.0   ;;  %v6845_v45 = vld [vmem:[#allocation6 + $0x6c] ss:$16 sps:$4 sm:$0xff]  }
 0x441   : > { %v1495_v46 = vsel %vm1494_vm1, %v8054_v44, 128 }
 0x442   : > { %v1497_v47 = vshra.s32 %v1495_v46, 16  ;;  %v1496_v58 = vand.u32 65535, %v1495_v46  ;;  %v6843_v46 = vld [vmem:[#allocation6 + $0x68] ss:$16 sps:$4 sm:$0xff]  }
 0x444   : > { %v1499_v48 = vcvt.s32.f32 %v1497_v47  ;;  %v1498_v60 = vcvt.s32.f32 %v1496_v58  ;;  %v6851_v47 = vld [vmem:[#allocation6 + $0x8c] ss:$16 sps:$4 sm:$0xff]   ;;  %v6873_v58 = vld [vmem:[#allocation6 + $0x108] ss:$16 sps:$4 sm:$0xff]  }
 0x446   : > { %1500 = vmin.xlane.f32.xlu0 %v1499_v48 }
 0x4d3   : > { %v8064_v59 = vpop.xlane.xlu0 %1500 }
 0x4d4   : > { %vm1502_vm2 = vcmp.eq.f32.partialorder %v1499_v48, %v8064_v59  ;;  %v1507_v29 = vcvt.f32.s32 %v8064_v59  ;;  %v6849_v48 = vld [vmem:[#allocation6 + $0x88] ss:$16 sps:$4 sm:$0xff]   ;;  %v6881_v59 = vld [vmem:[#allocation6 + $0x12c] ss:$16 sps:$4 sm:$0xff]  }
 0x4d5   : > { %v1503_v61 = vsel %vm1502_vm2, %v1498_v60, inf  ;;  %v6879_v60 = vld [vmem:[#allocation6 + $0x128] ss:$16 sps:$4 sm:$0xff]  }
 0x4d6   : > { %1504 = vmin.xlane.f32.xlu1 %v1503_v61  ;;  %v1508_v31 = vshll.u32 %v1507_v29, 16  ;;  %v6887_v61 = vld [vmem:[#allocation6 + $0x14c] ss:$16 sps:$4 sm:$0xff]   ;;  %v6924_v29 = vld [vmem:[#allocation6 + $0x220] ss:$16 sps:$4 sm:$0xff]  }
 0x563   : > { %v1505_v30 = vpop.xlane.xlu1 %1504 }
 0x564   : > { %v1506_v32 = vcvt.f32.s32 %v1505_v30  ;;  %v6927_v30 = vld [vmem:[#allocation6 + $0x228] ss:$16 sps:$4 sm:$0xff]  }
 0x566   : > { %v1509_v33 = vadd.s32 %v1508_v31, %v1506_v32  ;;  %v6932_v31 = vld [vmem:[#allocation6 + $0x244] ss:$16 sps:$4 sm:$0xff]   ;;  %v6935_v32 = vld [vmem:[#allocation6 + $0x24c] ss:$16 sps:$4 sm:$0xff]  }
 0x568   : > { %vm1510_vm3 = vcmp.eq.s32.totalorder %v8054_v44, %v1509_v33  ;;  %v6930_v33 = vld [vmem:[#allocation6 + $0x240] ss:$16 sps:$4 sm:$0xff]  }
 0x569   : > { %vm5763_vm4 = vmpackc.low %vm1510_vm3, %vm1510_vm3 }
 0x56a   : > { %6391 = vmatmul.mubr.msk.bf16.vlgmr.msra.gmra.mrb[8].mxu1 %vm5763_vm4, %v7771_v40 }
 0x56b   : > { %2079 = vmatpush1.bf16.msra.mxu1 %v6825_v38  ;;  %2110 = vmatprep.mubr.bf16.mxu1 %v8017_v54  ;;  %v6933_v38 = vld [vmem:[#allocation6 + $0x248] ss:$16 sps:$4 sm:$0xff]   ;;  %v6938_v54 = vld [vmem:[#allocation6 + $0x264] ss:$16 sps:$4 sm:$0xff]  }
 0x56c   : > { %2080 = vmatprep.subr.bf16.mxu1 %v6833_v39  ;;  %v6941_v39 = vld [vmem:[#allocation6 + $0x26c] ss:$16 sps:$4 sm:$0xff]  }
 0x56f   : > { %2081 = vmatpush1.bf16.msra.mxu1 %v6831_v41  ;;  %v6936_v41 = vld [vmem:[#allocation6 + $0x260] ss:$16 sps:$4 sm:$0xff]  }
 0x570   : > { %2082 = vmatprep.subr.bf16.mxu1 %v6839_v42  ;;  %v6939_v42 = vld [vmem:[#allocation6 + $0x268] ss:$16 sps:$4 sm:$0xff]  }
 0x573   : > { %2083 = vmatpush1.bf16.msra.mxu1 %v6837_v43  ;;  %v6944_v43 = vld [vmem:[#allocation6 + $0x284] ss:$16 sps:$4 sm:$0xff]  }
 0x574   : > { %2084 = vmatprep.subr.bf16.mxu1 %v6845_v45  ;;  %v6947_v45 = vld [vmem:[#allocation6 + $0x28c] ss:$16 sps:$4 sm:$0xff]  }
 0x577   : > { %2085 = vmatpush1.bf16.msra.mxu1 %v6843_v46  ;;  %v6942_v46 = vld [vmem:[#allocation6 + $0x280] ss:$16 sps:$4 sm:$0xff]  }
 0x578   : > { %2086 = vmatprep.subr.bf16.mxu1 %v6851_v47  ;;  %v6945_v47 = vld [vmem:[#allocation6 + $0x288] ss:$16 sps:$4 sm:$0xff]  }
 0x57b   : > { %2087 = vmatpush1.bf16.msra.mxu1 %v6849_v48  ;;  %v6950_v48 = vld [vmem:[#allocation6 + $0x2a4] ss:$16 sps:$4 sm:$0xff]  }
 0x57c   : > { %2088 = vmatprep.subr.bf16.mxu1 %v6857_v49  ;;  %v6953_v49 = vld [vmem:[#allocation6 + $0x2ac] ss:$16 sps:$4 sm:$0xff]  }
 0x57f   : > { %2089 = vmatpush1.bf16.msra.mxu1 %v6855_v50  ;;  %v6948_v50 = vld [vmem:[#allocation6 + $0x2a0] ss:$16 sps:$4 sm:$0xff]  }
 0x580   : > { %2090 = vmatprep.subr.bf16.mxu1 %v6863_v51  ;;  %v6951_v51 = vld [vmem:[#allocation6 + $0x2a8] ss:$16 sps:$4 sm:$0xff]  }
 0x583   : > { %2091 = vmatpush1.bf16.msra.mxu1 %v6861_v53  ;;  %v6956_v53 = vld [vmem:[#allocation6 + $0x2c4] ss:$16 sps:$4 sm:$0xff]  }
 0x584   : > { %2092 = vmatprep.subr.bf16.mxu1 %v6869_v13  ;;  %v6959_v13 = vld [vmem:[#allocation6 + $0x2cc] ss:$16 sps:$4 sm:$0xff]  }
 0x587   : > { %2093 = vmatpush1.bf16.msra.mxu1 %v6867_v55  ;;  %v6954_v55 = vld [vmem:[#allocation6 + $0x2c0] ss:$16 sps:$4 sm:$0xff]  }
 0x588   : > { %2094 = vmatprep.subr.bf16.mxu1 %v6875_v57  ;;  %v6957_v57 = vld [vmem:[#allocation6 + $0x2c8] ss:$16 sps:$4 sm:$0xff]  }
 0x58b   : > { %2095 = vmatpush1.bf16.msra.mxu1 %v6873_v58  ;;  %v6962_v58 = vld [vmem:[#allocation6 + $0x2e4] ss:$16 sps:$4 sm:$0xff]  }
 0x58c   : > { %2096 = vmatprep.subr.bf16.mxu1 %v6881_v59  ;;  %v6965_v59 = vld [vmem:[#allocation6 + $0x2ec] ss:$16 sps:$4 sm:$0xff]  }
 0x58f   : > { %2097 = vmatpush1.bf16.msra.mxu1 %v6879_v60  ;;  %v6960_v60 = vld [vmem:[#allocation6 + $0x2e0] ss:$16 sps:$4 sm:$0xff]  }
 0x590   : > { %2098 = vmatprep.subr.bf16.mxu1 %v6887_v61  ;;  %v6963_v61 = vld [vmem:[#allocation6 + $0x2e8] ss:$16 sps:$4 sm:$0xff]  }
 0x593   : > { %2099 = vmatpush1.bf16.msra.mxu1 %v6885_v62  ;;  %v6968_v62 = vld [vmem:[#allocation6 + $0x304] ss:$16 sps:$4 sm:$0xff]  }
 0x594   : > { %2100 = vmatprep.subr.bf16.mxu1 %v6893_v63  ;;  %v6971_v63 = vld [vmem:[#allocation6 + $0x30c] ss:$16 sps:$4 sm:$0xff]  }
 0x597   : > { %2101 = vmatpush1.bf16.msra.mxu1 %v6891_v0  ;;  %v6966_v0 = vld [vmem:[#allocation6 + $0x300] ss:$16 sps:$4 sm:$0xff]  }
 0x598   : > { %2102 = vmatprep.subr.bf16.mxu1 %v6899_v1  ;;  %v6969_v1 = vld [vmem:[#allocation6 + $0x308] ss:$16 sps:$4 sm:$0xff]  }
 0x59b   : > { %2103 = vmatpush1.bf16.msra.mxu1 %v6897_v2  ;;  %v6974_v2 = vld [vmem:[#allocation6 + $0x324] ss:$16 sps:$4 sm:$0xff]  }
 0x59c   : > { %2104 = vmatprep.subr.bf16.mxu1 %v6905_v4  ;;  %v6972_v4 = vld [vmem:[#allocation6 + $0x320] ss:$16 sps:$4 sm:$0xff]  }
 0x59f   : > { %2105 = vmatpush1.bf16.msra.mxu1 %v6903_v6  ;;  %v6980_v6 = vld [vmem:[#allocation6 + $0x344] ss:$16 sps:$4 sm:$0xff]  }
 0x5a0   : > { %2106 = vmatprep.subr.bf16.mxu1 %v6911_v8  ;;  %v6978_v8 = vld [vmem:[#allocation6 + $0x340] ss:$16 sps:$4 sm:$0xff]  }
 0x5a3   : > { %2107 = vmatpush1.bf16.msra.mxu1 %v6909_v10  ;;  %v6986_v10 = vld [vmem:[#allocation6 + $0x364] ss:$16 sps:$4 sm:$0xff]  }
 0x5a4   : > { %2108 = vmatprep.subr.bf16.mxu1 %v6917_v12  ;;  %v6984_v12 = vld [vmem:[#allocation6 + $0x360] ss:$16 sps:$4 sm:$0xff]  }
 0x5a7   : > { %2109 = vmatpush1.bf16.msra.mxu1 %v6915_v16  ;;  %v6992_v16 = vld [vmem:[#allocation6 + $0x384] ss:$16 sps:$4 sm:$0xff]  }
 0x5a8   : > { %2599 = vmatprep.subr.bf16.mxu1 %v6923_v19  ;;  %v6990_v19 = vld [vmem:[#allocation6 + $0x380] ss:$16 sps:$4 sm:$0xff]  }
 0x63d   : > { %v1612_v20 = vpop.f32.mrb[8].mxu1 }
 0x63e   : > { %v6392_v21 = vpop.f32.mrb[9].mxu1  ;;  %v7530_v24 = vpack.c.bf16 %v1612_v20, %v1612_v20  ;;  %v6993_v20 = vld [vmem:[#allocation6 + $0x388] ss:$16 sps:$4 sm:$0xff]  }
 0x63f   : > { %v1615_v22 = vpop.f32.mrb[10].mxu1  ;;  %v6998_v21 = vld [vmem:[#allocation6 + $0x3a4] ss:$16 sps:$4 sm:$0xff]  }
 0x640   : > { %v6393_v23 = vpop.f32.mrb[11].mxu1  ;;  %2070 = vmatmul.mubr.bf16.vlgmr.msra.gmra.mrb[12].mxu0 %v7530_v24  ;;  %2111 = vmatmul.mubr.bf16.vlgmr.msra.gmra.mrb[12].mxu1 %v7530_v24  ;;  %v7001_v22 = vld [vmem:[#allocation6 + $0x3ac] ss:$16 sps:$4 sm:$0xff]   ;;  %v6999_v24 = vld [vmem:[#allocation6 + $0x3a8] ss:$16 sps:$4 sm:$0xff]  }
 0x641   : > { %2559 = vmatpush1.bf16.msra.mxu0 %v6918_v25  ;;  %2600 = vmatpush1.bf16.msra.mxu1 %v6921_v26  ;;  %v6996_v23 = vld [vmem:[#allocation6 + $0x3a0] ss:$16 sps:$4 sm:$0xff]   ;;  %v7004_v25 = vld [vmem:[#allocation6 + $0x3c4] ss:$16 sps:$4 sm:$0xff]   ;;  %v7007_v26 = vld [vmem:[#allocation6 + $0x3cc] ss:$16 sps:$4 sm:$0xff]  }
 0x642   : > { %2560 = vmatprep.subr.bf16.mxu0 %v6926_v27  ;;  %2601 = vmatprep.subr.bf16.mxu1 %v6929_v28  ;;  %v7002_v27 = vld [vmem:[#allocation6 + $0x3c0] ss:$16 sps:$4 sm:$0xff]   ;;  %v7005_v28 = vld [vmem:[#allocation6 + $0x3c8] ss:$16 sps:$4 sm:$0xff]  }
 0x643   : > { %2590 = vmatprep.mubr.bf16.mxu0 %v8046_v37  ;;  %2631 = vmatprep.mubr.bf16.mxu1 %v8046_v37  ;;  %v7017_v37 = vld [vmem:[#allocation8 + $0x18] sm:$0xff]  }
 0x645   : > { %2561 = vmatpush1.bf16.msra.mxu0 %v6924_v29  ;;  %2602 = vmatpush1.bf16.msra.mxu1 %v6927_v30  ;;  %v7010_v29 = vld [vmem:[#allocation6 + $0x3e4] ss:$16 sps:$4 sm:$0xff]   ;;  %v7013_v30 = vld [vmem:[#allocation6 + $0x3ec] ss:$16 sps:$4 sm:$0xff]  }
 0x646   : > { %2562 = vmatprep.subr.bf16.mxu0 %v6932_v31  ;;  %2603 = vmatprep.subr.bf16.mxu1 %v6935_v32  ;;  %v7008_v31 = vld [vmem:[#allocation6 + $0x3e0] ss:$16 sps:$4 sm:$0xff]   ;;  %v7011_v32 = vld [vmem:[#allocation6 + $0x3e8] ss:$16 sps:$4 sm:$0xff]  }
 0x649   : > { %2563 = vmatpush1.bf16.msra.mxu0 %v6930_v33  ;;  %2604 = vmatpush1.bf16.msra.mxu1 %v6933_v38  ;;  %v1688_v33 = vld [vmem:[%s8329_s2] sm:$0xf] }
 0x64a   : > { %2564 = vmatprep.subr.bf16.mxu0 %v6938_v54  ;;  %2605 = vmatprep.subr.bf16.mxu1 %v6941_v39  ;;  %v1693_v38 = vrot.slane %v1688_v33, %v7994_v15 }
 0x64d   : > { %2565 = vmatpush1.bf16.msra.mxu0 %v6936_v41  ;;  %2606 = vmatpush1.bf16.msra.mxu1 %v6939_v42  ;;  %v1697_v41 = vrot.slane %v1688_v33, %v7999_v17 }
 0x64e   : > { %2566 = vmatprep.subr.bf16.mxu0 %v6944_v43  ;;  %2607 = vmatprep.subr.bf16.mxu1 %v6947_v45 }
 0x651   : > { %2567 = vmatpush1.bf16.msra.mxu0 %v6942_v46  ;;  %2608 = vmatpush1.bf16.msra.mxu1 %v6945_v47 }
 0x652   : > { %2568 = vmatprep.subr.bf16.mxu0 %v6950_v48  ;;  %2609 = vmatprep.subr.bf16.mxu1 %v6953_v49 }
 0x655   : > { %2569 = vmatpush1.bf16.msra.mxu0 %v6948_v50  ;;  %2610 = vmatpush1.bf16.msra.mxu1 %v6951_v51 }
 0x656   : > { %2570 = vmatprep.subr.bf16.mxu0 %v6956_v53  ;;  %2611 = vmatprep.subr.bf16.mxu1 %v6959_v13 }
 0x659   : > { %2571 = vmatpush1.bf16.msra.mxu0 %v6954_v55  ;;  %2612 = vmatpush1.bf16.msra.mxu1 %v6957_v57 }
 0x65a   : > { %2572 = vmatprep.subr.bf16.mxu0 %v6962_v58  ;;  %2613 = vmatprep.subr.bf16.mxu1 %v6965_v59  ;;  %v1705_v58 = vrot.slane %v1688_v33, %v8003_v34  ;;  %v1701_v59 = vrot.slane %v1688_v33, %v8005_v35 }
 0x65d   : > { %2573 = vmatpush1.bf16.msra.mxu0 %v6960_v60  ;;  %2614 = vmatpush1.bf16.msra.mxu1 %v6963_v61 }
 0x65e   : > { %2574 = vmatprep.subr.bf16.mxu0 %v6968_v62  ;;  %2615 = vmatprep.subr.bf16.mxu1 %v6971_v63 }
 0x661   : > { %2575 = vmatpush1.bf16.msra.mxu0 %v6966_v0  ;;  %2616 = vmatpush1.bf16.msra.mxu1 %v6969_v1 }
 0x662   : > { %2576 = vmatprep.subr.bf16.mxu0 %v6974_v2  ;;  %2617 = vmatprep.subr.bf16.mxu1 %v6977_v3 }
 0x665   : > { %2577 = vmatpush1.bf16.msra.mxu0 %v6972_v4  ;;  %2618 = vmatpush1.bf16.msra.mxu1 %v6975_v5 }
 0x666   : > { %2578 = vmatprep.subr.bf16.mxu0 %v6980_v6  ;;  %2619 = vmatprep.subr.bf16.mxu1 %v6983_v7 }
 0x669   : > { %2579 = vmatpush1.bf16.msra.mxu0 %v6978_v8  ;;  %2620 = vmatpush1.bf16.msra.mxu1 %v6981_v9  ;;  %v7015_v9 = vld [vmem:[#allocation8 + $0x8] sm:$0xff]  }
 0x66a   : > { %2580 = vmatprep.subr.bf16.mxu0 %v6986_v10  ;;  %2621 = vmatprep.subr.bf16.mxu1 %v6989_v11  ;;  %v7016_v10 = vld [vmem:[#allocation8 + $0x10] sm:$0xff]   ;;  %v7018_v11 = vld [vmem:[#allocation8 + $0x20] sm:$0xff]  }
 0x66d   : > { %2581 = vmatpush1.bf16.msra.mxu0 %v6984_v12  ;;  %2622 = vmatpush1.bf16.msra.mxu1 %v6987_v14  ;;  %v7019_v12 = vld [vmem:[#allocation8 + $0x28] sm:$0xff]   ;;  %v7020_v14 = vld [vmem:[#allocation8 + $0x30] sm:$0xff]  }
 0x66e   : > { %2582 = vmatprep.subr.bf16.mxu0 %v6992_v16  ;;  %2623 = vmatprep.subr.bf16.mxu1 %v6995_v18  ;;  %v7021_v16 = vld [vmem:[#allocation8 + $0x38] sm:$0xff]  }
 0x66f   : > { %v5833_v18 = vld [vmem:[%s8329_s2 + $0x4] sm:$0xf] }
 0x671   : > { %2583 = vmatpush1.bf16.msra.mxu0 %v6990_v19  ;;  %2624 = vmatpush1.bf16.msra.mxu1 %v6993_v20  ;;  %v2214_v19 = vrot.slane %v5833_v18, %v7994_v15 }
 0x672   : > { %2584 = vmatprep.subr.bf16.mxu0 %v6998_v21  ;;  %2625 = vmatprep.subr.bf16.mxu1 %v7001_v22  ;;  %v2218_v22 = vrot.slane %v5833_v18, %v7999_v17 }
 0x675   : > { %2585 = vmatpush1.bf16.msra.mxu0 %v6996_v23  ;;  %2626 = vmatpush1.bf16.msra.mxu1 %v6999_v24 }
 0x676   : > { %2586 = vmatprep.subr.bf16.mxu0 %v7004_v25  ;;  %2627 = vmatprep.subr.bf16.mxu1 %v7007_v26 }
 0x679   : > { %2587 = vmatpush1.bf16.msra.mxu0 %v7002_v27  ;;  %2628 = vmatpush1.bf16.msra.mxu1 %v7005_v28 }
 0x67a   : > { %2588 = vmatprep.subr.bf16.mxu0 %v7010_v29  ;;  %2629 = vmatprep.subr.bf16.mxu1 %v7013_v30 }
 0x67d   : > { %2589 = vmatpush1.bf16.msra.mxu0 %v7008_v31  ;;  %2630 = vmatpush1.bf16.msra.mxu1 %v7011_v32 }
 0x67e   : > { %6394 = vmatprep.subr.bf16.mxu0 %v7769_v56  ;;  %6414 = vmatprep.subr.bf16.mxu1 %v7769_v56 }
 0x713   : > { %v2071_v54 = vpop.f32.mrb[12].mxu0  ;;  %v2112_v39 = vpop.f32.mrb[12].mxu1 }
 0x714   : > { %v2072_v42 = vadd.f32 %v2071_v54, %v1693_v38  ;;  %v2073_v43 = vpop.f32.mrb[13].mxu0  ;;  %v2114_v45 = vpop.f32.mrb[13].mxu1  ;;  %v2113_v63 = vadd.f32 %v2112_v39, %v1701_v59  ;;  %v2226_v39 = vrot.slane %v5833_v18, %v8003_v34 }
 0x715   : > { %v2075_v46 = vpop.f32.mrb[14].mxu0  ;;  %v2116_v47 = vpop.f32.mrb[14].mxu1  ;;  %v2074_v51 = vadd.f32 %v2073_v43, %v1697_v41  ;;  %v2115_v61 = vadd.f32 %v2114_v45, %v1705_v58  ;;  %v2222_v41 = vrot.slane %v5833_v18, %v8005_v35  ;;  %v5902_v58 = vld [vmem:[%s8331_s4] ss:$0 sm:$0xff]  ;;  %v7030_v18 = vld [vmem:[#allocation6] ss:$16 sps:$4 sm:$0xff]  }
 0x716   : > { %v5831_v48 = vmul.f32 -1.442695, %v2072_v42  ;;  %v2076_v49 = vpop.f32.mrb[15].mxu0  ;;  %v2117_v50 = vpop.f32.mrb[15].mxu1 }
 0x717   : > { %v5832_v53 = vmul.f32 -1.442695, %v2074_v51 }
 0x718   : > { %7466 = vpow2.f32 %v5831_v48 }
 0x719   : > { %7468 = vpow2.f32 %v5832_v53 }
 0x722   : > { %v7467_v13 = vpop.eup %7466 }
 0x723   : > { %v2122_v55 = vadd.f32 1.0, %v7467_v13  ;;  %v7469_v57 = vpop.eup %7468 }
 0x724   : > { %v2128_v60 = vadd.f32 1.0, %v7469_v57 }
 0x725   : > { %7470 = vrcp.f32 %v2122_v55 }
 0x726   : > { %7472 = vrcp.f32 %v2128_v60 }
 0x72f   : > { %v7471_v62 = vpop.eup %7470 }
 0x730   : > { %v2131_v0 = vmul.f32 %v7471_v62, %v2115_v61  ;;  %v7473_v2 = vpop.eup %7472 }
 0x731   : > { %v2134_v3 = vsub.f32 1.0, %v7473_v2  ;;  %v2136_v5 = vmul.f32 %v7473_v2, %v8011_v52  ;;  %v7014_v52 = vld [vmem:[#allocation8] sm:$0xff]  }
 0x732   : > { %v2132_v1 = vadd.f32 %v2131_v0, %v2113_v63 }
 0x734   : > { %7474 = vtanh.f32 %v2132_v1 }
 0x73e   : > { %v7475_v4 = vpop.eup %7474 }
 0x73f   : > { %v2135_v6 = vmul.f32 %v7475_v4, %v2134_v3  ;;  %v7022_v3 = vld [vmem:[#allocation3] sm:$0xff]   ;;  %v7023_v4 = vld [vmem:[#allocation3 + $0x8] sm:$0xff]  }
 0x741   : > { %v8082_v7 = vadd.f32 %v2136_v5, %v2135_v6  ;;  %v7024_v5 = vld [vmem:[#allocation3 + $0x10] sm:$0xff]   ;;  %v7025_v6 = vld [vmem:[#allocation3 + $0x18] sm:$0xff]  }
 0x743   : > { %v8086_v8 = vpack.c.bf16 %v8082_v7, %v8082_v7 }
 0x745   : > { %2591 = vmatmul.mubr.bf16.vlgmr.msra.gmra.mrb[16].mxu0 %v8086_v8  ;;  %2632 = vmatmul.mubr.bf16.vlgmr.msra.gmra.mrb[16].mxu1 %v8086_v8 }
 0x746   : > { %6410 = vmatprep.mubr.msk.bf16.mxu0 %vm7770_vm0, %v7769_v56  ;;  %6430 = vmatprep.mubr.msk.bf16.mxu1 %vm7770_vm0, %v7769_v56 }
 0x747   : > { %6395 = vmatpush3.bf16.msra.mxu0 %v7014_v52  ;;  %6415 = vmatpush3.bf16.msra.mxu1 %v7022_v3  ;;  %v7026_v52 = vld [vmem:[#allocation3 + $0x20] sm:$0xff]   ;;  %v7065_v3 = vld [vmem:[#allocation6 + $0xac] ss:$16 sps:$4 sm:$0xff]  }
 0x748   : > { %6396 = vmatprep.subr.bf16.mxu0 %v7769_v56  ;;  %6416 = vmatprep.subr.bf16.mxu1 %v7769_v56 }
 0x74b   : > { %6397 = vmatpush3.bf16.msra.mxu0 %v7015_v9  ;;  %6417 = vmatpush3.bf16.msra.mxu1 %v7023_v4  ;;  %v7027_v9 = vld [vmem:[#allocation3 + $0x28] sm:$0xff]  }
 0x74c   : > { %6398 = vmatprep.subr.bf16.mxu0 %v7769_v56  ;;  %6418 = vmatprep.subr.bf16.mxu1 %v7769_v56  ;;  %v7063_v4 = vld [vmem:[#allocation6 + $0xa8] ss:$16 sps:$4 sm:$0xff]  }
 0x74f   : > { %6399 = vmatpush3.bf16.msra.mxu0 %v7016_v10  ;;  %6419 = vmatpush3.bf16.msra.mxu1 %v7024_v5  ;;  %v7028_v10 = vld [vmem:[#allocation3 + $0x30] sm:$0xff]   ;;  %v7071_v5 = vld [vmem:[#allocation6 + $0xcc] ss:$16 sps:$4 sm:$0xff]  }
 0x750   : > { %6400 = vmatprep.subr.bf16.mxu0 %v7769_v56  ;;  %6420 = vmatprep.subr.bf16.mxu1 %v7769_v56 }
 0x753   : > { %6401 = vmatpush3.bf16.msra.mxu0 %v7017_v37  ;;  %6421 = vmatpush3.bf16.msra.mxu1 %v7025_v6  ;;  %v7069_v6 = vld [vmem:[#allocation6 + $0xc8] ss:$16 sps:$4 sm:$0xff]  }
 0x754   : > { %6402 = vmatprep.subr.bf16.mxu0 %v7769_v56  ;;  %6422 = vmatprep.subr.bf16.mxu1 %v7769_v56 }
 0x757   : > { %6403 = vmatpush3.bf16.msra.mxu0 %v7018_v11  ;;  %6423 = vmatpush3.bf16.msra.mxu1 %v7026_v52  ;;  %v7077_v52 = vld [vmem:[#allocation6 + $0xec] ss:$16 sps:$4 sm:$0xff]  }
 0x758   : > { %6404 = vmatprep.subr.bf16.mxu0 %v7769_v56  ;;  %6424 = vmatprep.subr.bf16.mxu1 %v7769_v56 }
 0x75b   : > { %6405 = vmatpush3.bf16.msra.mxu0 %v7019_v12  ;;  %6425 = vmatpush3.bf16.msra.mxu1 %v7027_v9  ;;  %v7075_v9 = vld [vmem:[#allocation6 + $0xe8] ss:$16 sps:$4 sm:$0xff]  }
 0x75c   : > { %6406 = vmatprep.subr.bf16.mxu0 %v7769_v56  ;;  %6426 = vmatprep.subr.bf16.mxu1 %v7769_v56 }
 0x75f   : > { %6407 = vmatpush3.bf16.msra.mxu0 %v7020_v14  ;;  %6427 = vmatpush3.bf16.msra.mxu1 %v7028_v10  ;;  %v7083_v10 = vld [vmem:[#allocation6 + $0x10c] ss:$16 sps:$4 sm:$0xff]  }
 0x760   : > { %6408 = vmatprep.subr.bf16.mxu0 %v7769_v56  ;;  %6428 = vmatprep.subr.bf16.mxu1 %v7769_v56 }
 0x763   : > { %6409 = vmatpush3.bf16.msra.mxu0 %v7021_v16  ;;  %v7029_v16 = vld [vmem:[#allocation3 + $0x38] sm:$0xff]  }
 0x764   : > { %6429 = vmatpush3.bf16.msra.mxu1 %v7029_v16  ;;  %v7093_v16 = vld [vmem:[#allocation6 + $0x148] ss:$16 sps:$4 sm:$0xff]  }
 0x818   : > { %v2592_v20 = vpop.f32.mrb[16].mxu0  ;;  %v2633_v21 = vpop.f32.mrb[16].mxu1 }
 0x819   : > { %v2593_v23 = vadd.f32 %v2592_v20, %v2214_v19  ;;  %v2594_v24 = vpop.f32.mrb[17].mxu0  ;;  %v2635_v25 = vpop.f32.mrb[17].mxu1  ;;  %v2634_v46 = vadd.f32 %v2633_v21, %v2222_v41  ;;  %v7032_v19 = vld [vmem:[#allocation6 + $0x4] ss:$16 sps:$4 sm:$0xff]   ;;  %v7035_v20 = vld [vmem:[#allocation6 + $0xc] ss:$16 sps:$4 sm:$0xff]  }
 0x81a   : > { %v2596_v26 = vpop.f32.mrb[18].mxu0  ;;  %v2637_v27 = vpop.f32.mrb[18].mxu1  ;;  %v2595_v31 = vadd.f32 %v2594_v24, %v2218_v22  ;;  %v2636_v43 = vadd.f32 %v2635_v25, %v2226_v39  ;;  %v7038_v21 = vld [vmem:[#allocation6 + $0x24] ss:$16 sps:$4 sm:$0xff]   ;;  %3319 = vmatprep.subr.bf16.mxu0 %v7032_v19  ;;  %3360 = vmatprep.subr.bf16.mxu1 %v7035_v20  ;;  %v7036_v22 = vld [vmem:[#allocation6 + $0x20] ss:$16 sps:$4 sm:$0xff]  }
 0x81b   : > { %v5900_v28 = vmul.f32 -1.442695, %v2593_v23  ;;  %v2597_v29 = vpop.f32.mrb[19].mxu0  ;;  %v2638_v30 = vpop.f32.mrb[19].mxu1  ;;  %v7044_v23 = vld [vmem:[#allocation6 + $0x44] ss:$16 sps:$4 sm:$0xff]  }
 0x81c   : > { %v5901_v32 = vmul.f32 -1.442695, %v2595_v31  ;;  %v7042_v24 = vld [vmem:[#allocation6 + $0x40] ss:$16 sps:$4 sm:$0xff]   ;;  %v7050_v25 = vld [vmem:[#allocation6 + $0x64] ss:$16 sps:$4 sm:$0xff]  }
 0x81d   : > { %7476 = vpow2.f32 %v5900_v28  ;;  %v7048_v26 = vld [vmem:[#allocation6 + $0x60] ss:$16 sps:$4 sm:$0xff]   ;;  %v7056_v27 = vld [vmem:[#allocation6 + $0x84] ss:$16 sps:$4 sm:$0xff]   ;;  %v7099_v19 = vld [vmem:[#allocation6 + $0x168] ss:$16 sps:$4 sm:$0xff]  }
 0x81e   : > { %7478 = vpow2.f32 %v5901_v32  ;;  %v7054_v28 = vld [vmem:[#allocation6 + $0x80] ss:$16 sps:$4 sm:$0xff]   ;;  %v7062_v29 = vld [vmem:[#allocation6 + $0xa4] ss:$16 sps:$4 sm:$0xff]   ;;  %v7107_v20 = vld [vmem:[#allocation6 + $0x18c] ss:$16 sps:$4 sm:$0xff]  }
 0x81f   : > { %v7060_v30 = vld [vmem:[#allocation6 + $0xa0] ss:$16 sps:$4 sm:$0xff]   ;;  %v7068_v31 = vld [vmem:[#allocation6 + $0xc4] ss:$16 sps:$4 sm:$0xff]  }
 0x820   : > { %v7066_v32 = vld [vmem:[#allocation6 + $0xc0] ss:$16 sps:$4 sm:$0xff]   ;;  %v7086_v41 = vld [vmem:[#allocation6 + $0x124] ss:$16 sps:$4 sm:$0xff]  }
 0x821   : > { %v7078_v39 = vld [vmem:[#allocation6 + $0x100] ss:$16 sps:$4 sm:$0xff]  }
 0x827   : > { %v7477_v33 = vpop.eup %7476 }
 0x828   : > { %v2643_v38 = vadd.f32 1.0, %v7477_v33  ;;  %v7479_v54 = vpop.eup %7478  ;;  %v7074_v33 = vld [vmem:[#allocation6 + $0xe4] ss:$16 sps:$4 sm:$0xff]  }
 0x829   : > { %v2649_v42 = vadd.f32 1.0, %v7479_v54  ;;  %v7080_v54 = vld [vmem:[#allocation6 + $0x104] ss:$16 sps:$4 sm:$0xff]  }
 0x82a   : > { %7480 = vrcp.f32 %v2643_v38  ;;  %v7072_v38 = vld [vmem:[#allocation6 + $0xe0] ss:$16 sps:$4 sm:$0xff]  }
 0x82b   : > { %7482 = vrcp.f32 %v2649_v42  ;;  %v7084_v42 = vld [vmem:[#allocation6 + $0x120] ss:$16 sps:$4 sm:$0xff]  }
 0x834   : > { %v7481_v45 = vpop.eup %7480 }
 0x835   : > { %v2652_v47 = vmul.f32 %v7481_v45, %v2636_v43  ;;  %v7483_v49 = vpop.eup %7482  ;;  %v7092_v43 = vld [vmem:[#allocation6 + $0x144] ss:$16 sps:$4 sm:$0xff]   ;;  %v7090_v45 = vld [vmem:[#allocation6 + $0x140] ss:$16 sps:$4 sm:$0xff]  }
 0x836   : > { %v2655_v50 = vsub.f32 1.0, %v7483_v49  ;;  %v2657_v13 = vmul.f32 %v7483_v49, %v8042_v36  ;;  %v7102_v49 = vld [vmem:[#allocation6 + $0x180] ss:$16 sps:$4 sm:$0xff]  }
 0x837   : > { %v2653_v48 = vadd.f32 %v2652_v47, %v2634_v46  ;;  %v7098_v46 = vld [vmem:[#allocation6 + $0x164] ss:$16 sps:$4 sm:$0xff]   ;;  %v7096_v47 = vld [vmem:[#allocation6 + $0x160] ss:$16 sps:$4 sm:$0xff]  }
 0x839   : > { %7484 = vtanh.f32 %v2653_v48  ;;  %v7104_v48 = vld [vmem:[#allocation6 + $0x184] ss:$16 sps:$4 sm:$0xff]  }
 0x843   : > { %v7485_v51 = vpop.eup %7484 }
 0x844   : > { %v2656_v53 = vmul.f32 %v7485_v51, %v2655_v50 }
 0x846   : > { %v8111_v55 = vadd.f32 %v2657_v13, %v2656_v53 }
 0x848   : > { %v8115_v57 = vpack.c.bf16 %v8111_v55, %v8111_v55 }
 0x84a   : > { %6411 = vmatmul.mubr.bf16.vlgmr.msra.gmra.mrb[20].mxu0 %v8115_v57 }
 0x84b   : > { %3320 = vmatpush1.bf16.msra.mxu0 %v7030_v18  ;;  %v7101_v18 = vld [vmem:[#allocation6 + $0x16c] ss:$16 sps:$4 sm:$0xff]   ;;  %3351 = vmatprep.mubr.bf16.mxu0 %v8086_v8 }
 0x84c   : > { %3321 = vmatprep.subr.bf16.mxu0 %v7038_v21  ;;  %v7105_v21 = vld [vmem:[#allocation6 + $0x188] ss:$16 sps:$4 sm:$0xff]  }
 0x84f   : > { %3322 = vmatpush1.bf16.msra.mxu0 %v7036_v22  ;;  %v7110_v22 = vld [vmem:[#allocation6 + $0x1a4] ss:$16 sps:$4 sm:$0xff]  }
 0x850   : > { %3323 = vmatprep.subr.bf16.mxu0 %v7044_v23  ;;  %v7113_v23 = vld [vmem:[#allocation6 + $0x1ac] ss:$16 sps:$4 sm:$0xff]  }
 0x853   : > { %3324 = vmatpush1.bf16.msra.mxu0 %v7042_v24  ;;  %v7108_v24 = vld [vmem:[#allocation6 + $0x1a0] ss:$16 sps:$4 sm:$0xff]  }
 0x854   : > { %3325 = vmatprep.subr.bf16.mxu0 %v7050_v25  ;;  %v7111_v25 = vld [vmem:[#allocation6 + $0x1a8] ss:$16 sps:$4 sm:$0xff]  }
 0x857   : > { %3326 = vmatpush1.bf16.msra.mxu0 %v7048_v26  ;;  %v7116_v26 = vld [vmem:[#allocation6 + $0x1c4] ss:$16 sps:$4 sm:$0xff]  }
 0x858   : > { %3327 = vmatprep.subr.bf16.mxu0 %v7056_v27  ;;  %v7119_v27 = vld [vmem:[#allocation6 + $0x1cc] ss:$16 sps:$4 sm:$0xff]  }
 0x85b   : > { %3328 = vmatpush1.bf16.msra.mxu0 %v7054_v28  ;;  %v7114_v28 = vld [vmem:[#allocation6 + $0x1c0] ss:$16 sps:$4 sm:$0xff]  }
 0x85c   : > { %3329 = vmatprep.subr.bf16.mxu0 %v7062_v29  ;;  %v7117_v29 = vld [vmem:[#allocation6 + $0x1c8] ss:$16 sps:$4 sm:$0xff]  }
 0x85f   : > { %3330 = vmatpush1.bf16.msra.mxu0 %v7060_v30  ;;  %v7122_v30 = vld [vmem:[#allocation6 + $0x1e4] ss:$16 sps:$4 sm:$0xff]  }
 0x860   : > { %3331 = vmatprep.subr.bf16.mxu0 %v7068_v31  ;;  %v7125_v31 = vld [vmem:[#allocation6 + $0x1ec] ss:$16 sps:$4 sm:$0xff]  }
 0x863   : > { %3332 = vmatpush1.bf16.msra.mxu0 %v7066_v32  ;;  %v7120_v32 = vld [vmem:[#allocation6 + $0x1e0] ss:$16 sps:$4 sm:$0xff]  }
 0x864   : > { %3333 = vmatprep.subr.bf16.mxu0 %v7074_v33  ;;  %v7123_v33 = vld [vmem:[#allocation6 + $0x1e8] ss:$16 sps:$4 sm:$0xff]  }
 0x867   : > { %3334 = vmatpush1.bf16.msra.mxu0 %v7072_v38  ;;  %v7128_v38 = vld [vmem:[#allocation6 + $0x204] ss:$16 sps:$4 sm:$0xff]  }
 0x868   : > { %3335 = vmatprep.subr.bf16.mxu0 %v7080_v54  ;;  %v7131_v54 = vld [vmem:[#allocation6 + $0x20c] ss:$16 sps:$4 sm:$0xff]  }
 0x86b   : > { %3336 = vmatpush1.bf16.msra.mxu0 %v7078_v39 }
 0x86c   : > { %3337 = vmatprep.subr.bf16.mxu0 %v7086_v41 }
 0x86f   : > { %3338 = vmatpush1.bf16.msra.mxu0 %v7084_v42 }
 0x870   : > { %3339 = vmatprep.subr.bf16.mxu0 %v7092_v43 }
 0x873   : > { %3340 = vmatpush1.bf16.msra.mxu0 %v7090_v45 }
 0x874   : > { %3341 = vmatprep.subr.bf16.mxu0 %v7098_v46  ;;  %v7126_v46 = vld [vmem:[#allocation6 + $0x200] ss:$16 sps:$4 sm:$0xff]  }
 0x877   : > { %3342 = vmatpush1.bf16.msra.mxu0 %v7096_v47  ;;  %v7129_v47 = vld [vmem:[#allocation6 + $0x208] ss:$16 sps:$4 sm:$0xff]  }
 0x878   : > { %3343 = vmatprep.subr.bf16.mxu0 %v7104_v48  ;;  %v7134_v48 = vld [vmem:[#allocation6 + $0x224] ss:$16 sps:$4 sm:$0xff]  }
 0x87b   : > { %3344 = vmatpush1.bf16.msra.mxu0 %v7102_v49  ;;  %v7137_v49 = vld [vmem:[#allocation6 + $0x22c] ss:$16 sps:$4 sm:$0xff]  }
 0x87c   : > { %3345 = vmatprep.subr.bf16.mxu0 %v7110_v22  ;;  %v7185_v22 = vld [vmem:[#allocation6 + $0x32c] ss:$16 sps:$4 sm:$0xff]  }
 0x87f   : > { %3346 = vmatpush1.bf16.msra.mxu0 %v7108_v24  ;;  %v7183_v24 = vld [vmem:[#allocation6 + $0x328] ss:$16 sps:$4 sm:$0xff]  }
 0x880   : > { %3347 = vmatprep.subr.bf16.mxu0 %v7116_v26  ;;  %v7191_v26 = vld [vmem:[#allocation6 + $0x34c] ss:$16 sps:$4 sm:$0xff]  }
 0x883   : > { %3348 = vmatpush1.bf16.msra.mxu0 %v7114_v28  ;;  %v7189_v28 = vld [vmem:[#allocation6 + $0x348] ss:$16 sps:$4 sm:$0xff]  }
 0x884   : > { %3349 = vmatprep.subr.bf16.mxu0 %v7122_v30  ;;  %v7197_v30 = vld [vmem:[#allocation6 + $0x36c] ss:$16 sps:$4 sm:$0xff]  }
 0x887   : > { %3350 = vmatpush1.bf16.msra.mxu0 %v7120_v32  ;;  %v7195_v32 = vld [vmem:[#allocation6 + $0x368] ss:$16 sps:$4 sm:$0xff]  }
 0x888   : > { %3840 = vmatprep.subr.bf16.mxu0 %v7128_v38  ;;  %v7203_v38 = vld [vmem:[#allocation6 + $0x38c] ss:$16 sps:$4 sm:$0xff]  }
 0x91d   : > { %v2766_v59 = vpop.f32.mrb[20].mxu0 }
 0x91e   : > { %v2767_v60 = vadd.f32 %v5902_v58, %v2766_v59  ;;  %v6412_v61 = vpop.f32.mrb[21].mxu0  ;;  %v7033_v59 = vld [vmem:[#allocation6 + $0x8] ss:$16 sps:$4 sm:$0xff]  }
 0x91f   : > { %v2769_v62 = vpop.f32.mrb[22].mxu0  ;;  %v7039_v61 = vld [vmem:[#allocation6 + $0x28] ss:$16 sps:$4 sm:$0xff]  }
 0x920   : > { %5911 = vst [vmem:[%s7989_s29 + $0x8] sm:$0xff] %v2767_v60  ;;  %2774 = vmax.xlane.f32.xlu1 %v2767_v60  ;;  %v6413_v63 = vpop.f32.mrb[23].mxu0  ;;  %v7047_v62 = vld [vmem:[#allocation6 + $0x4c] ss:$16 sps:$4 sm:$0xff]  }
 0x921   : > { %v7045_v63 = vld [vmem:[#allocation6 + $0x48] ss:$16 sps:$4 sm:$0xff]  }
 0x9ad   : > { %v2775_v36 = vpop.xlane.xlu1 %2774 }
 0x9ae   : > { %vm2776_vm5 = vcmp.ge.f32.partialorder %v2767_v60, %v2775_v36  ;;  %v7041_v60 = vld [vmem:[#allocation6 + $0x2c] ss:$16 sps:$4 sm:$0xff]  }
 0x9af   : > { %v2777_v0 = vsel %vm2776_vm5, %v8054_v44, 128  ;;  %v7053_v36 = vld [vmem:[#allocation6 + $0x6c] ss:$16 sps:$4 sm:$0xff]  }
 0x9b0   : > { %v2779_v1 = vshra.s32 %v2777_v0, 16  ;;  %v2778_v37 = vand.u32 65535, %v2777_v0  ;;  %v7051_v0 = vld [vmem:[#allocation6 + $0x68] ss:$16 sps:$4 sm:$0xff]  }
 0x9b2   : > { %v2781_v2 = vcvt.s32.f32 %v2779_v1  ;;  %v2780_v12 = vcvt.s32.f32 %v2778_v37  ;;  %v7059_v1 = vld [vmem:[#allocation6 + $0x8c] ss:$16 sps:$4 sm:$0xff]   ;;  %v7081_v37 = vld [vmem:[#allocation6 + $0x108] ss:$16 sps:$4 sm:$0xff]  }
 0x9b4   : > { %2782 = vmin.xlane.f32.xlu0 %v2781_v2 }
 0xa41   : > { %v8130_v11 = vpop.xlane.xlu0 %2782 }
 0xa42   : > { %vm2784_vm6 = vcmp.eq.f32.partialorder %v2781_v2, %v8130_v11  ;;  %v2789_v50 = vcvt.f32.s32 %v8130_v11  ;;  %v7057_v2 = vld [vmem:[#allocation6 + $0x88] ss:$16 sps:$4 sm:$0xff]   ;;  %v7089_v11 = vld [vmem:[#allocation6 + $0x12c] ss:$16 sps:$4 sm:$0xff]  }
 0xa43   : > { %v2785_v14 = vsel %vm2784_vm6, %v2780_v12, inf  ;;  %v7087_v12 = vld [vmem:[#allocation6 + $0x128] ss:$16 sps:$4 sm:$0xff]  }
 0xa44   : > { %2786 = vmin.xlane.f32.xlu1 %v2785_v14  ;;  %v2790_v53 = vshll.u32 %v2789_v50, 16  ;;  %v7095_v14 = vld [vmem:[#allocation6 + $0x14c] ss:$16 sps:$4 sm:$0xff]   ;;  %v7132_v50 = vld [vmem:[#allocation6 + $0x220] ss:$16 sps:$4 sm:$0xff]  }
 0xad1   : > { %v2787_v51 = vpop.xlane.xlu1 %2786 }
 0xad2   : > { %v2788_v13 = vcvt.f32.s32 %v2787_v51  ;;  %v7135_v51 = vld [vmem:[#allocation6 + $0x228] ss:$16 sps:$4 sm:$0xff]  }
 0xad4   : > { %v2791_v58 = vadd.s32 %v2790_v53, %v2788_v13  ;;  %v7140_v53 = vld [vmem:[#allocation6 + $0x244] ss:$16 sps:$4 sm:$0xff]   ;;  %v7143_v13 = vld [vmem:[#allocation6 + $0x24c] ss:$16 sps:$4 sm:$0xff]  }
 0xad6   : > { %vm2792_vm7 = vcmp.eq.s32.totalorder %v8054_v44, %v2791_v58  ;;  %v7138_v58 = vld [vmem:[#allocation6 + $0x240] ss:$16 sps:$4 sm:$0xff]  }
 0xad7   : > { %vm5921_vm8 = vmpackc.low %vm2792_vm7, %vm2792_vm7 }
 0xad8   : > { %6431 = vmatmul.mubr.msk.bf16.vlgmr.msra.gmra.mrb[20].mxu1 %vm5921_vm8, %v7771_v40 }
 0xad9   : > { %3361 = vmatpush1.bf16.msra.mxu1 %v7033_v59  ;;  %3392 = vmatprep.mubr.bf16.mxu1 %v8086_v8  ;;  %v7141_v59 = vld [vmem:[#allocation6 + $0x248] ss:$16 sps:$4 sm:$0xff]   ;;  %v7146_v8 = vld [vmem:[#allocation6 + $0x264] ss:$16 sps:$4 sm:$0xff]  }
 0xada   : > { %3362 = vmatprep.subr.bf16.mxu1 %v7041_v60  ;;  %v7149_v60 = vld [vmem:[#allocation6 + $0x26c] ss:$16 sps:$4 sm:$0xff]  }
 0xadd   : > { %3363 = vmatpush1.bf16.msra.mxu1 %v7039_v61  ;;  %v7144_v61 = vld [vmem:[#allocation6 + $0x260] ss:$16 sps:$4 sm:$0xff]  }
 0xade   : > { %3364 = vmatprep.subr.bf16.mxu1 %v7047_v62  ;;  %v7147_v62 = vld [vmem:[#allocation6 + $0x268] ss:$16 sps:$4 sm:$0xff]  }
 0xae1   : > { %3365 = vmatpush1.bf16.msra.mxu1 %v7045_v63  ;;  %v7152_v63 = vld [vmem:[#allocation6 + $0x284] ss:$16 sps:$4 sm:$0xff]  }
 0xae2   : > { %3366 = vmatprep.subr.bf16.mxu1 %v7053_v36  ;;  %v7155_v36 = vld [vmem:[#allocation6 + $0x28c] ss:$16 sps:$4 sm:$0xff]  }
 0xae5   : > { %3367 = vmatpush1.bf16.msra.mxu1 %v7051_v0  ;;  %v7150_v0 = vld [vmem:[#allocation6 + $0x280] ss:$16 sps:$4 sm:$0xff]  }
 0xae6   : > { %3368 = vmatprep.subr.bf16.mxu1 %v7059_v1  ;;  %v7153_v1 = vld [vmem:[#allocation6 + $0x288] ss:$16 sps:$4 sm:$0xff]  }
 0xae9   : > { %3369 = vmatpush1.bf16.msra.mxu1 %v7057_v2  ;;  %v7158_v2 = vld [vmem:[#allocation6 + $0x2a4] ss:$16 sps:$4 sm:$0xff]  }
 0xaea   : > { %3370 = vmatprep.subr.bf16.mxu1 %v7065_v3  ;;  %v7161_v3 = vld [vmem:[#allocation6 + $0x2ac] ss:$16 sps:$4 sm:$0xff]  }
 0xaed   : > { %3371 = vmatpush1.bf16.msra.mxu1 %v7063_v4  ;;  %v7156_v4 = vld [vmem:[#allocation6 + $0x2a0] ss:$16 sps:$4 sm:$0xff]  }
 0xaee   : > { %3372 = vmatprep.subr.bf16.mxu1 %v7071_v5  ;;  %v7159_v5 = vld [vmem:[#allocation6 + $0x2a8] ss:$16 sps:$4 sm:$0xff]  }
 0xaf1   : > { %3373 = vmatpush1.bf16.msra.mxu1 %v7069_v6  ;;  %v7164_v6 = vld [vmem:[#allocation6 + $0x2c4] ss:$16 sps:$4 sm:$0xff]  }
 0xaf2   : > { %3374 = vmatprep.subr.bf16.mxu1 %v7077_v52  ;;  %v7167_v52 = vld [vmem:[#allocation6 + $0x2cc] ss:$16 sps:$4 sm:$0xff]  }
 0xaf5   : > { %3375 = vmatpush1.bf16.msra.mxu1 %v7075_v9  ;;  %v7162_v9 = vld [vmem:[#allocation6 + $0x2c0] ss:$16 sps:$4 sm:$0xff]  }
 0xaf6   : > { %3376 = vmatprep.subr.bf16.mxu1 %v7083_v10  ;;  %v7165_v10 = vld [vmem:[#allocation6 + $0x2c8] ss:$16 sps:$4 sm:$0xff]  }
 0xaf9   : > { %3377 = vmatpush1.bf16.msra.mxu1 %v7081_v37  ;;  %v7170_v37 = vld [vmem:[#allocation6 + $0x2e4] ss:$16 sps:$4 sm:$0xff]  }
 0xafa   : > { %3378 = vmatprep.subr.bf16.mxu1 %v7089_v11  ;;  %v7173_v11 = vld [vmem:[#allocation6 + $0x2ec] ss:$16 sps:$4 sm:$0xff]  }
 0xafd   : > { %3379 = vmatpush1.bf16.msra.mxu1 %v7087_v12  ;;  %v7168_v12 = vld [vmem:[#allocation6 + $0x2e0] ss:$16 sps:$4 sm:$0xff]  }
 0xafe   : > { %3380 = vmatprep.subr.bf16.mxu1 %v7095_v14  ;;  %v7171_v14 = vld [vmem:[#allocation6 + $0x2e8] ss:$16 sps:$4 sm:$0xff]  }
 0xb01   : > { %3381 = vmatpush1.bf16.msra.mxu1 %v7093_v16  ;;  %v7176_v16 = vld [vmem:[#allocation6 + $0x304] ss:$16 sps:$4 sm:$0xff]  }
 0xb02   : > { %3382 = vmatprep.subr.bf16.mxu1 %v7101_v18  ;;  %v7179_v18 = vld [vmem:[#allocation6 + $0x30c] ss:$16 sps:$4 sm:$0xff]  }
 0xb05   : > { %3383 = vmatpush1.bf16.msra.mxu1 %v7099_v19  ;;  %v7174_v19 = vld [vmem:[#allocation6 + $0x300] ss:$16 sps:$4 sm:$0xff]  }
 0xb06   : > { %3384 = vmatprep.subr.bf16.mxu1 %v7107_v20  ;;  %v7177_v20 = vld [vmem:[#allocation6 + $0x308] ss:$16 sps:$4 sm:$0xff]  }
 0xb09   : > { %3385 = vmatpush1.bf16.msra.mxu1 %v7105_v21  ;;  %v7182_v21 = vld [vmem:[#allocation6 + $0x324] ss:$16 sps:$4 sm:$0xff]  }
 0xb0a   : > { %3386 = vmatprep.subr.bf16.mxu1 %v7113_v23  ;;  %v7180_v23 = vld [vmem:[#allocation6 + $0x320] ss:$16 sps:$4 sm:$0xff]  }
 0xb0d   : > { %3387 = vmatpush1.bf16.msra.mxu1 %v7111_v25  ;;  %v7188_v25 = vld [vmem:[#allocation6 + $0x344] ss:$16 sps:$4 sm:$0xff]  }
 0xb0e   : > { %3388 = vmatprep.subr.bf16.mxu1 %v7119_v27  ;;  %v7186_v27 = vld [vmem:[#allocation6 + $0x340] ss:$16 sps:$4 sm:$0xff]  }
 0xb11   : > { %3389 = vmatpush1.bf16.msra.mxu1 %v7117_v29  ;;  %v7194_v29 = vld [vmem:[#allocation6 + $0x364] ss:$16 sps:$4 sm:$0xff]  }
 0xb12   : > { %3390 = vmatprep.subr.bf16.mxu1 %v7125_v31  ;;  %v7192_v31 = vld [vmem:[#allocation6 + $0x360] ss:$16 sps:$4 sm:$0xff]  }
 0xb15   : > { %3391 = vmatpush1.bf16.msra.mxu1 %v7123_v33  ;;  %v7200_v33 = vld [vmem:[#allocation6 + $0x384] ss:$16 sps:$4 sm:$0xff]  }
 0xb16   : > { %3881 = vmatprep.subr.bf16.mxu1 %v7131_v54  ;;  %v7198_v54 = vld [vmem:[#allocation6 + $0x380] ss:$16 sps:$4 sm:$0xff]  }
 0xbab   : > { %v2894_v39 = vpop.f32.mrb[20].mxu1 }
 0xbac   : > { %v6432_v41 = vpop.f32.mrb[21].mxu1  ;;  %v7534_v45 = vpack.c.bf16 %v2894_v39, %v2894_v39  ;;  %v7201_v39 = vld [vmem:[#allocation6 + $0x388] ss:$16 sps:$4 sm:$0xff]  }
 0xbad   : > { %v2897_v42 = vpop.f32.mrb[22].mxu1  ;;  %v7206_v41 = vld [vmem:[#allocation6 + $0x3a4] ss:$16 sps:$4 sm:$0xff]  }
 0xbae   : > { %v6433_v43 = vpop.f32.mrb[23].mxu1  ;;  %3352 = vmatmul.mubr.bf16.vlgmr.msra.gmra.mrb[24].mxu0 %v7534_v45  ;;  %3393 = vmatmul.mubr.bf16.vlgmr.msra.gmra.mrb[24].mxu1 %v7534_v45  ;;  %v7209_v42 = vld [vmem:[#allocation6 + $0x3ac] ss:$16 sps:$4 sm:$0xff]   ;;  %v7207_v45 = vld [vmem:[#allocation6 + $0x3a8] ss:$16 sps:$4 sm:$0xff]  }
 0xbaf   : > { %3841 = vmatpush1.bf16.msra.mxu0 %v7126_v46  ;;  %3882 = vmatpush1.bf16.msra.mxu1 %v7129_v47  ;;  %v7204_v43 = vld [vmem:[#allocation6 + $0x3a0] ss:$16 sps:$4 sm:$0xff]   ;;  %v7212_v46 = vld [vmem:[#allocation6 + $0x3c4] ss:$16 sps:$4 sm:$0xff]   ;;  %v7215_v47 = vld [vmem:[#allocation6 + $0x3cc] ss:$16 sps:$4 sm:$0xff]  }
 0xbb0   : > { %3842 = vmatprep.subr.bf16.mxu0 %v7134_v48  ;;  %3883 = vmatprep.subr.bf16.mxu1 %v7137_v49  ;;  %v7210_v48 = vld [vmem:[#allocation6 + $0x3c0] ss:$16 sps:$4 sm:$0xff]   ;;  %v7213_v49 = vld [vmem:[#allocation6 + $0x3c8] ss:$16 sps:$4 sm:$0xff]  }
 0xbb1   : > { %3872 = vmatprep.mubr.bf16.mxu0 %v8115_v57  ;;  %3913 = vmatprep.mubr.bf16.mxu1 %v8115_v57  ;;  %v7225_v57 = vld [vmem:[#allocation8 + $0x18] sm:$0xff]  }
 0xbb3   : > { %3843 = vmatpush1.bf16.msra.mxu0 %v7132_v50  ;;  %3884 = vmatpush1.bf16.msra.mxu1 %v7135_v51  ;;  %v7218_v50 = vld [vmem:[#allocation6 + $0x3e4] ss:$16 sps:$4 sm:$0xff]   ;;  %v7221_v51 = vld [vmem:[#allocation6 + $0x3ec] ss:$16 sps:$4 sm:$0xff]  }
 0xbb4   : > { %3844 = vmatprep.subr.bf16.mxu0 %v7140_v53  ;;  %3885 = vmatprep.subr.bf16.mxu1 %v7143_v13  ;;  %v7216_v53 = vld [vmem:[#allocation6 + $0x3e0] ss:$16 sps:$4 sm:$0xff]   ;;  %v7219_v13 = vld [vmem:[#allocation6 + $0x3e8] ss:$16 sps:$4 sm:$0xff]  }
 0xbb7   : > { %3845 = vmatpush1.bf16.msra.mxu0 %v7138_v58  ;;  %3886 = vmatpush1.bf16.msra.mxu1 %v7141_v59  ;;  %v2970_v58 = vld [vmem:[%s8329_s2] sm:$0xf] }
 0xbb8   : > { %3846 = vmatprep.subr.bf16.mxu0 %v7146_v8  ;;  %3887 = vmatprep.subr.bf16.mxu1 %v7149_v60  ;;  %v2975_v59 = vrot.slane %v2970_v58, %v7994_v15 }
 0xbbb   : > { %3847 = vmatpush1.bf16.msra.mxu0 %v7144_v61  ;;  %3888 = vmatpush1.bf16.msra.mxu1 %v7147_v62  ;;  %v2979_v61 = vrot.slane %v2970_v58, %v7999_v17 }
 0xbbc   : > { %3848 = vmatprep.subr.bf16.mxu0 %v7152_v63  ;;  %3889 = vmatprep.subr.bf16.mxu1 %v7155_v36 }
 0xbbf   : > { %3849 = vmatpush1.bf16.msra.mxu0 %v7150_v0  ;;  %3890 = vmatpush1.bf16.msra.mxu1 %v7153_v1 }
 0xbc0   : > { %3850 = vmatprep.subr.bf16.mxu0 %v7158_v2  ;;  %3891 = vmatprep.subr.bf16.mxu1 %v7161_v3 }
 0xbc3   : > { %3851 = vmatpush1.bf16.msra.mxu0 %v7156_v4  ;;  %3892 = vmatpush1.bf16.msra.mxu1 %v7159_v5 }
 0xbc4   : > { %3852 = vmatprep.subr.bf16.mxu0 %v7164_v6  ;;  %3893 = vmatprep.subr.bf16.mxu1 %v7167_v52 }
 0xbc7   : > { %3853 = vmatpush1.bf16.msra.mxu0 %v7162_v9  ;;  %3894 = vmatpush1.bf16.msra.mxu1 %v7165_v10 }
 0xbc8   : > { %3854 = vmatprep.subr.bf16.mxu0 %v7170_v37  ;;  %3895 = vmatprep.subr.bf16.mxu1 %v7173_v11  ;;  %v2987_v37 = vrot.slane %v2970_v58, %v8003_v34  ;;  %v2983_v11 = vrot.slane %v2970_v58, %v8005_v35 }
 0xbcb   : > { %3855 = vmatpush1.bf16.msra.mxu0 %v7168_v12  ;;  %3896 = vmatpush1.bf16.msra.mxu1 %v7171_v14 }
 0xbcc   : > { %3856 = vmatprep.subr.bf16.mxu0 %v7176_v16  ;;  %3897 = vmatprep.subr.bf16.mxu1 %v7179_v18 }
 0xbcf   : > { %3857 = vmatpush1.bf16.msra.mxu0 %v7174_v19  ;;  %3898 = vmatpush1.bf16.msra.mxu1 %v7177_v20 }
 0xbd0   : > { %3858 = vmatprep.subr.bf16.mxu0 %v7182_v21  ;;  %3899 = vmatprep.subr.bf16.mxu1 %v7185_v22 }
 0xbd3   : > { %3859 = vmatpush1.bf16.msra.mxu0 %v7180_v23  ;;  %3900 = vmatpush1.bf16.msra.mxu1 %v7183_v24 }
 0xbd4   : > { %3860 = vmatprep.subr.bf16.mxu0 %v7188_v25  ;;  %3901 = vmatprep.subr.bf16.mxu1 %v7191_v26 }
 0xbd7   : > { %3861 = vmatpush1.bf16.msra.mxu0 %v7186_v27  ;;  %3902 = vmatpush1.bf16.msra.mxu1 %v7189_v28  ;;  %v7223_v28 = vld [vmem:[#allocation8 + $0x8] sm:$0xff]  }
 0xbd8   : > { %3862 = vmatprep.subr.bf16.mxu0 %v7194_v29  ;;  %3903 = vmatprep.subr.bf16.mxu1 %v7197_v30  ;;  %v7224_v29 = vld [vmem:[#allocation8 + $0x10] sm:$0xff]   ;;  %v7226_v30 = vld [vmem:[#allocation8 + $0x20] sm:$0xff]  }
 0xbdb   : > { %3863 = vmatpush1.bf16.msra.mxu0 %v7192_v31  ;;  %3904 = vmatpush1.bf16.msra.mxu1 %v7195_v32  ;;  %v7227_v31 = vld [vmem:[#allocation8 + $0x28] sm:$0xff]   ;;  %v7228_v32 = vld [vmem:[#allocation8 + $0x30] sm:$0xff]  }
 0xbdc   : > { %3864 = vmatprep.subr.bf16.mxu0 %v7200_v33  ;;  %3905 = vmatprep.subr.bf16.mxu1 %v7203_v38  ;;  %v7229_v33 = vld [vmem:[#allocation8 + $0x38] sm:$0xff]  }
 0xbdd   : > { %v5991_v38 = vld [vmem:[%s8329_s2 + $0x4] sm:$0xf] }
 0xbdf   : > { %3865 = vmatpush1.bf16.msra.mxu0 %v7198_v54  ;;  %3906 = vmatpush1.bf16.msra.mxu1 %v7201_v39  ;;  %v3496_v54 = vrot.slane %v5991_v38, %v7994_v15 }
 0xbe0   : > { %3866 = vmatprep.subr.bf16.mxu0 %v7206_v41  ;;  %3907 = vmatprep.subr.bf16.mxu1 %v7209_v42  ;;  %v3500_v42 = vrot.slane %v5991_v38, %v7999_v17 }
 0xbe3   : > { %3867 = vmatpush1.bf16.msra.mxu0 %v7204_v43  ;;  %3908 = vmatpush1.bf16.msra.mxu1 %v7207_v45 }
 0xbe4   : > { %3868 = vmatprep.subr.bf16.mxu0 %v7212_v46  ;;  %3909 = vmatprep.subr.bf16.mxu1 %v7215_v47 }
 0xbe7   : > { %3869 = vmatpush1.bf16.msra.mxu0 %v7210_v48  ;;  %3910 = vmatpush1.bf16.msra.mxu1 %v7213_v49 }
 0xbe8   : > { %3870 = vmatprep.subr.bf16.mxu0 %v7218_v50  ;;  %3911 = vmatprep.subr.bf16.mxu1 %v7221_v51 }
 0xbeb   : > { %3871 = vmatpush1.bf16.msra.mxu0 %v7216_v53  ;;  %3912 = vmatpush1.bf16.msra.mxu1 %v7219_v13 }
 0xbec   : > { %6434 = vmatprep.subr.bf16.mxu0 %v7769_v56  ;;  %6454 = vmatprep.subr.bf16.mxu1 %v7769_v56 }
 0xc81   : > { %v3353_v8 = vpop.f32.mrb[24].mxu0  ;;  %v3394_v60 = vpop.f32.mrb[24].mxu1 }
 0xc82   : > { %v3354_v62 = vadd.f32 %v3353_v8, %v2975_v59  ;;  %v3355_v63 = vpop.f32.mrb[25].mxu0  ;;  %v3396_v36 = vpop.f32.mrb[25].mxu1  ;;  %v3395_v18 = vadd.f32 %v3394_v60, %v2983_v11  ;;  %v3508_v60 = vrot.slane %v5991_v38, %v8003_v34 }
 0xc83   : > { %v3357_v0 = vpop.f32.mrb[26].mxu0  ;;  %v3398_v1 = vpop.f32.mrb[26].mxu1  ;;  %v3356_v5 = vadd.f32 %v3355_v63, %v2979_v61  ;;  %v3397_v14 = vadd.f32 %v3396_v36, %v2987_v37  ;;  %v3504_v61 = vrot.slane %v5991_v38, %v8005_v35  ;;  %v6060_v37 = vld [vmem:[%s8331_s4] ss:$0 sm:$0xff]  ;;  %v7238_v38 = vld [vmem:[#allocation6] ss:$16 sps:$4 sm:$0xff]  }
 0xc84   : > { %v5989_v2 = vmul.f32 -1.442695, %v3354_v62  ;;  %v3358_v3 = vpop.f32.mrb[27].mxu0  ;;  %v3399_v4 = vpop.f32.mrb[27].mxu1 }
 0xc85   : > { %v5990_v6 = vmul.f32 -1.442695, %v3356_v5 }
 0xc86   : > { %7486 = vpow2.f32 %v5989_v2 }
 0xc87   : > { %7488 = vpow2.f32 %v5990_v6 }
 0xc90   : > { %v7487_v52 = vpop.eup %7486 }
 0xc91   : > { %v3404_v9 = vadd.f32 1.0, %v7487_v52  ;;  %v7489_v10 = vpop.eup %7488 }
 0xc92   : > { %v3410_v12 = vadd.f32 1.0, %v7489_v10 }
 0xc93   : > { %7490 = vrcp.f32 %v3404_v9 }
 0xc94   : > { %7492 = vrcp.f32 %v3410_v12 }
 0xc9d   : > { %v7491_v16 = vpop.eup %7490 }
 0xc9e   : > { %v3413_v19 = vmul.f32 %v7491_v16, %v3397_v14  ;;  %v7493_v21 = vpop.eup %7492 }
 0xc9f   : > { %v3416_v22 = vsub.f32 1.0, %v7493_v21  ;;  %v3418_v24 = vmul.f32 %v7493_v21, %v8082_v7  ;;  %v7222_v7 = vld [vmem:[#allocation8] sm:$0xff]  }
 0xca0   : > { %v3414_v20 = vadd.f32 %v3413_v19, %v3395_v18 }
 0xca2   : > { %7494 = vtanh.f32 %v3414_v20 }
 0xcac   : > { %v7495_v23 = vpop.eup %7494 }
 0xcad   : > { %v3417_v25 = vmul.f32 %v7495_v23, %v3416_v22  ;;  %v7230_v22 = vld [vmem:[#allocation3] sm:$0xff]   ;;  %v7231_v23 = vld [vmem:[#allocation3 + $0x8] sm:$0xff]  }
 0xcaf   : > { %v8148_v26 = vadd.f32 %v3418_v24, %v3417_v25  ;;  %v7232_v24 = vld [vmem:[#allocation3 + $0x10] sm:$0xff]   ;;  %v7233_v25 = vld [vmem:[#allocation3 + $0x18] sm:$0xff]  }
 0xcb1   : > { %v8152_v27 = vpack.c.bf16 %v8148_v26, %v8148_v26 }
 0xcb3   : > { %3873 = vmatmul.mubr.bf16.vlgmr.msra.gmra.mrb[28].mxu0 %v8152_v27  ;;  %3914 = vmatmul.mubr.bf16.vlgmr.msra.gmra.mrb[28].mxu1 %v8152_v27 }
 0xcb4   : > { %6450 = vmatprep.mubr.msk.bf16.mxu0 %vm7770_vm0, %v7769_v56  ;;  %6470 = vmatprep.mubr.msk.bf16.mxu1 %vm7770_vm0, %v7769_v56 }
 0xcb5   : > { %6435 = vmatpush3.bf16.msra.mxu0 %v7222_v7  ;;  %6455 = vmatpush3.bf16.msra.mxu1 %v7230_v22  ;;  %v7234_v7 = vld [vmem:[#allocation3 + $0x20] sm:$0xff]   ;;  %v7273_v22 = vld [vmem:[#allocation6 + $0xac] ss:$16 sps:$4 sm:$0xff]  }
 0xcb6   : > { %6436 = vmatprep.subr.bf16.mxu0 %v7769_v56  ;;  %6456 = vmatprep.subr.bf16.mxu1 %v7769_v56 }
 0xcb9   : > { %6437 = vmatpush3.bf16.msra.mxu0 %v7223_v28  ;;  %6457 = vmatpush3.bf16.msra.mxu1 %v7231_v23  ;;  %v7235_v28 = vld [vmem:[#allocation3 + $0x28] sm:$0xff]  }
 0xcba   : > { %6438 = vmatprep.subr.bf16.mxu0 %v7769_v56  ;;  %6458 = vmatprep.subr.bf16.mxu1 %v7769_v56  ;;  %v7271_v23 = vld [vmem:[#allocation6 + $0xa8] ss:$16 sps:$4 sm:$0xff]  }
 0xcbd   : > { %6439 = vmatpush3.bf16.msra.mxu0 %v7224_v29  ;;  %6459 = vmatpush3.bf16.msra.mxu1 %v7232_v24  ;;  %v7236_v29 = vld [vmem:[#allocation3 + $0x30] sm:$0xff]   ;;  %v7279_v24 = vld [vmem:[#allocation6 + $0xcc] ss:$16 sps:$4 sm:$0xff]  }
 0xcbe   : > { %6440 = vmatprep.subr.bf16.mxu0 %v7769_v56  ;;  %6460 = vmatprep.subr.bf16.mxu1 %v7769_v56 }
 0xcc1   : > { %6441 = vmatpush3.bf16.msra.mxu0 %v7225_v57  ;;  %6461 = vmatpush3.bf16.msra.mxu1 %v7233_v25  ;;  %v7277_v25 = vld [vmem:[#allocation6 + $0xc8] ss:$16 sps:$4 sm:$0xff]  }
 0xcc2   : > { %6442 = vmatprep.subr.bf16.mxu0 %v7769_v56  ;;  %6462 = vmatprep.subr.bf16.mxu1 %v7769_v56 }
 0xcc5   : > { %6443 = vmatpush3.bf16.msra.mxu0 %v7226_v30  ;;  %6463 = vmatpush3.bf16.msra.mxu1 %v7234_v7  ;;  %v7285_v7 = vld [vmem:[#allocation6 + $0xec] ss:$16 sps:$4 sm:$0xff]  }
 0xcc6   : > { %6444 = vmatprep.subr.bf16.mxu0 %v7769_v56  ;;  %6464 = vmatprep.subr.bf16.mxu1 %v7769_v56 }
 0xcc9   : > { %6445 = vmatpush3.bf16.msra.mxu0 %v7227_v31  ;;  %6465 = vmatpush3.bf16.msra.mxu1 %v7235_v28  ;;  %v7283_v28 = vld [vmem:[#allocation6 + $0xe8] ss:$16 sps:$4 sm:$0xff]  }
 0xcca   : > { %6446 = vmatprep.subr.bf16.mxu0 %v7769_v56  ;;  %6466 = vmatprep.subr.bf16.mxu1 %v7769_v56 }
 0xccd   : > { %6447 = vmatpush3.bf16.msra.mxu0 %v7228_v32  ;;  %6467 = vmatpush3.bf16.msra.mxu1 %v7236_v29  ;;  %v7291_v29 = vld [vmem:[#allocation6 + $0x10c] ss:$16 sps:$4 sm:$0xff]  }
 0xcce   : > { %6448 = vmatprep.subr.bf16.mxu0 %v7769_v56  ;;  %6468 = vmatprep.subr.bf16.mxu1 %v7769_v56 }
 0xcd1   : > { %6449 = vmatpush3.bf16.msra.mxu0 %v7229_v33  ;;  %v7237_v33 = vld [vmem:[#allocation3 + $0x38] sm:$0xff]  }
 0xcd2   : > { %6469 = vmatpush3.bf16.msra.mxu1 %v7237_v33  ;;  %v7301_v33 = vld [vmem:[#allocation6 + $0x148] ss:$16 sps:$4 sm:$0xff]  }
 0xd86   : > { %v3874_v39 = vpop.f32.mrb[28].mxu0  ;;  %v3915_v41 = vpop.f32.mrb[28].mxu1 }
 0xd87   : > { %v3875_v43 = vadd.f32 %v3874_v39, %v3496_v54  ;;  %v3876_v45 = vpop.f32.mrb[29].mxu0  ;;  %v3917_v46 = vpop.f32.mrb[29].mxu1  ;;  %v3916_v0 = vadd.f32 %v3915_v41, %v3504_v61  ;;  %v7240_v54 = vld [vmem:[#allocation6 + $0x4] ss:$16 sps:$4 sm:$0xff]   ;;  %v7243_v39 = vld [vmem:[#allocation6 + $0xc] ss:$16 sps:$4 sm:$0xff]  }
 0xd88   : > { %v3878_v47 = vpop.f32.mrb[30].mxu0  ;;  %v3919_v48 = vpop.f32.mrb[30].mxu1  ;;  %v3877_v53 = vadd.f32 %v3876_v45, %v3500_v42  ;;  %v3918_v63 = vadd.f32 %v3917_v46, %v3508_v60  ;;  %v7246_v41 = vld [vmem:[#allocation6 + $0x24] ss:$16 sps:$4 sm:$0xff]   ;;  %4601 = vmatprep.subr.bf16.mxu0 %v7240_v54  ;;  %4642 = vmatprep.subr.bf16.mxu1 %v7243_v39  ;;  %v7244_v42 = vld [vmem:[#allocation6 + $0x20] ss:$16 sps:$4 sm:$0xff]  }
 0xd89   : > { %v6058_v49 = vmul.f32 -1.442695, %v3875_v43  ;;  %v3879_v50 = vpop.f32.mrb[31].mxu0  ;;  %v3920_v51 = vpop.f32.mrb[31].mxu1  ;;  %v7252_v43 = vld [vmem:[#allocation6 + $0x44] ss:$16 sps:$4 sm:$0xff]  }
 0xd8a   : > { %v6059_v13 = vmul.f32 -1.442695, %v3877_v53  ;;  %v7250_v45 = vld [vmem:[#allocation6 + $0x40] ss:$16 sps:$4 sm:$0xff]   ;;  %v7258_v46 = vld [vmem:[#allocation6 + $0x64] ss:$16 sps:$4 sm:$0xff]  }
 0xd8b   : > { %7496 = vpow2.f32 %v6058_v49  ;;  %v7256_v47 = vld [vmem:[#allocation6 + $0x60] ss:$16 sps:$4 sm:$0xff]   ;;  %v7264_v48 = vld [vmem:[#allocation6 + $0x84] ss:$16 sps:$4 sm:$0xff]   ;;  %v7307_v54 = vld [vmem:[#allocation6 + $0x168] ss:$16 sps:$4 sm:$0xff]  }
 0xd8c   : > { %7498 = vpow2.f32 %v6059_v13  ;;  %v7262_v49 = vld [vmem:[#allocation6 + $0x80] ss:$16 sps:$4 sm:$0xff]   ;;  %v7270_v50 = vld [vmem:[#allocation6 + $0xa4] ss:$16 sps:$4 sm:$0xff]   ;;  %v7315_v39 = vld [vmem:[#allocation6 + $0x18c] ss:$16 sps:$4 sm:$0xff]  }
 0xd8d   : > { %v7268_v51 = vld [vmem:[#allocation6 + $0xa0] ss:$16 sps:$4 sm:$0xff]   ;;  %v7276_v53 = vld [vmem:[#allocation6 + $0xc4] ss:$16 sps:$4 sm:$0xff]  }
 0xd8e   : > { %v7274_v13 = vld [vmem:[#allocation6 + $0xc0] ss:$16 sps:$4 sm:$0xff]   ;;  %v7294_v61 = vld [vmem:[#allocation6 + $0x124] ss:$16 sps:$4 sm:$0xff]  }
 0xd8f   : > { %v7286_v60 = vld [vmem:[#allocation6 + $0x100] ss:$16 sps:$4 sm:$0xff]  }
 0xd95   : > { %v7497_v58 = vpop.eup %7496 }
 0xd96   : > { %v3925_v59 = vadd.f32 1.0, %v7497_v58  ;;  %v7499_v8 = vpop.eup %7498  ;;  %v7282_v58 = vld [vmem:[#allocation6 + $0xe4] ss:$16 sps:$4 sm:$0xff]  }
 0xd97   : > { %v3931_v62 = vadd.f32 1.0, %v7499_v8  ;;  %v7288_v8 = vld [vmem:[#allocation6 + $0x104] ss:$16 sps:$4 sm:$0xff]  }
 0xd98   : > { %7500 = vrcp.f32 %v3925_v59  ;;  %v7280_v59 = vld [vmem:[#allocation6 + $0xe0] ss:$16 sps:$4 sm:$0xff]  }
 0xd99   : > { %7502 = vrcp.f32 %v3931_v62  ;;  %v7292_v62 = vld [vmem:[#allocation6 + $0x120] ss:$16 sps:$4 sm:$0xff]  }
 0xda2   : > { %v7501_v36 = vpop.eup %7500 }
 0xda3   : > { %v3934_v1 = vmul.f32 %v7501_v36, %v3918_v63  ;;  %v7503_v3 = vpop.eup %7502  ;;  %v7300_v63 = vld [vmem:[#allocation6 + $0x144] ss:$16 sps:$4 sm:$0xff]   ;;  %v7298_v36 = vld [vmem:[#allocation6 + $0x140] ss:$16 sps:$4 sm:$0xff]  }
 0xda4   : > { %v3937_v4 = vsub.f32 1.0, %v7503_v3  ;;  %v3939_v52 = vmul.f32 %v7503_v3, %v8111_v55  ;;  %v7310_v3 = vld [vmem:[#allocation6 + $0x180] ss:$16 sps:$4 sm:$0xff]  }
 0xda5   : > { %v3935_v2 = vadd.f32 %v3934_v1, %v3916_v0  ;;  %v7306_v0 = vld [vmem:[#allocation6 + $0x164] ss:$16 sps:$4 sm:$0xff]   ;;  %v7304_v1 = vld [vmem:[#allocation6 + $0x160] ss:$16 sps:$4 sm:$0xff]  }
 0xda7   : > { %7504 = vtanh.f32 %v3935_v2  ;;  %v7312_v2 = vld [vmem:[#allocation6 + $0x184] ss:$16 sps:$4 sm:$0xff]  }
 0xdb1   : > { %v7505_v5 = vpop.eup %7504 }
 0xdb2   : > { %v3938_v6 = vmul.f32 %v7505_v5, %v3937_v4 }
 0xdb4   : > { %v8177_v9 = vadd.f32 %v3939_v52, %v3938_v6 }
 0xdb6   : > { %v8181_v10 = vpack.c.bf16 %v8177_v9, %v8177_v9 }
 0xdb8   : > { %6451 = vmatmul.mubr.bf16.vlgmr.msra.gmra.mrb[32].mxu0 %v8181_v10 }
 0xdb9   : > { %4602 = vmatpush1.bf16.msra.mxu0 %v7238_v38  ;;  %v7309_v38 = vld [vmem:[#allocation6 + $0x16c] ss:$16 sps:$4 sm:$0xff]   ;;  %4633 = vmatprep.mubr.bf16.mxu0 %v8152_v27 }
 0xdba   : > { %4603 = vmatprep.subr.bf16.mxu0 %v7246_v41  ;;  %v7313_v41 = vld [vmem:[#allocation6 + $0x188] ss:$16 sps:$4 sm:$0xff]  }
 0xdbd   : > { %4604 = vmatpush1.bf16.msra.mxu0 %v7244_v42  ;;  %v7318_v42 = vld [vmem:[#allocation6 + $0x1a4] ss:$16 sps:$4 sm:$0xff]  }
 0xdbe   : > { %4605 = vmatprep.subr.bf16.mxu0 %v7252_v43  ;;  %v7321_v43 = vld [vmem:[#allocation6 + $0x1ac] ss:$16 sps:$4 sm:$0xff]  }
 0xdc1   : > { %4606 = vmatpush1.bf16.msra.mxu0 %v7250_v45  ;;  %v7316_v45 = vld [vmem:[#allocation6 + $0x1a0] ss:$16 sps:$4 sm:$0xff]  }
 0xdc2   : > { %4607 = vmatprep.subr.bf16.mxu0 %v7258_v46  ;;  %v7319_v46 = vld [vmem:[#allocation6 + $0x1a8] ss:$16 sps:$4 sm:$0xff]  }
 0xdc5   : > { %4608 = vmatpush1.bf16.msra.mxu0 %v7256_v47  ;;  %v7324_v47 = vld [vmem:[#allocation6 + $0x1c4] ss:$16 sps:$4 sm:$0xff]  }
 0xdc6   : > { %4609 = vmatprep.subr.bf16.mxu0 %v7264_v48  ;;  %v7327_v48 = vld [vmem:[#allocation6 + $0x1cc] ss:$16 sps:$4 sm:$0xff]  }
 0xdc9   : > { %4610 = vmatpush1.bf16.msra.mxu0 %v7262_v49  ;;  %v7322_v49 = vld [vmem:[#allocation6 + $0x1c0] ss:$16 sps:$4 sm:$0xff]  }
 0xdca   : > { %4611 = vmatprep.subr.bf16.mxu0 %v7270_v50  ;;  %v7325_v50 = vld [vmem:[#allocation6 + $0x1c8] ss:$16 sps:$4 sm:$0xff]  }
 0xdcd   : > { %4612 = vmatpush1.bf16.msra.mxu0 %v7268_v51  ;;  %v7330_v51 = vld [vmem:[#allocation6 + $0x1e4] ss:$16 sps:$4 sm:$0xff]  }
 0xdce   : > { %4613 = vmatprep.subr.bf16.mxu0 %v7276_v53  ;;  %v7333_v53 = vld [vmem:[#allocation6 + $0x1ec] ss:$16 sps:$4 sm:$0xff]  }
 0xdd1   : > { %4614 = vmatpush1.bf16.msra.mxu0 %v7274_v13  ;;  %v7328_v13 = vld [vmem:[#allocation6 + $0x1e0] ss:$16 sps:$4 sm:$0xff]  }
 0xdd2   : > { %4615 = vmatprep.subr.bf16.mxu0 %v7282_v58  ;;  %v7331_v58 = vld [vmem:[#allocation6 + $0x1e8] ss:$16 sps:$4 sm:$0xff]  }
 0xdd5   : > { %4616 = vmatpush1.bf16.msra.mxu0 %v7280_v59  ;;  %v7336_v59 = vld [vmem:[#allocation6 + $0x204] ss:$16 sps:$4 sm:$0xff]  }
 0xdd6   : > { %4617 = vmatprep.subr.bf16.mxu0 %v7288_v8  ;;  %v7339_v8 = vld [vmem:[#allocation6 + $0x20c] ss:$16 sps:$4 sm:$0xff]  }
 0xdd9   : > { %4618 = vmatpush1.bf16.msra.mxu0 %v7286_v60 }
 0xdda   : > { %4619 = vmatprep.subr.bf16.mxu0 %v7294_v61 }
 0xddd   : > { %4620 = vmatpush1.bf16.msra.mxu0 %v7292_v62 }
 0xdde   : > { %4621 = vmatprep.subr.bf16.mxu0 %v7300_v63 }
 0xde1   : > { %4622 = vmatpush1.bf16.msra.mxu0 %v7298_v36 }
 0xde2   : > { %4623 = vmatprep.subr.bf16.mxu0 %v7306_v0  ;;  %v7334_v0 = vld [vmem:[#allocation6 + $0x200] ss:$16 sps:$4 sm:$0xff]  }
 0xde5   : > { %4624 = vmatpush1.bf16.msra.mxu0 %v7304_v1  ;;  %v7337_v1 = vld [vmem:[#allocation6 + $0x208] ss:$16 sps:$4 sm:$0xff]  }
 0xde6   : > { %4625 = vmatprep.subr.bf16.mxu0 %v7312_v2  ;;  %v7342_v2 = vld [vmem:[#allocation6 + $0x224] ss:$16 sps:$4 sm:$0xff]  }
 0xde9   : > { %4626 = vmatpush1.bf16.msra.mxu0 %v7310_v3  ;;  %v7345_v3 = vld [vmem:[#allocation6 + $0x22c] ss:$16 sps:$4 sm:$0xff]  }
 0xdea   : > { %4627 = vmatprep.subr.bf16.mxu0 %v7318_v42  ;;  %v7393_v42 = vld [vmem:[#allocation6 + $0x32c] ss:$16 sps:$4 sm:$0xff]  }
 0xded   : > { %4628 = vmatpush1.bf16.msra.mxu0 %v7316_v45  ;;  %v7391_v45 = vld [vmem:[#allocation6 + $0x328] ss:$16 sps:$4 sm:$0xff]  }
 0xdee   : > { %4629 = vmatprep.subr.bf16.mxu0 %v7324_v47  ;;  %v7399_v47 = vld [vmem:[#allocation6 + $0x34c] ss:$16 sps:$4 sm:$0xff]  }
 0xdf1   : > { %4630 = vmatpush1.bf16.msra.mxu0 %v7322_v49  ;;  %v7397_v49 = vld [vmem:[#allocation6 + $0x348] ss:$16 sps:$4 sm:$0xff]  }
 0xdf2   : > { %4631 = vmatprep.subr.bf16.mxu0 %v7330_v51  ;;  %v7405_v51 = vld [vmem:[#allocation6 + $0x36c] ss:$16 sps:$4 sm:$0xff]  }
 0xdf5   : > { %4632 = vmatpush1.bf16.msra.mxu0 %v7328_v13  ;;  %v7403_v13 = vld [vmem:[#allocation6 + $0x368] ss:$16 sps:$4 sm:$0xff]  }
 0xdf6   : > { %5122 = vmatprep.subr.bf16.mxu0 %v7336_v59  ;;  %v7411_v59 = vld [vmem:[#allocation6 + $0x38c] ss:$16 sps:$4 sm:$0xff]  }
 0xe8b   : > { %v4048_v11 = vpop.f32.mrb[32].mxu0 }
 0xe8c   : > { %v4049_v12 = vadd.f32 %v6060_v37, %v4048_v11  ;;  %v6452_v14 = vpop.f32.mrb[33].mxu0  ;;  %v7241_v11 = vld [vmem:[#allocation6 + $0x8] ss:$16 sps:$4 sm:$0xff]  }
 0xe8d   : > { %v4051_v16 = vpop.f32.mrb[34].mxu0  ;;  %v7247_v14 = vld [vmem:[#allocation6 + $0x28] ss:$16 sps:$4 sm:$0xff]  }
 0xe8e   : > { %6069 = vst [vmem:[%s7989_s29 + $0x10] sm:$0xff] %v4049_v12  ;;  %4056 = vmax.xlane.f32.xlu0 %v4049_v12  ;;  %v6453_v18 = vpop.f32.mrb[35].mxu0  ;;  %v7255_v16 = vld [vmem:[#allocation6 + $0x4c] ss:$16 sps:$4 sm:$0xff]  }
 0xe8f   : > { %v7253_v18 = vld [vmem:[#allocation6 + $0x48] ss:$16 sps:$4 sm:$0xff]  }
 0xf1b   : > { %v4057_v55 = vpop.xlane.xlu0 %4056 }
 0xf1c   : > { %vm4058_vm9 = vcmp.ge.f32.partialorder %v4049_v12, %v4057_v55  ;;  %v7249_v12 = vld [vmem:[#allocation6 + $0x2c] ss:$16 sps:$4 sm:$0xff]  }
 0xf1d   : > { %v4059_v19 = vsel %vm4058_vm9, %v8054_v44, 128  ;;  %v7261_v55 = vld [vmem:[#allocation6 + $0x6c] ss:$16 sps:$4 sm:$0xff]  }
 0xf1e   : > { %v4061_v20 = vshra.s32 %v4059_v19, 16  ;;  %v4060_v57 = vand.u32 65535, %v4059_v19  ;;  %v7259_v19 = vld [vmem:[#allocation6 + $0x68] ss:$16 sps:$4 sm:$0xff]  }
 0xf20   : > { %v4063_v21 = vcvt.s32.f32 %v4061_v20  ;;  %v4062_v31 = vcvt.s32.f32 %v4060_v57  ;;  %v7267_v20 = vld [vmem:[#allocation6 + $0x8c] ss:$16 sps:$4 sm:$0xff]   ;;  %v7289_v57 = vld [vmem:[#allocation6 + $0x108] ss:$16 sps:$4 sm:$0xff]  }
 0xf22   : > { %4064 = vmin.xlane.f32.xlu1 %v4063_v21 }
 0xfaf   : > { %v8196_v30 = vpop.xlane.xlu1 %4064 }
 0xfb0   : > { %vm4066_vm10 = vcmp.eq.f32.partialorder %v4063_v21, %v8196_v30  ;;  %v4071_v4 = vcvt.f32.s32 %v8196_v30  ;;  %v7265_v21 = vld [vmem:[#allocation6 + $0x88] ss:$16 sps:$4 sm:$0xff]   ;;  %v7297_v30 = vld [vmem:[#allocation6 + $0x12c] ss:$16 sps:$4 sm:$0xff]  }
 0xfb1   : > { %v4067_v32 = vsel %vm4066_vm10, %v4062_v31, inf  ;;  %v7295_v31 = vld [vmem:[#allocation6 + $0x128] ss:$16 sps:$4 sm:$0xff]  }
 0xfb2   : > { %4068 = vmin.xlane.f32.xlu0 %v4067_v32  ;;  %v4072_v6 = vshll.u32 %v4071_v4, 16  ;;  %v7303_v32 = vld [vmem:[#allocation6 + $0x14c] ss:$16 sps:$4 sm:$0xff]   ;;  %v7340_v4 = vld [vmem:[#allocation6 + $0x220] ss:$16 sps:$4 sm:$0xff]  }
0x103f   : > { %v4069_v5 = vpop.xlane.xlu0 %4068 }
0x1040   : > { %v4070_v52 = vcvt.f32.s32 %v4069_v5  ;;  %v7343_v5 = vld [vmem:[#allocation6 + $0x228] ss:$16 sps:$4 sm:$0xff]  }
0x1042   : > { %v4073_v37 = vadd.s32 %v4072_v6, %v4070_v52  ;;  %v7348_v6 = vld [vmem:[#allocation6 + $0x244] ss:$16 sps:$4 sm:$0xff]   ;;  %v7351_v52 = vld [vmem:[#allocation6 + $0x24c] ss:$16 sps:$4 sm:$0xff]  }
0x1044   : > { %vm4074_vm11 = vcmp.eq.s32.totalorder %v8054_v44, %v4073_v37  ;;  %v7346_v37 = vld [vmem:[#allocation6 + $0x240] ss:$16 sps:$4 sm:$0xff]  }
0x1045   : > { %vm6079_vm12 = vmpackc.low %vm4074_vm11, %vm4074_vm11 }
0x1046   : > { %6471 = vmatmul.mubr.msk.bf16.vlgmr.msra.gmra.mrb[32].mxu1 %vm6079_vm12, %v7771_v40 }
0x1047   : > { %4643 = vmatpush1.bf16.msra.mxu1 %v7241_v11  ;;  %4674 = vmatprep.mubr.bf16.mxu1 %v8152_v27  ;;  %v7349_v11 = vld [vmem:[#allocation6 + $0x248] ss:$16 sps:$4 sm:$0xff]   ;;  %v7354_v27 = vld [vmem:[#allocation6 + $0x264] ss:$16 sps:$4 sm:$0xff]  }
0x1048   : > { %4644 = vmatprep.subr.bf16.mxu1 %v7249_v12  ;;  %v7357_v12 = vld [vmem:[#allocation6 + $0x26c] ss:$16 sps:$4 sm:$0xff]  }
0x104b   : > { %4645 = vmatpush1.bf16.msra.mxu1 %v7247_v14  ;;  %v7352_v14 = vld [vmem:[#allocation6 + $0x260] ss:$16 sps:$4 sm:$0xff]  }
0x104c   : > { %4646 = vmatprep.subr.bf16.mxu1 %v7255_v16  ;;  %v7355_v16 = vld [vmem:[#allocation6 + $0x268] ss:$16 sps:$4 sm:$0xff]  }
0x104f   : > { %4647 = vmatpush1.bf16.msra.mxu1 %v7253_v18  ;;  %v7360_v18 = vld [vmem:[#allocation6 + $0x284] ss:$16 sps:$4 sm:$0xff]  }
0x1050   : > { %4648 = vmatprep.subr.bf16.mxu1 %v7261_v55  ;;  %v7363_v55 = vld [vmem:[#allocation6 + $0x28c] ss:$16 sps:$4 sm:$0xff]  }
0x1053   : > { %4649 = vmatpush1.bf16.msra.mxu1 %v7259_v19  ;;  %v7358_v19 = vld [vmem:[#allocation6 + $0x280] ss:$16 sps:$4 sm:$0xff]  }
0x1054   : > { %4650 = vmatprep.subr.bf16.mxu1 %v7267_v20  ;;  %v7361_v20 = vld [vmem:[#allocation6 + $0x288] ss:$16 sps:$4 sm:$0xff]  }
0x1057   : > { %4651 = vmatpush1.bf16.msra.mxu1 %v7265_v21  ;;  %v7366_v21 = vld [vmem:[#allocation6 + $0x2a4] ss:$16 sps:$4 sm:$0xff]  }
0x1058   : > { %4652 = vmatprep.subr.bf16.mxu1 %v7273_v22  ;;  %v7369_v22 = vld [vmem:[#allocation6 + $0x2ac] ss:$16 sps:$4 sm:$0xff]  }
0x105b   : > { %4653 = vmatpush1.bf16.msra.mxu1 %v7271_v23  ;;  %v7364_v23 = vld [vmem:[#allocation6 + $0x2a0] ss:$16 sps:$4 sm:$0xff]  }
0x105c   : > { %4654 = vmatprep.subr.bf16.mxu1 %v7279_v24  ;;  %v7367_v24 = vld [vmem:[#allocation6 + $0x2a8] ss:$16 sps:$4 sm:$0xff]  }
0x105f   : > { %4655 = vmatpush1.bf16.msra.mxu1 %v7277_v25  ;;  %v7372_v25 = vld [vmem:[#allocation6 + $0x2c4] ss:$16 sps:$4 sm:$0xff]  }
0x1060   : > { %4656 = vmatprep.subr.bf16.mxu1 %v7285_v7  ;;  %v7375_v7 = vld [vmem:[#allocation6 + $0x2cc] ss:$16 sps:$4 sm:$0xff]  }
0x1063   : > { %4657 = vmatpush1.bf16.msra.mxu1 %v7283_v28  ;;  %v7370_v28 = vld [vmem:[#allocation6 + $0x2c0] ss:$16 sps:$4 sm:$0xff]  }
0x1064   : > { %4658 = vmatprep.subr.bf16.mxu1 %v7291_v29  ;;  %v7373_v29 = vld [vmem:[#allocation6 + $0x2c8] ss:$16 sps:$4 sm:$0xff]  }
0x1067   : > { %4659 = vmatpush1.bf16.msra.mxu1 %v7289_v57  ;;  %v7378_v57 = vld [vmem:[#allocation6 + $0x2e4] ss:$16 sps:$4 sm:$0xff]  }
0x1068   : > { %4660 = vmatprep.subr.bf16.mxu1 %v7297_v30  ;;  %v7381_v30 = vld [vmem:[#allocation6 + $0x2ec] ss:$16 sps:$4 sm:$0xff]  }
0x106b   : > { %4661 = vmatpush1.bf16.msra.mxu1 %v7295_v31  ;;  %v7376_v31 = vld [vmem:[#allocation6 + $0x2e0] ss:$16 sps:$4 sm:$0xff]  }
0x106c   : > { %4662 = vmatprep.subr.bf16.mxu1 %v7303_v32  ;;  %v7379_v32 = vld [vmem:[#allocation6 + $0x2e8] ss:$16 sps:$4 sm:$0xff]  }
0x106f   : > { %4663 = vmatpush1.bf16.msra.mxu1 %v7301_v33  ;;  %v7384_v33 = vld [vmem:[#allocation6 + $0x304] ss:$16 sps:$4 sm:$0xff]  }
0x1070   : > { %4664 = vmatprep.subr.bf16.mxu1 %v7309_v38  ;;  %v7387_v38 = vld [vmem:[#allocation6 + $0x30c] ss:$16 sps:$4 sm:$0xff]  }
0x1073   : > { %4665 = vmatpush1.bf16.msra.mxu1 %v7307_v54  ;;  %v7382_v54 = vld [vmem:[#allocation6 + $0x300] ss:$16 sps:$4 sm:$0xff]  }
0x1074   : > { %4666 = vmatprep.subr.bf16.mxu1 %v7315_v39  ;;  %v7385_v39 = vld [vmem:[#allocation6 + $0x308] ss:$16 sps:$4 sm:$0xff]  }
0x1077   : > { %4667 = vmatpush1.bf16.msra.mxu1 %v7313_v41  ;;  %v7390_v41 = vld [vmem:[#allocation6 + $0x324] ss:$16 sps:$4 sm:$0xff]  }
0x1078   : > { %4668 = vmatprep.subr.bf16.mxu1 %v7321_v43  ;;  %v7388_v43 = vld [vmem:[#allocation6 + $0x320] ss:$16 sps:$4 sm:$0xff]  }
0x107b   : > { %4669 = vmatpush1.bf16.msra.mxu1 %v7319_v46  ;;  %v7396_v46 = vld [vmem:[#allocation6 + $0x344] ss:$16 sps:$4 sm:$0xff]  }
0x107c   : > { %4670 = vmatprep.subr.bf16.mxu1 %v7327_v48  ;;  %v7394_v48 = vld [vmem:[#allocation6 + $0x340] ss:$16 sps:$4 sm:$0xff]  }
0x107f   : > { %4671 = vmatpush1.bf16.msra.mxu1 %v7325_v50  ;;  %v7402_v50 = vld [vmem:[#allocation6 + $0x364] ss:$16 sps:$4 sm:$0xff]  }
0x1080   : > { %4672 = vmatprep.subr.bf16.mxu1 %v7333_v53  ;;  %v7400_v53 = vld [vmem:[#allocation6 + $0x360] ss:$16 sps:$4 sm:$0xff]  }
0x1083   : > { %4673 = vmatpush1.bf16.msra.mxu1 %v7331_v58  ;;  %v7408_v58 = vld [vmem:[#allocation6 + $0x384] ss:$16 sps:$4 sm:$0xff]  }
0x1084   : > { %5163 = vmatprep.subr.bf16.mxu1 %v7339_v8  ;;  %v7406_v8 = vld [vmem:[#allocation6 + $0x380] ss:$16 sps:$4 sm:$0xff]  }
0x1119   : > { %v4176_v60 = vpop.f32.mrb[32].mxu1 }
0x111a   : > { %v6472_v61 = vpop.f32.mrb[33].mxu1  ;;  %v7538_v36 = vpack.c.bf16 %v4176_v60, %v4176_v60  ;;  %v7409_v60 = vld [vmem:[#allocation6 + $0x388] ss:$16 sps:$4 sm:$0xff]  }
0x111b   : > { %v4179_v62 = vpop.f32.mrb[34].mxu1  ;;  %v7414_v61 = vld [vmem:[#allocation6 + $0x3a4] ss:$16 sps:$4 sm:$0xff]  }
0x111c   : > { %v6473_v63 = vpop.f32.mrb[35].mxu1  ;;  %4634 = vmatmul.mubr.bf16.vlgmr.msra.gmra.mrb[36].mxu0 %v7538_v36  ;;  %4675 = vmatmul.mubr.bf16.vlgmr.msra.gmra.mrb[36].mxu1 %v7538_v36  ;;  %v7417_v62 = vld [vmem:[#allocation6 + $0x3ac] ss:$16 sps:$4 sm:$0xff]   ;;  %v7415_v36 = vld [vmem:[#allocation6 + $0x3a8] ss:$16 sps:$4 sm:$0xff]  }
0x111d   : > { %5123 = vmatpush1.bf16.msra.mxu0 %v7334_v0  ;;  %5164 = vmatpush1.bf16.msra.mxu1 %v7337_v1  ;;  %v7412_v63 = vld [vmem:[#allocation6 + $0x3a0] ss:$16 sps:$4 sm:$0xff]   ;;  %v7420_v0 = vld [vmem:[#allocation6 + $0x3c4] ss:$16 sps:$4 sm:$0xff]   ;;  %v7423_v1 = vld [vmem:[#allocation6 + $0x3cc] ss:$16 sps:$4 sm:$0xff]  }
0x111e   : > { %5124 = vmatprep.subr.bf16.mxu0 %v7342_v2  ;;  %5165 = vmatprep.subr.bf16.mxu1 %v7345_v3  ;;  %v7418_v2 = vld [vmem:[#allocation6 + $0x3c0] ss:$16 sps:$4 sm:$0xff]   ;;  %v7421_v3 = vld [vmem:[#allocation6 + $0x3c8] ss:$16 sps:$4 sm:$0xff]  }
0x111f   : > { %5154 = vmatprep.mubr.bf16.mxu0 %v8181_v10  ;;  %5195 = vmatprep.mubr.bf16.mxu1 %v8181_v10  ;;  %v7433_v10 = vld [vmem:[#allocation8 + $0x18] sm:$0xff]  }
0x1121   : > { %5125 = vmatpush1.bf16.msra.mxu0 %v7340_v4  ;;  %5166 = vmatpush1.bf16.msra.mxu1 %v7343_v5  ;;  %v7426_v4 = vld [vmem:[#allocation6 + $0x3e4] ss:$16 sps:$4 sm:$0xff]   ;;  %v7429_v5 = vld [vmem:[#allocation6 + $0x3ec] ss:$16 sps:$4 sm:$0xff]  }
0x1122   : > { %5126 = vmatprep.subr.bf16.mxu0 %v7348_v6  ;;  %5167 = vmatprep.subr.bf16.mxu1 %v7351_v52  ;;  %v7424_v6 = vld [vmem:[#allocation6 + $0x3e0] ss:$16 sps:$4 sm:$0xff]   ;;  %v7427_v52 = vld [vmem:[#allocation6 + $0x3e8] ss:$16 sps:$4 sm:$0xff]  }
0x1125   : > { %5127 = vmatpush1.bf16.msra.mxu0 %v7346_v37  ;;  %5168 = vmatpush1.bf16.msra.mxu1 %v7349_v11  ;;  %v4252_v37 = vld [vmem:[%s8329_s2] sm:$0xf] }
0x1126   : > { %5128 = vmatprep.subr.bf16.mxu0 %v7354_v27  ;;  %5169 = vmatprep.subr.bf16.mxu1 %v7357_v12  ;;  %v4257_v11 = vrot.slane %v4252_v37, %v7994_v15 }
0x1129   : > { %5129 = vmatpush1.bf16.msra.mxu0 %v7352_v14  ;;  %5170 = vmatpush1.bf16.msra.mxu1 %v7355_v16  ;;  %v4261_v14 = vrot.slane %v4252_v37, %v7999_v17 }
0x112a   : > { %5130 = vmatprep.subr.bf16.mxu0 %v7360_v18  ;;  %5171 = vmatprep.subr.bf16.mxu1 %v7363_v55 }
0x112d   : > { %5131 = vmatpush1.bf16.msra.mxu0 %v7358_v19  ;;  %5172 = vmatpush1.bf16.msra.mxu1 %v7361_v20 }
0x112e   : > { %5132 = vmatprep.subr.bf16.mxu0 %v7366_v21  ;;  %5173 = vmatprep.subr.bf16.mxu1 %v7369_v22 }
0x1131   : > { %5133 = vmatpush1.bf16.msra.mxu0 %v7364_v23  ;;  %5174 = vmatpush1.bf16.msra.mxu1 %v7367_v24 }
0x1132   : > { %5134 = vmatprep.subr.bf16.mxu0 %v7372_v25  ;;  %5175 = vmatprep.subr.bf16.mxu1 %v7375_v7 }
0x1135   : > { %5135 = vmatpush1.bf16.msra.mxu0 %v7370_v28  ;;  %5176 = vmatpush1.bf16.msra.mxu1 %v7373_v29 }
0x1136   : > { %5136 = vmatprep.subr.bf16.mxu0 %v7378_v57  ;;  %5177 = vmatprep.subr.bf16.mxu1 %v7381_v30  ;;  %v4269_v57 = vrot.slane %v4252_v37, %v8003_v34  ;;  %v4265_v30 = vrot.slane %v4252_v37, %v8005_v35 }
0x1139   : > { %5137 = vmatpush1.bf16.msra.mxu0 %v7376_v31  ;;  %5178 = vmatpush1.bf16.msra.mxu1 %v7379_v32 }
0x113a   : > { %5138 = vmatprep.subr.bf16.mxu0 %v7384_v33  ;;  %5179 = vmatprep.subr.bf16.mxu1 %v7387_v38 }
0x113d   : > { %5139 = vmatpush1.bf16.msra.mxu0 %v7382_v54  ;;  %5180 = vmatpush1.bf16.msra.mxu1 %v7385_v39 }
0x113e   : > { %5140 = vmatprep.subr.bf16.mxu0 %v7390_v41  ;;  %5181 = vmatprep.subr.bf16.mxu1 %v7393_v42 }
0x1141   : > { %5141 = vmatpush1.bf16.msra.mxu0 %v7388_v43  ;;  %5182 = vmatpush1.bf16.msra.mxu1 %v7391_v45 }
0x1142   : > { %5142 = vmatprep.subr.bf16.mxu0 %v7396_v46  ;;  %5183 = vmatprep.subr.bf16.mxu1 %v7399_v47 }
0x1145   : > { %5143 = vmatpush1.bf16.msra.mxu0 %v7394_v48  ;;  %5184 = vmatpush1.bf16.msra.mxu1 %v7397_v49 }
0x1146   : > { %5144 = vmatprep.subr.bf16.mxu0 %v7402_v50  ;;  %5185 = vmatprep.subr.bf16.mxu1 %v7405_v51  ;;  %v7431_v50 = vld [vmem:[#allocation8 + $0x8] sm:$0xff]   ;;  %v7432_v51 = vld [vmem:[#allocation8 + $0x10] sm:$0xff]  }
0x1149   : > { %5145 = vmatpush1.bf16.msra.mxu0 %v7400_v53  ;;  %5186 = vmatpush1.bf16.msra.mxu1 %v7403_v13  ;;  %v7434_v53 = vld [vmem:[#allocation8 + $0x20] sm:$0xff]   ;;  %v7435_v13 = vld [vmem:[#allocation8 + $0x28] sm:$0xff]  }
0x114a   : > { %5146 = vmatprep.subr.bf16.mxu0 %v7408_v58  ;;  %5187 = vmatprep.subr.bf16.mxu1 %v7411_v59  ;;  %v7436_v58 = vld [vmem:[#allocation8 + $0x30] sm:$0xff]   ;;  %v7437_v59 = vld [vmem:[#allocation8 + $0x38] sm:$0xff]  }
0x114d   : > { %5147 = vmatpush1.bf16.msra.mxu0 %v7406_v8  ;;  %5188 = vmatpush1.bf16.msra.mxu1 %v7409_v60  ;;  %v6149_v8 = vld [vmem:[%s8329_s2 + $0x4] sm:$0xf] }
0x114e   : > { %5148 = vmatprep.subr.bf16.mxu0 %v7414_v61  ;;  %5189 = vmatprep.subr.bf16.mxu1 %v7417_v62  ;;  %v4778_v60 = vrot.slane %v6149_v8, %v7994_v15 }
0x1151   : > { %5149 = vmatpush1.bf16.msra.mxu0 %v7412_v63  ;;  %5190 = vmatpush1.bf16.msra.mxu1 %v7415_v36  ;;  %v4782_v63 = vrot.slane %v6149_v8, %v7999_v17  ;;  %v4786_v17 = vrot.slane %v6149_v8, %v8005_v35 }
0x1152   : > { %5150 = vmatprep.subr.bf16.mxu0 %v7420_v0  ;;  %5191 = vmatprep.subr.bf16.mxu1 %v7423_v1 }
0x1155   : > { %5151 = vmatpush1.bf16.msra.mxu0 %v7418_v2  ;;  %5192 = vmatpush1.bf16.msra.mxu1 %v7421_v3 }
0x1156   : > { %5152 = vmatprep.subr.bf16.mxu0 %v7426_v4  ;;  %5193 = vmatprep.subr.bf16.mxu1 %v7429_v5 }
0x1159   : > { %5153 = vmatpush1.bf16.msra.mxu0 %v7424_v6  ;;  %5194 = vmatpush1.bf16.msra.mxu1 %v7427_v52 }
0x115a   : > { %6474 = vmatprep.subr.bf16.mxu0 %v7769_v56  ;;  %6494 = vmatprep.subr.bf16.mxu1 %v7769_v56 }
0x11ef   : > { %v4635_v27 = vpop.f32.mrb[36].mxu0  ;;  %v4676_v12 = vpop.f32.mrb[36].mxu1 }
0x11f0   : > { %v4636_v16 = vadd.f32 %v4635_v27, %v4257_v11  ;;  %v4637_v18 = vpop.f32.mrb[37].mxu0  ;;  %v4678_v55 = vpop.f32.mrb[37].mxu1  ;;  %v4677_v38 = vadd.f32 %v4676_v12, %v4265_v30  ;;  %v4790_v12 = vrot.slane %v6149_v8, %v8003_v34  ;;  %v6218_v34 = vld [vmem:[%s8331_s4] ss:$0 sm:$0xff] }
0x11f1   : > { %v4639_v19 = vpop.f32.mrb[38].mxu0  ;;  %v4680_v20 = vpop.f32.mrb[38].mxu1  ;;  %v4638_v24 = vadd.f32 %v4637_v18, %v4261_v14  ;;  %v4679_v32 = vadd.f32 %v4678_v55, %v4269_v57 }
0x11f2   : > { %v6147_v21 = vmul.f32 -1.442695, %v4636_v16  ;;  %v4640_v22 = vpop.f32.mrb[39].mxu0  ;;  %v4681_v23 = vpop.f32.mrb[39].mxu1 }
0x11f3   : > { %v6148_v25 = vmul.f32 -1.442695, %v4638_v24 }
0x11f4   : > { %7506 = vpow2.f32 %v6147_v21 }
0x11f5   : > { %7508 = vpow2.f32 %v6148_v25 }
0x11fe   : > { %v7507_v7 = vpop.eup %7506 }
0x11ff   : > { %v4686_v28 = vadd.f32 1.0, %v7507_v7  ;;  %v7509_v29 = vpop.eup %7508 }
0x1200   : > { %v4692_v31 = vadd.f32 1.0, %v7509_v29 }
0x1201   : > { %7510 = vrcp.f32 %v4686_v28 }
0x1202   : > { %7512 = vrcp.f32 %v4692_v31 }
0x120b   : > { %v7511_v33 = vpop.eup %7510 }
0x120c   : > { %v4695_v54 = vmul.f32 %v7511_v33, %v4679_v32  ;;  %v7513_v41 = vpop.eup %7512 }
0x120d   : > { %v4698_v42 = vsub.f32 1.0, %v7513_v41  ;;  %v4700_v45 = vmul.f32 %v7513_v41, %v8148_v26  ;;  %v7430_v26 = vld [vmem:[#allocation8] sm:$0xff]   ;;  %v7440_v41 = vld [vmem:[#allocation3 + $0x10] sm:$0xff]  }
0x120e   : > { %v4696_v39 = vadd.f32 %v4695_v54, %v4677_v38  ;;  %v7438_v54 = vld [vmem:[#allocation3] sm:$0xff]  }
0x1210   : > { %7514 = vtanh.f32 %v4696_v39  ;;  %v7439_v39 = vld [vmem:[#allocation3 + $0x8] sm:$0xff]  }
0x121a   : > { %v7515_v43 = vpop.eup %7514 }
0x121b   : > { %v4699_v46 = vmul.f32 %v7515_v43, %v4698_v42  ;;  %v7441_v42 = vld [vmem:[#allocation3 + $0x18] sm:$0xff]   ;;  %v7442_v43 = vld [vmem:[#allocation3 + $0x20] sm:$0xff]  }
0x121d   : > { %v4701_v47 = vadd.f32 %v4700_v45, %v4699_v46  ;;  %v7443_v45 = vld [vmem:[#allocation3 + $0x28] sm:$0xff]   ;;  %v7444_v46 = vld [vmem:[#allocation3 + $0x30] sm:$0xff]  }
0x121f   : > { %v6280_v48 = vpack.c.bf16 %v8177_v9, %v4701_v47  ;;  %4702 = vst [vmem:[#allocation12] sm:$0xff] %v4701_v47  ;;  %v7540_v49 = vpack.c.bf16 %v4701_v47, %v4701_v47 }
0x1221   : > { %6281 = vst [vmem:[#allocation2] sm:$0xff] %v6280_v48   ;;  %5155 = vmatmul.mubr.bf16.vlgmr.msra.gmra.mrb[40].mxu0 %v7540_v49  ;;  %5196 = vmatmul.mubr.bf16.vlgmr.msra.gmra.mrb[40].mxu1 %v7540_v49 }
0x1222   : > { %6490 = vmatprep.mubr.msk.bf16.mxu0 %vm7770_vm0, %v7769_v56  ;;  %6510 = vmatprep.mubr.msk.bf16.mxu1 %vm7770_vm0, %v7769_v56 }
0x1223   : > { %6475 = vmatpush3.bf16.msra.mxu0 %v7430_v26  ;;  %6495 = vmatpush3.bf16.msra.mxu1 %v7438_v54 }
0x1224   : > { %6476 = vmatprep.subr.bf16.mxu0 %v7769_v56  ;;  %6496 = vmatprep.subr.bf16.mxu1 %v7769_v56 }
0x1227   : > { %6477 = vmatpush3.bf16.msra.mxu0 %v7431_v50  ;;  %6497 = vmatpush3.bf16.msra.mxu1 %v7439_v39  ;;  %v7445_v50 = vld [vmem:[#allocation3 + $0x38] sm:$0xff]  }
0x1228   : > { %6478 = vmatprep.subr.bf16.mxu0 %v7769_v56  ;;  %6498 = vmatprep.subr.bf16.mxu1 %v7769_v56 }
0x122b   : > { %6479 = vmatpush3.bf16.msra.mxu0 %v7432_v51  ;;  %6499 = vmatpush3.bf16.msra.mxu1 %v7440_v41 }
0x122c   : > { %6480 = vmatprep.subr.bf16.mxu0 %v7769_v56  ;;  %6500 = vmatprep.subr.bf16.mxu1 %v7769_v56 }
0x122f   : > { %6481 = vmatpush3.bf16.msra.mxu0 %v7433_v10  ;;  %6501 = vmatpush3.bf16.msra.mxu1 %v7441_v42 }
0x1230   : > { %6482 = vmatprep.subr.bf16.mxu0 %v7769_v56  ;;  %6502 = vmatprep.subr.bf16.mxu1 %v7769_v56 }
0x1233   : > { %6483 = vmatpush3.bf16.msra.mxu0 %v7434_v53  ;;  %6503 = vmatpush3.bf16.msra.mxu1 %v7442_v43 }
0x1234   : > { %6484 = vmatprep.subr.bf16.mxu0 %v7769_v56  ;;  %6504 = vmatprep.subr.bf16.mxu1 %v7769_v56 }
0x1237   : > { %6485 = vmatpush3.bf16.msra.mxu0 %v7435_v13  ;;  %6505 = vmatpush3.bf16.msra.mxu1 %v7443_v45 }
0x1238   : > { %6486 = vmatprep.subr.bf16.mxu0 %v7769_v56  ;;  %6506 = vmatprep.subr.bf16.mxu1 %v7769_v56 }
0x123b   : > { %6487 = vmatpush3.bf16.msra.mxu0 %v7436_v58  ;;  %6507 = vmatpush3.bf16.msra.mxu1 %v7444_v46 }
0x123c   : > { %6488 = vmatprep.subr.bf16.mxu0 %v7769_v56  ;;  %6508 = vmatprep.subr.bf16.mxu1 %v7769_v56 }
0x123f   : > { %6489 = vmatpush3.bf16.msra.mxu0 %v7437_v59  ;;  %6509 = vmatpush3.bf16.msra.mxu1 %v7445_v50 }
0x12f4   : > { %v5156_v61 = vpop.f32.mrb[40].mxu0  ;;  %v5197_v62 = vpop.f32.mrb[40].mxu1 }
0x12f5   : > { %v5157_v36 = vadd.f32 %v5156_v61, %v4778_v60  ;;  %v5158_v0 = vpop.f32.mrb[41].mxu0  ;;  %v5199_v1 = vpop.f32.mrb[41].mxu1  ;;  %v5198_v55 = vadd.f32 %v5197_v62, %v4786_v17 }
0x12f6   : > { %v5160_v2 = vpop.f32.mrb[42].mxu0  ;;  %v5201_v3 = vpop.f32.mrb[42].mxu1  ;;  %v5159_v52 = vadd.f32 %v5158_v0, %v4782_v63  ;;  %v5200_v16 = vadd.f32 %v5199_v1, %v4790_v12 }
0x12f7   : > { %v6216_v4 = vmul.f32 -1.442695, %v5157_v36  ;;  %v5161_v5 = vpop.f32.mrb[43].mxu0  ;;  %v5202_v6 = vpop.f32.mrb[43].mxu1 }
0x12f8   : > { %v6217_v37 = vmul.f32 -1.442695, %v5159_v52 }
0x12f9   : > { %7516 = vpow2.f32 %v6216_v4 }
0x12fa   : > { %7518 = vpow2.f32 %v6217_v37 }
0x1303   : > { %v7517_v11 = vpop.eup %7516 }
0x1304   : > { %v5207_v27 = vadd.f32 1.0, %v7517_v11  ;;  %v7519_v15 = vpop.eup %7518 }
0x1305   : > { %v5213_v14 = vadd.f32 1.0, %v7519_v15 }
0x1306   : > { %7520 = vrcp.f32 %v5207_v27 }
0x1307   : > { %7522 = vrcp.f32 %v5213_v14 }
0x1310   : > { %v7521_v18 = vpop.eup %7520 }
0x1311   : > { %v5216_v19 = vmul.f32 %v7521_v18, %v5200_v16  ;;  %v7523_v21 = vpop.eup %7522 }
0x1312   : > { %v5219_v22 = vsub.f32 1.0, %v7523_v21  ;;  %v5221_v25 = vmul.f32 %v7523_v21, %v8177_v9 }
0x1313   : > { %v5217_v20 = vadd.f32 %v5216_v19, %v5198_v55 }
0x1315   : > { %7524 = vtanh.f32 %v5217_v20 }
0x131f   : > { %v7525_v23 = vpop.eup %7524 }
0x1320   : > { %v5220_v24 = vmul.f32 %v7525_v23, %v5219_v22 }
0x1322   : > { %v5222_v7 = vadd.f32 %v5221_v25, %v5220_v24 }
0x1324   : > { %v5224_v28 = vpack.c.bf16 %v5222_v7, %v5222_v7  ;;  %5223 = vst [vmem:[#allocation12 + $0x8] sm:$0xff] %v5222_v7 }
0x1326   : > { %6491 = vmatmul.mubr.bf16.vlgmr.msra.gmra.mrb[44].mxu0 %v5224_v28 }
0x13f9   : > { %v5330_v35 = vpop.f32.mrb[44].mxu0 }
0x13fa   : > { %v5331_v29 = vadd.f32 %v6218_v34, %v5330_v35  ;;  %v6492_v57 = vpop.f32.mrb[45].mxu0 }
0x13fb   : > { %v5333_v30 = vpop.f32.mrb[46].mxu0 }
0x13fc   : > { %6227 = vst [vmem:[%s7989_s29 + $0x18] sm:$0xff] %v5331_v29  ;;  %5338 = vmax.xlane.f32.xlu1 %v5331_v29  ;;  %v6493_v31 = vpop.f32.mrb[47].mxu0  ;;  %s7773_s29 = smov [#allocation11]  }
0x13fd   : > { %s7657_s8 = sshll.u32 %s7773_s29, 4  ;;  %s7658_s8 = int_to_ptr.vmem [resolvable:$false] %s7657_s8 }
0x13fe   : > { %s7659_s9 = scalar_lea.vmem %s7658_s8, 1024  ;;  %p7660_p8 = scmp.lt.s32.totalorder %s8257_s26, %s7658_s8 }
0x13ff   : > { %p7661_p12 = scmp.lt.s32.totalorder %s7659_s9, %s7653_s22 }
0x1401   : > { %p7662_p2 = por %p7661_p12, %p7660_p8 }
0x1403   : > { %p7663_p1 = pnand %p7662_p2, %p7656_p7 }
0x1489   : > { %v5339_v32 = vpop.xlane.xlu1 %5338 }
0x148a   : > { %vm5340_vm13 = vcmp.ge.f32.partialorder %v5331_v29, %v5339_v32 }
0x148b   : > { %v5341_v33 = vsel %vm5340_vm13, %v8054_v44, 128 }
0x148c   : > { %v5343_v9 = vshra.s32 %v5341_v33, 16  ;;  %v5342_v47 = vand.u32 65535, %v5341_v33 }
0x148e   : > { %v5345_v38 = vcvt.s32.f32 %v5343_v9  ;;  %v5344_v49 = vcvt.s32.f32 %v5342_v47 }
0x1490   : > { %5346 = vmin.xlane.f32.xlu0 %v5345_v38 }
0x151d   : > { %v5347_v48 = vpop.xlane.xlu0 %5346 }
0x151e   : > { %vm5348_vm14 = vcmp.eq.f32.partialorder %v5345_v38, %v5347_v48  ;;  %v5353_v51 = vcvt.f32.s32 %v5347_v48 }
0x151f   : > { %v5349_v26 = vsel %vm5348_vm14, %v5344_v49, inf }
0x1520   : > { %5350 = vmin.xlane.f32.xlu1 %v5349_v26  ;;  %v5354_v53 = vshll.u32 %v5353_v51, 16 }
0x15ad   : > { %v5351_v10 = vpop.xlane.xlu1 %5350 }
0x15ae   : > { %v5352_v13 = vcvt.f32.s32 %v5351_v10 }
0x15b0   : > { %v5355_v58 = vadd.s32 %v5354_v53, %v5352_v13 }
0x15b2   : > { %vm5356_vm15 = vcmp.eq.s32.totalorder %v8054_v44, %v5355_v58 }
0x15b3   : > { %vm6237_vm0 = vmpackc.low %vm5356_vm15, %vm5356_vm15 }
0x15b4   : > { %6511 = vmatmul.mubr.msk.bf16.vlgmr.msra.gmra.mrb[44].mxu1 %vm6237_vm0, %v7771_v40 }
0x15b5   : > { %7666 = shalt.err (!%p7663_p1)
}
0x15b6   : > { %s7667_s13 = scalar_lea.hbm %s8255_s1, 512  ;;  %s7671_s17 = scalar_lea.hbm %s8333_s6, 1024 }
0x15b7   : > { %p7668_p5 = scmp.ne.s32.totalorder %s8255_s1, %s7667_s13  ;;  %p7672_p10 = scmp.lt.u32.totalorder %s8255_s1, %s8333_s6 }
0x15b8   : > { %p7673_p13 = scmp.lt.u32.totalorder %s7671_s17, %s7667_s13  ;;  %p7675_p0 = scmp.lt.u32.totalorder %s7667_s13, %s8255_s1 }
0x15b9   : > { %p7669_p6 = pnand %p7668_p5, %p8357_p3 }
0x15ba   : > { %p7674_p11 = por %p7673_p13, %p7672_p10 }
0x15bb   : > { %p7670_p9 = pneg %p7669_p6 }
0x15bc   : > { %p7676_p4 = por %p7675_p0, %p7674_p11 }
0x15be   : > { %p7677_p7 = pnand %p7676_p4, %p7670_p9 }
0x15c0   : > { %7680 = shalt.err (!%p7677_p7)
}
0x15c1   : > { %s7774_s21 = smov 128   ;;  %s7775_s19 = smov 8  }
0x15c2   : > { %6530 = dma.vmem_to_hbm [thread:$0]  (%p8357_p3), %s8257_s26, 512, %s8255_s1, %s8263_s20, %s7774_s21, %s7774_s21, %s7775_s19  }
0x15c3   : > { %s7681_s16 = scalar_lea.vmem %s5494_s23, 256  ;;  %p8358_p12 = scmp.eq.s32.totalorder %s7837_s28, 1 }
0x15c4   : > { %p7682_p8 = scmp.ne.s32.totalorder %s5494_s23, %s7681_s16  ;;  %p7688_p5 = scmp.lt.s32.totalorder %s5494_s23, %s5494_s23 }
0x15c5   : > { %p7689_p6 = scmp.lt.s32.totalorder %s7681_s16, %s7681_s16 }
0x15c6   : > { %p7683_p2 = pnand %p7682_p8, %p8358_p12 }
0x15c7   : > { %p7690_p9 = por %p7689_p6, %p7688_p5 }
0x15c8   : > { %p7684_p1 = pneg %p7683_p2 }
0x15ca   : > { %p7691_p10 = pnand %p7690_p9, %p7684_p1 }
0x15cc   : > { %7694 = shalt.err (!%p7691_p10)
}
0x15cd   : > { %s7695_s8 = scalar_lea.hbm %s8334_s7, 256  ;;  %p8359_p13 = pmov %p8358_p12 }
0x15ce   : > { %p7696_p3 = scmp.ne.s32.totalorder %s8334_s7, %s7695_s8  ;;  %p7701_p4 = scmp.lt.u32.totalorder %s7695_s8, %s8334_s7 }
0x15d0   : > { %p7697_p11 = pnand %p7696_p3, %p8359_p13 }
0x15d2   : > { %p7698_p0 = pneg %p7697_p11 }
0x15d4   : > { %p7703_p7 = pnand %p7701_p4, %p7698_p0 }
0x15d6   : > { %7706 = shalt.err (!%p7703_p7)
}
0x15d7   : > { %p8360_p8 = pmov %p8358_p12 }
0x15d9   : > { %6532 = dma.vmem_to_hbm [thread:$0]  (%p8360_p8), %s5494_s23, 256, %s8334_s7, [#allocation13], %s7774_s21, %s7774_s21, %s7775_s19  }
0x15da   : > { %p8361_p12 = pmov %p8360_p8 }
0x1687   : > { %v5458_v56 = vpop.f32.mrb[44].mxu1 }
0x1688   : > { %v5464_v44 = vpack.c.bf16 %v5458_v56, %v5458_v56  ;;  %v6512_v40 = vpop.f32.mrb[45].mxu1 }
0x1689   : > { %v5461_v59 = vpop.f32.mrb[46].mxu1 }
0x168a   : > { %5465 = vst [vmem:[#allocation2] sm:$0xf] %v5464_v44  ;;  %v6513_v8 = vpop.f32.mrb[47].mxu1 }
0x168b   : > { %7736 = dma.done.wait (%p8361_p12), [#allocation13], 256   ;;  %p8362_p2 = pmov %p8360_p8 }
0x168d   : > { %7738 = vsyncadd (%p8362_p2), [#allocation13], 4294967040 }
0x168e PF: > { %p6563_p1 = scmp.ge.s32.totalorder %s7757_s27, 2  ;;  %s5512_s14 = sand.u32 1, %s7745_s24  }
0x168f   : > { %p8363_p5 = scmp.ne.s32.totalorder %s8344_s12, 0  ;;  %s5513_s23 = scalar_lea.sflag [#allocation5], %s5512_s14 }
0x1691   : > { %p6550_p6 = pnand %p6563_p1, %p8363_p5 }
0x1693   : > { %7740 = dma.done.wait (!%p6550_p6), %s5513_s23, 512  }
0x1694   : > { %7742 = vsyncadd (!%p6550_p6), %s5513_s23, 4294966784  ;;  %s8364_s15 = sld [smem:[#allocation19_spill]]  ;;  %s8365_s26 = sld [smem:[#allocation20_spill]] }
0x1695   : > { %p22_p9 = scmp.ge.s32.totalorder %s7841_s30, 4   ;;  %s8366_s24 = smov %s7749_s25 }
0x1696   : > { %s8368_s27 = smov %s7841_s30 }
0x1697   :  { %24 = sbr.rel (!%p22_p9) target bundleno = 9 (0x9), region = 111 }
0x169a   : > { %s8367_s25 = smov %s8364_s15 }
0x169e   :  { %5518 = vsyncpa [#allocation4], 1 }
0x169f   :  { %5520 = vsyncpa [#allocation4 + $0x1], 1 }
0x16a0   :  { %5521 = vsyncpa [#allocation7], 1 }
0x16a1   :  { %5522 = vsyncpa [#allocation10], 1 }
0x16a2   :  { %5523 = vsyncpa [#allocation5], 1 }
0x16a3   :  { %5525 = vsyncpa [#allocation5 + $0x1], 1 }
0x16a4   :  { %5526 = vsyncpa [#allocation13], 1 }

</bundles_post_ra>
